<compile_context>
chip_gen: v7x
topology: tpu7x:2x2x1
jax: 0.10.0
libtpu: 0.0.40
codegen_flags: <defaults>
</compile_context>

<pallas_src>
import math
import functools

import jax
import jax.numpy as jnp
from jax.experimental import pallas as pl
from jax.experimental.pallas import tpu as pltpu


def _mha_fusion_kernel(x_ref, wqkv_ref, bqkv_ref, wo_ref, bo_ref, o_ref,
                       *, num_heads: int):
    # x_ref block: (Bt, S, H) ; o_ref block: (Bt, H)
    x = x_ref[...]
    Bt, S, H = x.shape
    d = H // num_heads
    scale = 1.0 / math.sqrt(d)

    # ---- Fused QKV projection: one wide MXU matmul (N = 3H) + one bias add.
    x2 = x.reshape(Bt * S, H)
    qkv = jnp.dot(x2, wqkv_ref[...], preferred_element_type=jnp.float32)
    qkv = qkv + bqkv_ref[...]                               # (Bt*S, 3H)

    q = qkv[:, 0 * H:1 * H].reshape(Bt, S, H)
    k = qkv[:, 1 * H:2 * H].reshape(Bt, S, H)
    v = qkv[:, 2 * H:3 * H].reshape(Bt, S, H)

    # ---- Per-head attention, batched over the Bt batch block.
    # Each einsum is a 3-D contraction with a single leading batch dim (the
    # Mosaic-supported batched-matmul form).
    head_means = []
    for h in range(num_heads):
        qh = q[:, :, h * d:(h + 1) * d]                     # (Bt, S, d)
        kh = k[:, :, h * d:(h + 1) * d]
        vh = v[:, :, h * d:(h + 1) * d]
        s = jnp.einsum('bqd,bkd->bqk', qh, kh,
                       preferred_element_type=jnp.float32) * scale   # (Bt,S,S)
        s = s - jnp.max(s, axis=-1, keepdims=True)
        p = jnp.exp(s)
        # Softmax denominator via EUP reciprocal; normalization applied after
        # p@v so it touches (Bt,S,d) instead of (Bt,S,S).
        inv = pl.reciprocal(jnp.sum(p, axis=-1, keepdims=True), approx=True)
        ctx = jnp.einsum('bqk,bkd->bqd', p, vh,
                         preferred_element_type=jnp.float32) * inv    # (Bt,S,d)
        # Hoist mean(dim=1) per head (mean commutes with concat / linear ops).
        head_means.append(jnp.mean(ctx, axis=1))            # (Bt, d)
    attn_mean = jnp.concatenate(head_means, axis=-1)        # (Bt, H)

    # ---- mean_S(out_proj(attn) + x) == attn_mean @ Wo + bo + mean_S(x)
    x_mean = jnp.mean(x, axis=1)                            # (Bt, H)
    out = jnp.dot(attn_mean, wo_ref[...],
                  preferred_element_type=jnp.float32) + bo_ref[...] + x_mean
    o_ref[...] = out


def multi_slice_fusion(x, wqkv_t, bqkv, wo_t, bo, *, num_heads, block_b=None):
    """x: (B, S, H) float32.
       wqkv_t: (H, 3H) = [Wq^T | Wk^T | Wv^T], bqkv: (1, 3H),
       wo_t: (H, H), bo: (1, H).   Returns (B, H)."""
    B, S, H = x.shape
    if block_b is None:
        # Whole batch per grid step when small; otherwise 8-row (sublane-dense)
        # batch tiles so the output store stays unmasked.
        block_b = B if B <= 8 else (8 if B % 8 == 0 else B)
    assert B % block_b == 0, "batch must be divisible by the batch tile"

    kernel = functools.partial(_mha_fusion_kernel, num_heads=num_heads)

    return pl.pallas_call(
        kernel,
        out_shape=jax.ShapeDtypeStruct((B, H), jnp.float32),
        grid_spec=pltpu.PrefetchScalarGridSpec(
            num_scalar_prefetch=0,
            grid=(B // block_b,),
            in_specs=[
                pl.BlockSpec((block_b, S, H), lambda b: (b, 0, 0)),  # x
                pl.BlockSpec((H, 3 * H), lambda b: (0, 0)),          # Wqkv^T
                pl.BlockSpec((1, 3 * H), lambda b: (0, 0)),          # bqkv
                pl.BlockSpec((H, H), lambda b: (0, 0)),              # Wo^T
                pl.BlockSpec((1, H), lambda b: (0, 0)),              # bo
            ],
            out_specs=pl.BlockSpec((block_b, H), lambda b: (b, 0)),
        ),
        compiler_params=pltpu.CompilerParams(
            dimension_semantics=("parallel",)),
    )(x, wqkv_t, bqkv, wo_t, bo)


def reference(x, wqkv_t, bqkv, wo_t, bo, *, num_heads):
    """Pure-JAX reference matching torch.nn.MultiheadAttention semantics."""
    B, S, H = x.shape
    d = H // num_heads
    qkv = x @ wqkv_t + bqkv[0]
    q, k, v = qkv[..., 0:H], qkv[..., H:2 * H], qkv[..., 2 * H:3 * H]
    qh = q.reshape(B, S, num_heads, d)
    kh = k.reshape(B, S, num_heads, d)
    vh = v.reshape(B, S, num_heads, d)
    scores = jnp.einsum('bqhd,bkhd->bhqk', qh, kh) / math.sqrt(d)
    probs = jax.nn.softmax(scores, axis=-1)
    ctx = jnp.einsum('bhqk,bkhd->bqhd', probs, vh).reshape(B, S, H)
    out = ctx @ wo_t + bo[0]
    out = out + x
    return out.mean(axis=1)


if __name__ == "__main__":
    B, S, H = 2, 8, 64
    NUM_HEADS = 16                     # module default; H % 16 == 0

    key = jax.random.PRNGKey(0)
    kx, kin_w, kin_b, kout_w, kout_b = jax.random.split(key, 5)

    x = jax.random.normal(kx, (B, S, H), dtype=jnp.float32)

    # Deterministic synthetic parameters (shapes follow nn.MultiheadAttention):
    #   in_proj_weight: (3H, H), in_proj_bias: (3H,)
    #   out_proj.weight: (H, H), out_proj.bias: (H,)
    in_proj_w = jax.random.normal(kin_w, (3 * H, H), dtype=jnp.float32) * 0.05
    in_proj_b = jax.random.normal(kin_b, (3 * H,), dtype=jnp.float32) * 0.05
    out_proj_w = jax.random.normal(kout_w, (H, H), dtype=jnp.float32) * 0.05
    out_proj_b = jax.random.normal(kout_b, (H,), dtype=jnp.float32) * 0.05

    # Pre-transpose / fuse so the kernel computes x @ [Wq^T|Wk^T|Wv^T] + b.
    wqkv_t = in_proj_w.T                    # (H, 3H) = [Wq^T | Wk^T | Wv^T]
    bqkv = in_proj_b.reshape(1, 3 * H)
    wo_t = out_proj_w.T
    bo = out_proj_b.reshape(1, H)

    out = multi_slice_fusion(x, wqkv_t, bqkv, wo_t, bo, num_heads=NUM_HEADS)
    out = jax.block_until_ready(out)

    ref = reference(x, wqkv_t, bqkv, wo_t, bo, num_heads=NUM_HEADS)
    assert out.shape == (B, H)
    # Tolerance slightly loosened vs 1e-5 because the softmax denominator uses
    # the EUP approximate reciprocal (pl.reciprocal(approx=True)).
    assert jnp.allclose(out, ref, rtol=2e-3, atol=2e-3), "mismatch vs reference"

    print("KERNEL_OK")
</pallas_src>

<mosaic_0001>
module attributes {stable_mosaic.version = 11 : i64} {
  func.func @_mha_fusion_kernel(%arg0: i32, %arg1: memref<2x8x64xf32, #tpu.memory_space<vmem>>, %arg2: memref<64x192xf32, #tpu.memory_space<vmem>>, %arg3: memref<1x192xf32, #tpu.memory_space<vmem>>, %arg4: memref<64x64xf32, #tpu.memory_space<vmem>>, %arg5: memref<1x64xf32, #tpu.memory_space<vmem>>, %arg6: memref<2x64xf32, #tpu.memory_space<vmem>>) attributes {dimension_semantics = [#tpu.dimension_semantics<parallel>], iteration_bounds = array<i64: 1>, scalar_prefetch = 0 : i64, scratch_operands = 0 : i64, tpu.core_type = #tpu.core_type<tc>, window_params = [{transform_indices = @transform_0, window_bounds = array<i64: 2, 8, 64>}, {pipeline_mode = #tpu.pipeline_mode<synchronous>, transform_indices = @transform_1, window_bounds = array<i64: 64, 192>}, {pipeline_mode = #tpu.pipeline_mode<synchronous>, transform_indices = @transform_2, window_bounds = array<i64: 1, 192>}, {pipeline_mode = #tpu.pipeline_mode<synchronous>, transform_indices = @transform_3, window_bounds = array<i64: 64, 64>}, {pipeline_mode = #tpu.pipeline_mode<synchronous>, transform_indices = @transform_4, window_bounds = array<i64: 1, 64>}, {transform_indices = @transform_5, window_bounds = array<i64: 2, 64>}]} {
    %c0 = arith.constant 0 : index
    %c0_0 = arith.constant 0 : index
    %c0_1 = arith.constant 0 : index
    %0 = vector.load %arg1[%c0, %c0_0, %c0_1] : memref<2x8x64xf32, #tpu.memory_space<vmem>>, vector<2x8x64xf32>
    %1 = vector.shape_cast %0 : vector<2x8x64xf32> to vector<16x64xf32>
    %c0_2 = arith.constant 0 : index
    %c0_3 = arith.constant 0 : index
    %2 = vector.load %arg2[%c0_2, %c0_3] : memref<64x192xf32, #tpu.memory_space<vmem>>, vector<64x192xf32>
    %cst = arith.constant dense<0.000000e+00> : vector<16x192xf32>
    %3 = tpu.matmul %1, %2, %cst {dimension_numbers = #tpu.dot_dimension_numbers<[1], [0], [0], [1], [0, 0, 1, 1], [], []>} : vector<16x64xf32>, vector<64x192xf32>, vector<16x192xf32> -> vector<16x192xf32>
    %c0_4 = arith.constant 0 : index
    %c0_5 = arith.constant 0 : index
    %4 = vector.load %arg3[%c0_4, %c0_5] : memref<1x192xf32, #tpu.memory_space<vmem>>, vector<1x192xf32>
    %5 = vector.broadcast %4 : vector<1x192xf32> to vector<16x192xf32>
    %6 = arith.addf %3, %5 : vector<16x192xf32>
    %7 = vector.extract_strided_slice %6 {offsets = [0, 0], sizes = [16, 64], strides = [1, 1]} : vector<16x192xf32> to vector<16x64xf32>
    %8 = vector.shape_cast %7 : vector<16x64xf32> to vector<2x8x64xf32>
    %9 = vector.extract_strided_slice %6 {offsets = [0, 64], sizes = [16, 64], strides = [1, 1]} : vector<16x192xf32> to vector<16x64xf32>
    %10 = vector.shape_cast %9 : vector<16x64xf32> to vector<2x8x64xf32>
    %11 = vector.extract_strided_slice %6 {offsets = [0, 128], sizes = [16, 64], strides = [1, 1]} : vector<16x192xf32> to vector<16x64xf32>
    %12 = vector.shape_cast %11 : vector<16x64xf32> to vector<2x8x64xf32>
    %13 = vector.extract_strided_slice %8 {offsets = [0, 0, 0], sizes = [2, 8, 4], strides = [1, 1, 1]} : vector<2x8x64xf32> to vector<2x8x4xf32>
    %14 = vector.extract_strided_slice %10 {offsets = [0, 0, 0], sizes = [2, 8, 4], strides = [1, 1, 1]} : vector<2x8x64xf32> to vector<2x8x4xf32>
    %15 = vector.extract_strided_slice %12 {offsets = [0, 0, 0], sizes = [2, 8, 4], strides = [1, 1, 1]} : vector<2x8x64xf32> to vector<2x8x4xf32>
    "tpu.trace_start"() <{level = 10 : i32, message = "bqd,bkd->bqk"}> : () -> ()
    %cst_6 = arith.constant dense<0.000000e+00> : vector<2x8x8xf32>
    %16 = tpu.matmul %13, %14, %cst_6 {dimension_numbers = #tpu.dot_dimension_numbers<[2], [2], [1], [1], [0, 0, 0, 1, 1, 1], [0], [0]>} : vector<2x8x4xf32>, vector<2x8x4xf32>, vector<2x8x8xf32> -> vector<2x8x8xf32>
    "tpu.trace_stop"() : () -> ()
    %cst_7 = arith.constant 5.000000e-01 : f32
    %17 = vector.broadcast %cst_7 : f32 to vector<2x8x8xf32>
    %18 = arith.mulf %16, %17 : vector<2x8x8xf32>
    %cst_8 = arith.constant dense<0xFF800000> : vector<2x8xf32>
    %19 = vector.multi_reduction <maximumf>, %18, %cst_8 [2] : vector<2x8x8xf32> to vector<2x8xf32>
    %20 = vector.shape_cast %19 : vector<2x8xf32> to vector<2x8x1xf32>
    %21 = vector.broadcast %20 : vector<2x8x1xf32> to vector<2x8x8xf32>
    %22 = arith.subf %18, %21 : vector<2x8x8xf32>
    %23 = math.exp %22 : vector<2x8x8xf32>
    %cst_9 = arith.constant dense<0.000000e+00> : vector<2x8xf32>
    %24 = vector.multi_reduction <add>, %23, %cst_9 [2] : vector<2x8x8xf32> to vector<2x8xf32>
    %25 = vector.shape_cast %24 : vector<2x8xf32> to vector<2x8x1xf32>
    %26 = tpu.reciprocal %25 {approx = true} : vector<2x8x1xf32> -> vector<2x8x1xf32>
    "tpu.trace_start"() <{level = 10 : i32, message = "bqk,bkd->bqd"}> : () -> ()
    %cst_10 = arith.constant dense<0.000000e+00> : vector<2x8x4xf32>
    %27 = tpu.matmul %23, %15, %cst_10 {dimension_numbers = #tpu.dot_dimension_numbers<[2], [1], [1], [2], [0, 0, 0, 1, 1, 2], [0], [0]>} : vector<2x8x8xf32>, vector<2x8x4xf32>, vector<2x8x4xf32> -> vector<2x8x4xf32>
    "tpu.trace_stop"() : () -> ()
    %28 = vector.broadcast %26 : vector<2x8x1xf32> to vector<2x8x4xf32>
    %29 = arith.mulf %27, %28 : vector<2x8x4xf32>
    %cst_11 = arith.constant dense<0.000000e+00> : vector<2x4xf32>
    %30 = vector.multi_reduction <add>, %29, %cst_11 [1] : vector<2x8x4xf32> to vector<2x4xf32>
    %cst_12 = arith.constant 8.000000e+00 : f32
    %31 = vector.broadcast %cst_12 : f32 to vector<2x4xf32>
    %32 = arith.divf %30, %31 : vector<2x4xf32>
    %33 = vector.extract_strided_slice %8 {offsets = [0, 0, 4], sizes = [2, 8, 4], strides = [1, 1, 1]} : vector<2x8x64xf32> to vector<2x8x4xf32>
    %34 = vector.extract_strided_slice %10 {offsets = [0, 0, 4], sizes = [2, 8, 4], strides = [1, 1, 1]} : vector<2x8x64xf32> to vector<2x8x4xf32>
    %35 = vector.extract_strided_slice %12 {offsets = [0, 0, 4], sizes = [2, 8, 4], strides = [1, 1, 1]} : vector<2x8x64xf32> to vector<2x8x4xf32>
    "tpu.trace_start"() <{level = 10 : i32, message = "bqd,bkd->bqk"}> : () -> ()
    %cst_13 = arith.constant dense<0.000000e+00> : vector<2x8x8xf32>
    %36 = tpu.matmul %33, %34, %cst_13 {dimension_numbers = #tpu.dot_dimension_numbers<[2], [2], [1], [1], [0, 0, 0, 1, 1, 1], [0], [0]>} : vector<2x8x4xf32>, vector<2x8x4xf32>, vector<2x8x8xf32> -> vector<2x8x8xf32>
    "tpu.trace_stop"() : () -> ()
    %cst_14 = arith.constant 5.000000e-01 : f32
    %37 = vector.broadcast %cst_14 : f32 to vector<2x8x8xf32>
    %38 = arith.mulf %36, %37 : vector<2x8x8xf32>
    %cst_15 = arith.constant dense<0xFF800000> : vector<2x8xf32>
    %39 = vector.multi_reduction <maximumf>, %38, %cst_15 [2] : vector<2x8x8xf32> to vector<2x8xf32>
    %40 = vector.shape_cast %39 : vector<2x8xf32> to vector<2x8x1xf32>
    %41 = vector.broadcast %40 : vector<2x8x1xf32> to vector<2x8x8xf32>
    %42 = arith.subf %38, %41 : vector<2x8x8xf32>
    %43 = math.exp %42 : vector<2x8x8xf32>
    %cst_16 = arith.constant dense<0.000000e+00> : vector<2x8xf32>
    %44 = vector.multi_reduction <add>, %43, %cst_16 [2] : vector<2x8x8xf32> to vector<2x8xf32>
    %45 = vector.shape_cast %44 : vector<2x8xf32> to vector<2x8x1xf32>
    %46 = tpu.reciprocal %45 {approx = true} : vector<2x8x1xf32> -> vector<2x8x1xf32>
    "tpu.trace_start"() <{level = 10 : i32, message = "bqk,bkd->bqd"}> : () -> ()
    %cst_17 = arith.constant dense<0.000000e+00> : vector<2x8x4xf32>
    %47 = tpu.matmul %43, %35, %cst_17 {dimension_numbers = #tpu.dot_dimension_numbers<[2], [1], [1], [2], [0, 0, 0, 1, 1, 2], [0], [0]>} : vector<2x8x8xf32>, vector<2x8x4xf32>, vector<2x8x4xf32> -> vector<2x8x4xf32>
    "tpu.trace_stop"() : () -> ()
    %48 = vector.broadcast %46 : vector<2x8x1xf32> to vector<2x8x4xf32>
    %49 = arith.mulf %47, %48 : vector<2x8x4xf32>
    %cst_18 = arith.constant dense<0.000000e+00> : vector<2x4xf32>
    %50 = vector.multi_reduction <add>, %49, %cst_18 [1] : vector<2x8x4xf32> to vector<2x4xf32>
    %cst_19 = arith.constant 8.000000e+00 : f32
    %51 = vector.broadcast %cst_19 : f32 to vector<2x4xf32>
    %52 = arith.divf %50, %51 : vector<2x4xf32>
    %53 = vector.extract_strided_slice %8 {offsets = [0, 0, 8], sizes = [2, 8, 4], strides = [1, 1, 1]} : vector<2x8x64xf32> to vector<2x8x4xf32>
    %54 = vector.extract_strided_slice %10 {offsets = [0, 0, 8], sizes = [2, 8, 4], strides = [1, 1, 1]} : vector<2x8x64xf32> to vector<2x8x4xf32>
    %55 = vector.extract_strided_slice %12 {offsets = [0, 0, 8], sizes = [2, 8, 4], strides = [1, 1, 1]} : vector<2x8x64xf32> to vector<2x8x4xf32>
    "tpu.trace_start"() <{level = 10 : i32, message = "bqd,bkd->bqk"}> : () -> ()
    %cst_20 = arith.constant dense<0.000000e+00> : vector<2x8x8xf32>
    %56 = tpu.matmul %53, %54, %cst_20 {dimension_numbers = #tpu.dot_dimension_numbers<[2], [2], [1], [1], [0, 0, 0, 1, 1, 1], [0], [0]>} : vector<2x8x4xf32>, vector<2x8x4xf32>, vector<2x8x8xf32> -> vector<2x8x8xf32>
    "tpu.trace_stop"() : () -> ()
    %cst_21 = arith.constant 5.000000e-01 : f32
    %57 = vector.broadcast %cst_21 : f32 to vector<2x8x8xf32>
    %58 = arith.mulf %56, %57 : vector<2x8x8xf32>
    %cst_22 = arith.constant dense<0xFF800000> : vector<2x8xf32>
    %59 = vector.multi_reduction <maximumf>, %58, %cst_22 [2] : vector<2x8x8xf32> to vector<2x8xf32>
    %60 = vector.shape_cast %59 : vector<2x8xf32> to vector<2x8x1xf32>
    %61 = vector.broadcast %60 : vector<2x8x1xf32> to vector<2x8x8xf32>
    %62 = arith.subf %58, %61 : vector<2x8x8xf32>
    %63 = math.exp %62 : vector<2x8x8xf32>
    %cst_23 = arith.constant dense<0.000000e+00> : vector<2x8xf32>
    %64 = vector.multi_reduction <add>, %63, %cst_23 [2] : vector<2x8x8xf32> to vector<2x8xf32>
    %65 = vector.shape_cast %64 : vector<2x8xf32> to vector<2x8x1xf32>
    %66 = tpu.reciprocal %65 {approx = true} : vector<2x8x1xf32> -> vector<2x8x1xf32>
    "tpu.trace_start"() <{level = 10 : i32, message = "bqk,bkd->bqd"}> : () -> ()
    %cst_24 = arith.constant dense<0.000000e+00> : vector<2x8x4xf32>
    %67 = tpu.matmul %63, %55, %cst_24 {dimension_numbers = #tpu.dot_dimension_numbers<[2], [1], [1], [2], [0, 0, 0, 1, 1, 2], [0], [0]>} : vector<2x8x8xf32>, vector<2x8x4xf32>, vector<2x8x4xf32> -> vector<2x8x4xf32>
    "tpu.trace_stop"() : () -> ()
    %68 = vector.broadcast %66 : vector<2x8x1xf32> to vector<2x8x4xf32>
    %69 = arith.mulf %67, %68 : vector<2x8x4xf32>
    %cst_25 = arith.constant dense<0.000000e+00> : vector<2x4xf32>
    %70 = vector.multi_reduction <add>, %69, %cst_25 [1] : vector<2x8x4xf32> to vector<2x4xf32>
    %cst_26 = arith.constant 8.000000e+00 : f32
    %71 = vector.broadcast %cst_26 : f32 to vector<2x4xf32>
    %72 = arith.divf %70, %71 : vector<2x4xf32>
    %73 = vector.extract_strided_slice %8 {offsets = [0, 0, 12], sizes = [2, 8, 4], strides = [1, 1, 1]} : vector<2x8x64xf32> to vector<2x8x4xf32>
    %74 = vector.extract_strided_slice %10 {offsets = [0, 0, 12], sizes = [2, 8, 4], strides = [1, 1, 1]} : vector<2x8x64xf32> to vector<2x8x4xf32>
    %75 = vector.extract_strided_slice %12 {offsets = [0, 0, 12], sizes = [2, 8, 4], strides = [1, 1, 1]} : vector<2x8x64xf32> to vector<2x8x4xf32>
    "tpu.trace_start"() <{level = 10 : i32, message = "bqd,bkd->bqk"}> : () -> ()
    %cst_27 = arith.constant dense<0.000000e+00> : vector<2x8x8xf32>
    %76 = tpu.matmul %73, %74, %cst_27 {dimension_numbers = #tpu.dot_dimension_numbers<[2], [2], [1], [1], [0, 0, 0, 1, 1, 1], [0], [0]>} : vector<2x8x4xf32>, vector<2x8x4xf32>, vector<2x8x8xf32> -> vector<2x8x8xf32>
    "tpu.trace_stop"() : () -> ()
    %cst_28 = arith.constant 5.000000e-01 : f32
    %77 = vector.broadcast %cst_28 : f32 to vector<2x8x8xf32>
    %78 = arith.mulf %76, %77 : vector<2x8x8xf32>
    %cst_29 = arith.constant dense<0xFF800000> : vector<2x8xf32>
    %79 = vector.multi_reduction <maximumf>, %78, %cst_29 [2] : vector<2x8x8xf32> to vector<2x8xf32>
    %80 = vector.shape_cast %79 : vector<2x8xf32> to vector<2x8x1xf32>
    %81 = vector.broadcast %80 : vector<2x8x1xf32> to vector<2x8x8xf32>
    %82 = arith.subf %78, %81 : vector<2x8x8xf32>
    %83 = math.exp %82 : vector<2x8x8xf32>
    %cst_30 = arith.constant dense<0.000000e+00> : vector<2x8xf32>
    %84 = vector.multi_reduction <add>, %83, %cst_30 [2] : vector<2x8x8xf32> to vector<2x8xf32>
    %85 = vector.shape_cast %84 : vector<2x8xf32> to vector<2x8x1xf32>
    %86 = tpu.reciprocal %85 {approx = true} : vector<2x8x1xf32> -> vector<2x8x1xf32>
    "tpu.trace_start"() <{level = 10 : i32, message = "bqk,bkd->bqd"}> : () -> ()
    %cst_31 = arith.constant dense<0.000000e+00> : vector<2x8x4xf32>
    %87 = tpu.matmul %83, %75, %cst_31 {dimension_numbers = #tpu.dot_dimension_numbers<[2], [1], [1], [2], [0, 0, 0, 1, 1, 2], [0], [0]>} : vector<2x8x8xf32>, vector<2x8x4xf32>, vector<2x8x4xf32> -> vector<2x8x4xf32>
    "tpu.trace_stop"() : () -> ()
    %88 = vector.broadcast %86 : vector<2x8x1xf32> to vector<2x8x4xf32>
    %89 = arith.mulf %87, %88 : vector<2x8x4xf32>
    %cst_32 = arith.constant dense<0.000000e+00> : vector<2x4xf32>
    %90 = vector.multi_reduction <add>, %89, %cst_32 [1] : vector<2x8x4xf32> to vector<2x4xf32>
    %cst_33 = arith.constant 8.000000e+00 : f32
    %91 = vector.broadcast %cst_33 : f32 to vector<2x4xf32>
    %92 = arith.divf %90, %91 : vector<2x4xf32>
    %93 = vector.extract_strided_slice %8 {offsets = [0, 0, 16], sizes = [2, 8, 4], strides = [1, 1, 1]} : vector<2x8x64xf32> to vector<2x8x4xf32>
    %94 = vector.extract_strided_slice %10 {offsets = [0, 0, 16], sizes = [2, 8, 4], strides = [1, 1, 1]} : vector<2x8x64xf32> to vector<2x8x4xf32>
    %95 = vector.extract_strided_slice %12 {offsets = [0, 0, 16], sizes = [2, 8, 4], strides = [1, 1, 1]} : vector<2x8x64xf32> to vector<2x8x4xf32>
    "tpu.trace_start"() <{level = 10 : i32, message = "bqd,bkd->bqk"}> : () -> ()
    %cst_34 = arith.constant dense<0.000000e+00> : vector<2x8x8xf32>
    %96 = tpu.matmul %93, %94, %cst_34 {dimension_numbers = #tpu.dot_dimension_numbers<[2], [2], [1], [1], [0, 0, 0, 1, 1, 1], [0], [0]>} : vector<2x8x4xf32>, vector<2x8x4xf32>, vector<2x8x8xf32> -> vector<2x8x8xf32>
    "tpu.trace_stop"() : () -> ()
    %cst_35 = arith.constant 5.000000e-01 : f32
    %97 = vector.broadcast %cst_35 : f32 to vector<2x8x8xf32>
    %98 = arith.mulf %96, %97 : vector<2x8x8xf32>
    %cst_36 = arith.constant dense<0xFF800000> : vector<2x8xf32>
    %99 = vector.multi_reduction <maximumf>, %98, %cst_36 [2] : vector<2x8x8xf32> to vector<2x8xf32>
    %100 = vector.shape_cast %99 : vector<2x8xf32> to vector<2x8x1xf32>
    %101 = vector.broadcast %100 : vector<2x8x1xf32> to vector<2x8x8xf32>
    %102 = arith.subf %98, %101 : vector<2x8x8xf32>
    %103 = math.exp %102 : vector<2x8x8xf32>
    %cst_37 = arith.constant dense<0.000000e+00> : vector<2x8xf32>
    %104 = vector.multi_reduction <add>, %103, %cst_37 [2] : vector<2x8x8xf32> to vector<2x8xf32>
    %105 = vector.shape_cast %104 : vector<2x8xf32> to vector<2x8x1xf32>
    %106 = tpu.reciprocal %105 {approx = true} : vector<2x8x1xf32> -> vector<2x8x1xf32>
    "tpu.trace_start"() <{level = 10 : i32, message = "bqk,bkd->bqd"}> : () -> ()
    %cst_38 = arith.constant dense<0.000000e+00> : vector<2x8x4xf32>
    %107 = tpu.matmul %103, %95, %cst_38 {dimension_numbers = #tpu.dot_dimension_numbers<[2], [1], [1], [2], [0, 0, 0, 1, 1, 2], [0], [0]>} : vector<2x8x8xf32>, vector<2x8x4xf32>, vector<2x8x4xf32> -> vector<2x8x4xf32>
    "tpu.trace_stop"() : () -> ()
    %108 = vector.broadcast %106 : vector<2x8x1xf32> to vector<2x8x4xf32>
    %109 = arith.mulf %107, %108 : vector<2x8x4xf32>
    %cst_39 = arith.constant dense<0.000000e+00> : vector<2x4xf32>
    %110 = vector.multi_reduction <add>, %109, %cst_39 [1] : vector<2x8x4xf32> to vector<2x4xf32>
    %cst_40 = arith.constant 8.000000e+00 : f32
    %111 = vector.broadcast %cst_40 : f32 to vector<2x4xf32>
    %112 = arith.divf %110, %111 : vector<2x4xf32>
    %113 = vector.extract_strided_slice %8 {offsets = [0, 0, 20], sizes = [2, 8, 4], strides = [1, 1, 1]} : vector<2x8x64xf32> to vector<2x8x4xf32>
    %114 = vector.extract_strided_slice %10 {offsets = [0, 0, 20], sizes = [2, 8, 4], strides = [1, 1, 1]} : vector<2x8x64xf32> to vector<2x8x4xf32>
    %115 = vector.extract_strided_slice %12 {offsets = [0, 0, 20], sizes = [2, 8, 4], strides = [1, 1, 1]} : vector<2x8x64xf32> to vector<2x8x4xf32>
    "tpu.trace_start"() <{level = 10 : i32, message = "bqd,bkd->bqk"}> : () -> ()
    %cst_41 = arith.constant dense<0.000000e+00> : vector<2x8x8xf32>
    %116 = tpu.matmul %113, %114, %cst_41 {dimension_numbers = #tpu.dot_dimension_numbers<[2], [2], [1], [1], [0, 0, 0, 1, 1, 1], [0], [0]>} : vector<2x8x4xf32>, vector<2x8x4xf32>, vector<2x8x8xf32> -> vector<2x8x8xf32>
    "tpu.trace_stop"() : () -> ()
    %cst_42 = arith.constant 5.000000e-01 : f32
    %117 = vector.broadcast %cst_42 : f32 to vector<2x8x8xf32>
    %118 = arith.mulf %116, %117 : vector<2x8x8xf32>
    %cst_43 = arith.constant dense<0xFF800000> : vector<2x8xf32>
    %119 = vector.multi_reduction <maximumf>, %118, %cst_43 [2] : vector<2x8x8xf32> to vector<2x8xf32>
    %120 = vector.shape_cast %119 : vector<2x8xf32> to vector<2x8x1xf32>
    %121 = vector.broadcast %120 : vector<2x8x1xf32> to vector<2x8x8xf32>
    %122 = arith.subf %118, %121 : vector<2x8x8xf32>
    %123 = math.exp %122 : vector<2x8x8xf32>
    %cst_44 = arith.constant dense<0.000000e+00> : vector<2x8xf32>
    %124 = vector.multi_reduction <add>, %123, %cst_44 [2] : vector<2x8x8xf32> to vector<2x8xf32>
    %125 = vector.shape_cast %124 : vector<2x8xf32> to vector<2x8x1xf32>
    %126 = tpu.reciprocal %125 {approx = true} : vector<2x8x1xf32> -> vector<2x8x1xf32>
    "tpu.trace_start"() <{level = 10 : i32, message = "bqk,bkd->bqd"}> : () -> ()
    %cst_45 = arith.constant dense<0.000000e+00> : vector<2x8x4xf32>
    %127 = tpu.matmul %123, %115, %cst_45 {dimension_numbers = #tpu.dot_dimension_numbers<[2], [1], [1], [2], [0, 0, 0, 1, 1, 2], [0], [0]>} : vector<2x8x8xf32>, vector<2x8x4xf32>, vector<2x8x4xf32> -> vector<2x8x4xf32>
    "tpu.trace_stop"() : () -> ()
    %128 = vector.broadcast %126 : vector<2x8x1xf32> to vector<2x8x4xf32>
    %129 = arith.mulf %127, %128 : vector<2x8x4xf32>
    %cst_46 = arith.constant dense<0.000000e+00> : vector<2x4xf32>
    %130 = vector.multi_reduction <add>, %129, %cst_46 [1] : vector<2x8x4xf32> to vector<2x4xf32>
    %cst_47 = arith.constant 8.000000e+00 : f32
    %131 = vector.broadcast %cst_47 : f32 to vector<2x4xf32>
    %132 = arith.divf %130, %131 : vector<2x4xf32>
    %133 = vector.extract_strided_slice %8 {offsets = [0, 0, 24], sizes = [2, 8, 4], strides = [1, 1, 1]} : vector<2x8x64xf32> to vector<2x8x4xf32>
    %134 = vector.extract_strided_slice %10 {offsets = [0, 0, 24], sizes = [2, 8, 4], strides = [1, 1, 1]} : vector<2x8x64xf32> to vector<2x8x4xf32>
    %135 = vector.extract_strided_slice %12 {offsets = [0, 0, 24], sizes = [2, 8, 4], strides = [1, 1, 1]} : vector<2x8x64xf32> to vector<2x8x4xf32>
    "tpu.trace_start"() <{level = 10 : i32, message = "bqd,bkd->bqk"}> : () -> ()
    %cst_48 = arith.constant dense<0.000000e+00> : vector<2x8x8xf32>
    %136 = tpu.matmul %133, %134, %cst_48 {dimension_numbers = #tpu.dot_dimension_numbers<[2], [2], [1], [1], [0, 0, 0, 1, 1, 1], [0], [0]>} : vector<2x8x4xf32>, vector<2x8x4xf32>, vector<2x8x8xf32> -> vector<2x8x8xf32>
    "tpu.trace_stop"() : () -> ()
    %cst_49 = arith.constant 5.000000e-01 : f32
    %137 = vector.broadcast %cst_49 : f32 to vector<2x8x8xf32>
    %138 = arith.mulf %136, %137 : vector<2x8x8xf32>
    %cst_50 = arith.constant dense<0xFF800000> : vector<2x8xf32>
    %139 = vector.multi_reduction <maximumf>, %138, %cst_50 [2] : vector<2x8x8xf32> to vector<2x8xf32>
    %140 = vector.shape_cast %139 : vector<2x8xf32> to vector<2x8x1xf32>
    %141 = vector.broadcast %140 : vector<2x8x1xf32> to vector<2x8x8xf32>
    %142 = arith.subf %138, %141 : vector<2x8x8xf32>
    %143 = math.exp %142 : vector<2x8x8xf32>
    %cst_51 = arith.constant dense<0.000000e+00> : vector<2x8xf32>
    %144 = vector.multi_reduction <add>, %143, %cst_51 [2] : vector<2x8x8xf32> to vector<2x8xf32>
    %145 = vector.shape_cast %144 : vector<2x8xf32> to vector<2x8x1xf32>
    %146 = tpu.reciprocal %145 {approx = true} : vector<2x8x1xf32> -> vector<2x8x1xf32>
    "tpu.trace_start"() <{level = 10 : i32, message = "bqk,bkd->bqd"}> : () -> ()
    %cst_52 = arith.constant dense<0.000000e+00> : vector<2x8x4xf32>
    %147 = tpu.matmul %143, %135, %cst_52 {dimension_numbers = #tpu.dot_dimension_numbers<[2], [1], [1], [2], [0, 0, 0, 1, 1, 2], [0], [0]>} : vector<2x8x8xf32>, vector<2x8x4xf32>, vector<2x8x4xf32> -> vector<2x8x4xf32>
    "tpu.trace_stop"() : () -> ()
    %148 = vector.broadcast %146 : vector<2x8x1xf32> to vector<2x8x4xf32>
    %149 = arith.mulf %147, %148 : vector<2x8x4xf32>
    %cst_53 = arith.constant dense<0.000000e+00> : vector<2x4xf32>
    %150 = vector.multi_reduction <add>, %149, %cst_53 [1] : vector<2x8x4xf32> to vector<2x4xf32>
    %cst_54 = arith.constant 8.000000e+00 : f32
    %151 = vector.broadcast %cst_54 : f32 to vector<2x4xf32>
    %152 = arith.divf %150, %151 : vector<2x4xf32>
    %153 = vector.extract_strided_slice %8 {offsets = [0, 0, 28], sizes = [2, 8, 4], strides = [1, 1, 1]} : vector<2x8x64xf32> to vector<2x8x4xf32>
    %154 = vector.extract_strided_slice %10 {offsets = [0, 0, 28], sizes = [2, 8, 4], strides = [1, 1, 1]} : vector<2x8x64xf32> to vector<2x8x4xf32>
    %155 = vector.extract_strided_slice %12 {offsets = [0, 0, 28], sizes = [2, 8, 4], strides = [1, 1, 1]} : vector<2x8x64xf32> to vector<2x8x4xf32>
    "tpu.trace_start"() <{level = 10 : i32, message = "bqd,bkd->bqk"}> : () -> ()
    %cst_55 = arith.constant dense<0.000000e+00> : vector<2x8x8xf32>
    %156 = tpu.matmul %153, %154, %cst_55 {dimension_numbers = #tpu.dot_dimension_numbers<[2], [2], [1], [1], [0, 0, 0, 1, 1, 1], [0], [0]>} : vector<2x8x4xf32>, vector<2x8x4xf32>, vector<2x8x8xf32> -> vector<2x8x8xf32>
    "tpu.trace_stop"() : () -> ()
    %cst_56 = arith.constant 5.000000e-01 : f32
    %157 = vector.broadcast %cst_56 : f32 to vector<2x8x8xf32>
    %158 = arith.mulf %156, %157 : vector<2x8x8xf32>
    %cst_57 = arith.constant dense<0xFF800000> : vector<2x8xf32>
    %159 = vector.multi_reduction <maximumf>, %158, %cst_57 [2] : vector<2x8x8xf32> to vector<2x8xf32>
    %160 = vector.shape_cast %159 : vector<2x8xf32> to vector<2x8x1xf32>
    %161 = vector.broadcast %160 : vector<2x8x1xf32> to vector<2x8x8xf32>
    %162 = arith.subf %158, %161 : vector<2x8x8xf32>
    %163 = math.exp %162 : vector<2x8x8xf32>
    %cst_58 = arith.constant dense<0.000000e+00> : vector<2x8xf32>
    %164 = vector.multi_reduction <add>, %163, %cst_58 [2] : vector<2x8x8xf32> to vector<2x8xf32>
    %165 = vector.shape_cast %164 : vector<2x8xf32> to vector<2x8x1xf32>
    %166 = tpu.reciprocal %165 {approx = true} : vector<2x8x1xf32> -> vector<2x8x1xf32>
    "tpu.trace_start"() <{level = 10 : i32, message = "bqk,bkd->bqd"}> : () -> ()
    %cst_59 = arith.constant dense<0.000000e+00> : vector<2x8x4xf32>
    %167 = tpu.matmul %163, %155, %cst_59 {dimension_numbers = #tpu.dot_dimension_numbers<[2], [1], [1], [2], [0, 0, 0, 1, 1, 2], [0], [0]>} : vector<2x8x8xf32>, vector<2x8x4xf32>, vector<2x8x4xf32> -> vector<2x8x4xf32>
    "tpu.trace_stop"() : () -> ()
    %168 = vector.broadcast %166 : vector<2x8x1xf32> to vector<2x8x4xf32>
    %169 = arith.mulf %167, %168 : vector<2x8x4xf32>
    %cst_60 = arith.constant dense<0.000000e+00> : vector<2x4xf32>
    %170 = vector.multi_reduction <add>, %169, %cst_60 [1] : vector<2x8x4xf32> to vector<2x4xf32>
    %cst_61 = arith.constant 8.000000e+00 : f32
    %171 = vector.broadcast %cst_61 : f32 to vector<2x4xf32>
    %172 = arith.divf %170, %171 : vector<2x4xf32>
    %173 = vector.extract_strided_slice %8 {offsets = [0, 0, 32], sizes = [2, 8, 4], strides = [1, 1, 1]} : vector<2x8x64xf32> to vector<2x8x4xf32>
    %174 = vector.extract_strided_slice %10 {offsets = [0, 0, 32], sizes = [2, 8, 4], strides = [1, 1, 1]} : vector<2x8x64xf32> to vector<2x8x4xf32>
    %175 = vector.extract_strided_slice %12 {offsets = [0, 0, 32], sizes = [2, 8, 4], strides = [1, 1, 1]} : vector<2x8x64xf32> to vector<2x8x4xf32>
    "tpu.trace_start"() <{level = 10 : i32, message = "bqd,bkd->bqk"}> : () -> ()
    %cst_62 = arith.constant dense<0.000000e+00> : vector<2x8x8xf32>
    %176 = tpu.matmul %173, %174, %cst_62 {dimension_numbers = #tpu.dot_dimension_numbers<[2], [2], [1], [1], [0, 0, 0, 1, 1, 1], [0], [0]>} : vector<2x8x4xf32>, vector<2x8x4xf32>, vector<2x8x8xf32> -> vector<2x8x8xf32>
    "tpu.trace_stop"() : () -> ()
    %cst_63 = arith.constant 5.000000e-01 : f32
    %177 = vector.broadcast %cst_63 : f32 to vector<2x8x8xf32>
    %178 = arith.mulf %176, %177 : vector<2x8x8xf32>
    %cst_64 = arith.constant dense<0xFF800000> : vector<2x8xf32>
    %179 = vector.multi_reduction <maximumf>, %178, %cst_64 [2] : vector<2x8x8xf32> to vector<2x8xf32>
    %180 = vector.shape_cast %179 : vector<2x8xf32> to vector<2x8x1xf32>
    %181 = vector.broadcast %180 : vector<2x8x1xf32> to vector<2x8x8xf32>
    %182 = arith.subf %178, %181 : vector<2x8x8xf32>
    %183 = math.exp %182 : vector<2x8x8xf32>
    %cst_65 = arith.constant dense<0.000000e+00> : vector<2x8xf32>
    %184 = vector.multi_reduction <add>, %183, %cst_65 [2] : vector<2x8x8xf32> to vector<2x8xf32>
    %185 = vector.shape_cast %184 : vector<2x8xf32> to vector<2x8x1xf32>
    %186 = tpu.reciprocal %185 {approx = true} : vector<2x8x1xf32> -> vector<2x8x1xf32>
    "tpu.trace_start"() <{level = 10 : i32, message = "bqk,bkd->bqd"}> : () -> ()
    %cst_66 = arith.constant dense<0.000000e+00> : vector<2x8x4xf32>
    %187 = tpu.matmul %183, %175, %cst_66 {dimension_numbers = #tpu.dot_dimension_numbers<[2], [1], [1], [2], [0, 0, 0, 1, 1, 2], [0], [0]>} : vector<2x8x8xf32>, vector<2x8x4xf32>, vector<2x8x4xf32> -> vector<2x8x4xf32>
    "tpu.trace_stop"() : () -> ()
    %188 = vector.broadcast %186 : vector<2x8x1xf32> to vector<2x8x4xf32>
    %189 = arith.mulf %187, %188 : vector<2x8x4xf32>
    %cst_67 = arith.constant dense<0.000000e+00> : vector<2x4xf32>
    %190 = vector.multi_reduction <add>, %189, %cst_67 [1] : vector<2x8x4xf32> to vector<2x4xf32>
    %cst_68 = arith.constant 8.000000e+00 : f32
    %191 = vector.broadcast %cst_68 : f32 to vector<2x4xf32>
    %192 = arith.divf %190, %191 : vector<2x4xf32>
    %193 = vector.extract_strided_slice %8 {offsets = [0, 0, 36], sizes = [2, 8, 4], strides = [1, 1, 1]} : vector<2x8x64xf32> to vector<2x8x4xf32>
    %194 = vector.extract_strided_slice %10 {offsets = [0, 0, 36], sizes = [2, 8, 4], strides = [1, 1, 1]} : vector<2x8x64xf32> to vector<2x8x4xf32>
    %195 = vector.extract_strided_slice %12 {offsets = [0, 0, 36], sizes = [2, 8, 4], strides = [1, 1, 1]} : vector<2x8x64xf32> to vector<2x8x4xf32>
    "tpu.trace_start"() <{level = 10 : i32, message = "bqd,bkd->bqk"}> : () -> ()
    %cst_69 = arith.constant dense<0.000000e+00> : vector<2x8x8xf32>
    %196 = tpu.matmul %193, %194, %cst_69 {dimension_numbers = #tpu.dot_dimension_numbers<[2], [2], [1], [1], [0, 0, 0, 1, 1, 1], [0], [0]>} : vector<2x8x4xf32>, vector<2x8x4xf32>, vector<2x8x8xf32> -> vector<2x8x8xf32>
    "tpu.trace_stop"() : () -> ()
    %cst_70 = arith.constant 5.000000e-01 : f32
    %197 = vector.broadcast %cst_70 : f32 to vector<2x8x8xf32>
    %198 = arith.mulf %196, %197 : vector<2x8x8xf32>
    %cst_71 = arith.constant dense<0xFF800000> : vector<2x8xf32>
    %199 = vector.multi_reduction <maximumf>, %198, %cst_71 [2] : vector<2x8x8xf32> to vector<2x8xf32>
    %200 = vector.shape_cast %199 : vector<2x8xf32> to vector<2x8x1xf32>
    %201 = vector.broadcast %200 : vector<2x8x1xf32> to vector<2x8x8xf32>
    %202 = arith.subf %198, %201 : vector<2x8x8xf32>
    %203 = math.exp %202 : vector<2x8x8xf32>
    %cst_72 = arith.constant dense<0.000000e+00> : vector<2x8xf32>
    %204 = vector.multi_reduction <add>, %203, %cst_72 [2] : vector<2x8x8xf32> to vector<2x8xf32>
    %205 = vector.shape_cast %204 : vector<2x8xf32> to vector<2x8x1xf32>
    %206 = tpu.reciprocal %205 {approx = true} : vector<2x8x1xf32> -> vector<2x8x1xf32>
    "tpu.trace_start"() <{level = 10 : i32, message = "bqk,bkd->bqd"}> : () -> ()
    %cst_73 = arith.constant dense<0.000000e+00> : vector<2x8x4xf32>
    %207 = tpu.matmul %203, %195, %cst_73 {dimension_numbers = #tpu.dot_dimension_numbers<[2], [1], [1], [2], [0, 0, 0, 1, 1, 2], [0], [0]>} : vector<2x8x8xf32>, vector<2x8x4xf32>, vector<2x8x4xf32> -> vector<2x8x4xf32>
    "tpu.trace_stop"() : () -> ()
    %208 = vector.broadcast %206 : vector<2x8x1xf32> to vector<2x8x4xf32>
    %209 = arith.mulf %207, %208 : vector<2x8x4xf32>
    %cst_74 = arith.constant dense<0.000000e+00> : vector<2x4xf32>
    %210 = vector.multi_reduction <add>, %209, %cst_74 [1] : vector<2x8x4xf32> to vector<2x4xf32>
    %cst_75 = arith.constant 8.000000e+00 : f32
    %211 = vector.broadcast %cst_75 : f32 to vector<2x4xf32>
    %212 = arith.divf %210, %211 : vector<2x4xf32>
    %213 = vector.extract_strided_slice %8 {offsets = [0, 0, 40], sizes = [2, 8, 4], strides = [1, 1, 1]} : vector<2x8x64xf32> to vector<2x8x4xf32>
    %214 = vector.extract_strided_slice %10 {offsets = [0, 0, 40], sizes = [2, 8, 4], strides = [1, 1, 1]} : vector<2x8x64xf32> to vector<2x8x4xf32>
    %215 = vector.extract_strided_slice %12 {offsets = [0, 0, 40], sizes = [2, 8, 4], strides = [1, 1, 1]} : vector<2x8x64xf32> to vector<2x8x4xf32>
    "tpu.trace_start"() <{level = 10 : i32, message = "bqd,bkd->bqk"}> : () -> ()
    %cst_76 = arith.constant dense<0.000000e+00> : vector<2x8x8xf32>
    %216 = tpu.matmul %213, %214, %cst_76 {dimension_numbers = #tpu.dot_dimension_numbers<[2], [2], [1], [1], [0, 0, 0, 1, 1, 1], [0], [0]>} : vector<2x8x4xf32>, vector<2x8x4xf32>, vector<2x8x8xf32> -> vector<2x8x8xf32>
    "tpu.trace_stop"() : () -> ()
    %cst_77 = arith.constant 5.000000e-01 : f32
    %217 = vector.broadcast %cst_77 : f32 to vector<2x8x8xf32>
    %218 = arith.mulf %216, %217 : vector<2x8x8xf32>
    %cst_78 = arith.constant dense<0xFF800000> : vector<2x8xf32>
    %219 = vector.multi_reduction <maximumf>, %218, %cst_78 [2] : vector<2x8x8xf32> to vector<2x8xf32>
    %220 = vector.shape_cast %219 : vector<2x8xf32> to vector<2x8x1xf32>
    %221 = vector.broadcast %220 : vector<2x8x1xf32> to vector<2x8x8xf32>
    %222 = arith.subf %218, %221 : vector<2x8x8xf32>
    %223 = math.exp %222 : vector<2x8x8xf32>
    %cst_79 = arith.constant dense<0.000000e+00> : vector<2x8xf32>
    %224 = vector.multi_reduction <add>, %223, %cst_79 [2] : vector<2x8x8xf32> to vector<2x8xf32>
    %225 = vector.shape_cast %224 : vector<2x8xf32> to vector<2x8x1xf32>
    %226 = tpu.reciprocal %225 {approx = true} : vector<2x8x1xf32> -> vector<2x8x1xf32>
    "tpu.trace_start"() <{level = 10 : i32, message = "bqk,bkd->bqd"}> : () -> ()
    %cst_80 = arith.constant dense<0.000000e+00> : vector<2x8x4xf32>
    %227 = tpu.matmul %223, %215, %cst_80 {dimension_numbers = #tpu.dot_dimension_numbers<[2], [1], [1], [2], [0, 0, 0, 1, 1, 2], [0], [0]>} : vector<2x8x8xf32>, vector<2x8x4xf32>, vector<2x8x4xf32> -> vector<2x8x4xf32>
    "tpu.trace_stop"() : () -> ()
    %228 = vector.broadcast %226 : vector<2x8x1xf32> to vector<2x8x4xf32>
    %229 = arith.mulf %227, %228 : vector<2x8x4xf32>
    %cst_81 = arith.constant dense<0.000000e+00> : vector<2x4xf32>
    %230 = vector.multi_reduction <add>, %229, %cst_81 [1] : vector<2x8x4xf32> to vector<2x4xf32>
    %cst_82 = arith.constant 8.000000e+00 : f32
    %231 = vector.broadcast %cst_82 : f32 to vector<2x4xf32>
    %232 = arith.divf %230, %231 : vector<2x4xf32>
    %233 = vector.extract_strided_slice %8 {offsets = [0, 0, 44], sizes = [2, 8, 4], strides = [1, 1, 1]} : vector<2x8x64xf32> to vector<2x8x4xf32>
    %234 = vector.extract_strided_slice %10 {offsets = [0, 0, 44], sizes = [2, 8, 4], strides = [1, 1, 1]} : vector<2x8x64xf32> to vector<2x8x4xf32>
    %235 = vector.extract_strided_slice %12 {offsets = [0, 0, 44], sizes = [2, 8, 4], strides = [1, 1, 1]} : vector<2x8x64xf32> to vector<2x8x4xf32>
    "tpu.trace_start"() <{level = 10 : i32, message = "bqd,bkd->bqk"}> : () -> ()
    %cst_83 = arith.constant dense<0.000000e+00> : vector<2x8x8xf32>
    %236 = tpu.matmul %233, %234, %cst_83 {dimension_numbers = #tpu.dot_dimension_numbers<[2], [2], [1], [1], [0, 0, 0, 1, 1, 1], [0], [0]>} : vector<2x8x4xf32>, vector<2x8x4xf32>, vector<2x8x8xf32> -> vector<2x8x8xf32>
    "tpu.trace_stop"() : () -> ()
    %cst_84 = arith.constant 5.000000e-01 : f32
    %237 = vector.broadcast %cst_84 : f32 to vector<2x8x8xf32>
    %238 = arith.mulf %236, %237 : vector<2x8x8xf32>
    %cst_85 = arith.constant dense<0xFF800000> : vector<2x8xf32>
    %239 = vector.multi_reduction <maximumf>, %238, %cst_85 [2] : vector<2x8x8xf32> to vector<2x8xf32>
    %240 = vector.shape_cast %239 : vector<2x8xf32> to vector<2x8x1xf32>
    %241 = vector.broadcast %240 : vector<2x8x1xf32> to vector<2x8x8xf32>
    %242 = arith.subf %238, %241 : vector<2x8x8xf32>
    %243 = math.exp %242 : vector<2x8x8xf32>
    %cst_86 = arith.constant dense<0.000000e+00> : vector<2x8xf32>
    %244 = vector.multi_reduction <add>, %243, %cst_86 [2] : vector<2x8x8xf32> to vector<2x8xf32>
    %245 = vector.shape_cast %244 : vector<2x8xf32> to vector<2x8x1xf32>
    %246 = tpu.reciprocal %245 {approx = true} : vector<2x8x1xf32> -> vector<2x8x1xf32>
    "tpu.trace_start"() <{level = 10 : i32, message = "bqk,bkd->bqd"}> : () -> ()
    %cst_87 = arith.constant dense<0.000000e+00> : vector<2x8x4xf32>
    %247 = tpu.matmul %243, %235, %cst_87 {dimension_numbers = #tpu.dot_dimension_numbers<[2], [1], [1], [2], [0, 0, 0, 1, 1, 2], [0], [0]>} : vector<2x8x8xf32>, vector<2x8x4xf32>, vector<2x8x4xf32> -> vector<2x8x4xf32>
    "tpu.trace_stop"() : () -> ()
    %248 = vector.broadcast %246 : vector<2x8x1xf32> to vector<2x8x4xf32>
    %249 = arith.mulf %247, %248 : vector<2x8x4xf32>
    %cst_88 = arith.constant dense<0.000000e+00> : vector<2x4xf32>
    %250 = vector.multi_reduction <add>, %249, %cst_88 [1] : vector<2x8x4xf32> to vector<2x4xf32>
    %cst_89 = arith.constant 8.000000e+00 : f32
    %251 = vector.broadcast %cst_89 : f32 to vector<2x4xf32>
    %252 = arith.divf %250, %251 : vector<2x4xf32>
    %253 = vector.extract_strided_slice %8 {offsets = [0, 0, 48], sizes = [2, 8, 4], strides = [1, 1, 1]} : vector<2x8x64xf32> to vector<2x8x4xf32>
    %254 = vector.extract_strided_slice %10 {offsets = [0, 0, 48], sizes = [2, 8, 4], strides = [1, 1, 1]} : vector<2x8x64xf32> to vector<2x8x4xf32>
    %255 = vector.extract_strided_slice %12 {offsets = [0, 0, 48], sizes = [2, 8, 4], strides = [1, 1, 1]} : vector<2x8x64xf32> to vector<2x8x4xf32>
    "tpu.trace_start"() <{level = 10 : i32, message = "bqd,bkd->bqk"}> : () -> ()
    %cst_90 = arith.constant dense<0.000000e+00> : vector<2x8x8xf32>
    %256 = tpu.matmul %253, %254, %cst_90 {dimension_numbers = #tpu.dot_dimension_numbers<[2], [2], [1], [1], [0, 0, 0, 1, 1, 1], [0], [0]>} : vector<2x8x4xf32>, vector<2x8x4xf32>, vector<2x8x8xf32> -> vector<2x8x8xf32>
    "tpu.trace_stop"() : () -> ()
    %cst_91 = arith.constant 5.000000e-01 : f32
    %257 = vector.broadcast %cst_91 : f32 to vector<2x8x8xf32>
    %258 = arith.mulf %256, %257 : vector<2x8x8xf32>
    %cst_92 = arith.constant dense<0xFF800000> : vector<2x8xf32>
    %259 = vector.multi_reduction <maximumf>, %258, %cst_92 [2] : vector<2x8x8xf32> to vector<2x8xf32>
    %260 = vector.shape_cast %259 : vector<2x8xf32> to vector<2x8x1xf32>
    %261 = vector.broadcast %260 : vector<2x8x1xf32> to vector<2x8x8xf32>
    %262 = arith.subf %258, %261 : vector<2x8x8xf32>
    %263 = math.exp %262 : vector<2x8x8xf32>
    %cst_93 = arith.constant dense<0.000000e+00> : vector<2x8xf32>
    %264 = vector.multi_reduction <add>, %263, %cst_93 [2] : vector<2x8x8xf32> to vector<2x8xf32>
    %265 = vector.shape_cast %264 : vector<2x8xf32> to vector<2x8x1xf32>
    %266 = tpu.reciprocal %265 {approx = true} : vector<2x8x1xf32> -> vector<2x8x1xf32>
    "tpu.trace_start"() <{level = 10 : i32, message = "bqk,bkd->bqd"}> : () -> ()
    %cst_94 = arith.constant dense<0.000000e+00> : vector<2x8x4xf32>
    %267 = tpu.matmul %263, %255, %cst_94 {dimension_numbers = #tpu.dot_dimension_numbers<[2], [1], [1], [2], [0, 0, 0, 1, 1, 2], [0], [0]>} : vector<2x8x8xf32>, vector<2x8x4xf32>, vector<2x8x4xf32> -> vector<2x8x4xf32>
    "tpu.trace_stop"() : () -> ()
    %268 = vector.broadcast %266 : vector<2x8x1xf32> to vector<2x8x4xf32>
    %269 = arith.mulf %267, %268 : vector<2x8x4xf32>
    %cst_95 = arith.constant dense<0.000000e+00> : vector<2x4xf32>
    %270 = vector.multi_reduction <add>, %269, %cst_95 [1] : vector<2x8x4xf32> to vector<2x4xf32>
    %cst_96 = arith.constant 8.000000e+00 : f32
    %271 = vector.broadcast %cst_96 : f32 to vector<2x4xf32>
    %272 = arith.divf %270, %271 : vector<2x4xf32>
    %273 = vector.extract_strided_slice %8 {offsets = [0, 0, 52], sizes = [2, 8, 4], strides = [1, 1, 1]} : vector<2x8x64xf32> to vector<2x8x4xf32>
    %274 = vector.extract_strided_slice %10 {offsets = [0, 0, 52], sizes = [2, 8, 4], strides = [1, 1, 1]} : vector<2x8x64xf32> to vector<2x8x4xf32>
    %275 = vector.extract_strided_slice %12 {offsets = [0, 0, 52], sizes = [2, 8, 4], strides = [1, 1, 1]} : vector<2x8x64xf32> to vector<2x8x4xf32>
    "tpu.trace_start"() <{level = 10 : i32, message = "bqd,bkd->bqk"}> : () -> ()
    %cst_97 = arith.constant dense<0.000000e+00> : vector<2x8x8xf32>
    %276 = tpu.matmul %273, %274, %cst_97 {dimension_numbers = #tpu.dot_dimension_numbers<[2], [2], [1], [1], [0, 0, 0, 1, 1, 1], [0], [0]>} : vector<2x8x4xf32>, vector<2x8x4xf32>, vector<2x8x8xf32> -> vector<2x8x8xf32>
    "tpu.trace_stop"() : () -> ()
    %cst_98 = arith.constant 5.000000e-01 : f32
    %277 = vector.broadcast %cst_98 : f32 to vector<2x8x8xf32>
    %278 = arith.mulf %276, %277 : vector<2x8x8xf32>
    %cst_99 = arith.constant dense<0xFF800000> : vector<2x8xf32>
    %279 = vector.multi_reduction <maximumf>, %278, %cst_99 [2] : vector<2x8x8xf32> to vector<2x8xf32>
    %280 = vector.shape_cast %279 : vector<2x8xf32> to vector<2x8x1xf32>
    %281 = vector.broadcast %280 : vector<2x8x1xf32> to vector<2x8x8xf32>
    %282 = arith.subf %278, %281 : vector<2x8x8xf32>
    %283 = math.exp %282 : vector<2x8x8xf32>
    %cst_100 = arith.constant dense<0.000000e+00> : vector<2x8xf32>
    %284 = vector.multi_reduction <add>, %283, %cst_100 [2] : vector<2x8x8xf32> to vector<2x8xf32>
    %285 = vector.shape_cast %284 : vector<2x8xf32> to vector<2x8x1xf32>
    %286 = tpu.reciprocal %285 {approx = true} : vector<2x8x1xf32> -> vector<2x8x1xf32>
    "tpu.trace_start"() <{level = 10 : i32, message = "bqk,bkd->bqd"}> : () -> ()
    %cst_101 = arith.constant dense<0.000000e+00> : vector<2x8x4xf32>
    %287 = tpu.matmul %283, %275, %cst_101 {dimension_numbers = #tpu.dot_dimension_numbers<[2], [1], [1], [2], [0, 0, 0, 1, 1, 2], [0], [0]>} : vector<2x8x8xf32>, vector<2x8x4xf32>, vector<2x8x4xf32> -> vector<2x8x4xf32>
    "tpu.trace_stop"() : () -> ()
    %288 = vector.broadcast %286 : vector<2x8x1xf32> to vector<2x8x4xf32>
    %289 = arith.mulf %287, %288 : vector<2x8x4xf32>
    %cst_102 = arith.constant dense<0.000000e+00> : vector<2x4xf32>
    %290 = vector.multi_reduction <add>, %289, %cst_102 [1] : vector<2x8x4xf32> to vector<2x4xf32>
    %cst_103 = arith.constant 8.000000e+00 : f32
    %291 = vector.broadcast %cst_103 : f32 to vector<2x4xf32>
    %292 = arith.divf %290, %291 : vector<2x4xf32>
    %293 = vector.extract_strided_slice %8 {offsets = [0, 0, 56], sizes = [2, 8, 4], strides = [1, 1, 1]} : vector<2x8x64xf32> to vector<2x8x4xf32>
    %294 = vector.extract_strided_slice %10 {offsets = [0, 0, 56], sizes = [2, 8, 4], strides = [1, 1, 1]} : vector<2x8x64xf32> to vector<2x8x4xf32>
    %295 = vector.extract_strided_slice %12 {offsets = [0, 0, 56], sizes = [2, 8, 4], strides = [1, 1, 1]} : vector<2x8x64xf32> to vector<2x8x4xf32>
    "tpu.trace_start"() <{level = 10 : i32, message = "bqd,bkd->bqk"}> : () -> ()
    %cst_104 = arith.constant dense<0.000000e+00> : vector<2x8x8xf32>
    %296 = tpu.matmul %293, %294, %cst_104 {dimension_numbers = #tpu.dot_dimension_numbers<[2], [2], [1], [1], [0, 0, 0, 1, 1, 1], [0], [0]>} : vector<2x8x4xf32>, vector<2x8x4xf32>, vector<2x8x8xf32> -> vector<2x8x8xf32>
    "tpu.trace_stop"() : () -> ()
    %cst_105 = arith.constant 5.000000e-01 : f32
    %297 = vector.broadcast %cst_105 : f32 to vector<2x8x8xf32>
    %298 = arith.mulf %296, %297 : vector<2x8x8xf32>
    %cst_106 = arith.constant dense<0xFF800000> : vector<2x8xf32>
    %299 = vector.multi_reduction <maximumf>, %298, %cst_106 [2] : vector<2x8x8xf32> to vector<2x8xf32>
    %300 = vector.shape_cast %299 : vector<2x8xf32> to vector<2x8x1xf32>
    %301 = vector.broadcast %300 : vector<2x8x1xf32> to vector<2x8x8xf32>
    %302 = arith.subf %298, %301 : vector<2x8x8xf32>
    %303 = math.exp %302 : vector<2x8x8xf32>
    %cst_107 = arith.constant dense<0.000000e+00> : vector<2x8xf32>
    %304 = vector.multi_reduction <add>, %303, %cst_107 [2] : vector<2x8x8xf32> to vector<2x8xf32>
    %305 = vector.shape_cast %304 : vector<2x8xf32> to vector<2x8x1xf32>
    %306 = tpu.reciprocal %305 {approx = true} : vector<2x8x1xf32> -> vector<2x8x1xf32>
    "tpu.trace_start"() <{level = 10 : i32, message = "bqk,bkd->bqd"}> : () -> ()
    %cst_108 = arith.constant dense<0.000000e+00> : vector<2x8x4xf32>
    %307 = tpu.matmul %303, %295, %cst_108 {dimension_numbers = #tpu.dot_dimension_numbers<[2], [1], [1], [2], [0, 0, 0, 1, 1, 2], [0], [0]>} : vector<2x8x8xf32>, vector<2x8x4xf32>, vector<2x8x4xf32> -> vector<2x8x4xf32>
    "tpu.trace_stop"() : () -> ()
    %308 = vector.broadcast %306 : vector<2x8x1xf32> to vector<2x8x4xf32>
    %309 = arith.mulf %307, %308 : vector<2x8x4xf32>
    %cst_109 = arith.constant dense<0.000000e+00> : vector<2x4xf32>
    %310 = vector.multi_reduction <add>, %309, %cst_109 [1] : vector<2x8x4xf32> to vector<2x4xf32>
    %cst_110 = arith.constant 8.000000e+00 : f32
    %311 = vector.broadcast %cst_110 : f32 to vector<2x4xf32>
    %312 = arith.divf %310, %311 : vector<2x4xf32>
    %313 = vector.extract_strided_slice %8 {offsets = [0, 0, 60], sizes = [2, 8, 4], strides = [1, 1, 1]} : vector<2x8x64xf32> to vector<2x8x4xf32>
    %314 = vector.extract_strided_slice %10 {offsets = [0, 0, 60], sizes = [2, 8, 4], strides = [1, 1, 1]} : vector<2x8x64xf32> to vector<2x8x4xf32>
    %315 = vector.extract_strided_slice %12 {offsets = [0, 0, 60], sizes = [2, 8, 4], strides = [1, 1, 1]} : vector<2x8x64xf32> to vector<2x8x4xf32>
    "tpu.trace_start"() <{level = 10 : i32, message = "bqd,bkd->bqk"}> : () -> ()
    %cst_111 = arith.constant dense<0.000000e+00> : vector<2x8x8xf32>
    %316 = tpu.matmul %313, %314, %cst_111 {dimension_numbers = #tpu.dot_dimension_numbers<[2], [2], [1], [1], [0, 0, 0, 1, 1, 1], [0], [0]>} : vector<2x8x4xf32>, vector<2x8x4xf32>, vector<2x8x8xf32> -> vector<2x8x8xf32>
    "tpu.trace_stop"() : () -> ()
    %cst_112 = arith.constant 5.000000e-01 : f32
    %317 = vector.broadcast %cst_112 : f32 to vector<2x8x8xf32>
    %318 = arith.mulf %316, %317 : vector<2x8x8xf32>
    %cst_113 = arith.constant dense<0xFF800000> : vector<2x8xf32>
    %319 = vector.multi_reduction <maximumf>, %318, %cst_113 [2] : vector<2x8x8xf32> to vector<2x8xf32>
    %320 = vector.shape_cast %319 : vector<2x8xf32> to vector<2x8x1xf32>
    %321 = vector.broadcast %320 : vector<2x8x1xf32> to vector<2x8x8xf32>
    %322 = arith.subf %318, %321 : vector<2x8x8xf32>
    %323 = math.exp %322 : vector<2x8x8xf32>
    %cst_114 = arith.constant dense<0.000000e+00> : vector<2x8xf32>
    %324 = vector.multi_reduction <add>, %323, %cst_114 [2] : vector<2x8x8xf32> to vector<2x8xf32>
    %325 = vector.shape_cast %324 : vector<2x8xf32> to vector<2x8x1xf32>
    %326 = tpu.reciprocal %325 {approx = true} : vector<2x8x1xf32> -> vector<2x8x1xf32>
    "tpu.trace_start"() <{level = 10 : i32, message = "bqk,bkd->bqd"}> : () -> ()
    %cst_115 = arith.constant dense<0.000000e+00> : vector<2x8x4xf32>
    %327 = tpu.matmul %323, %315, %cst_115 {dimension_numbers = #tpu.dot_dimension_numbers<[2], [1], [1], [2], [0, 0, 0, 1, 1, 2], [0], [0]>} : vector<2x8x8xf32>, vector<2x8x4xf32>, vector<2x8x4xf32> -> vector<2x8x4xf32>
    "tpu.trace_stop"() : () -> ()
    %328 = vector.broadcast %326 : vector<2x8x1xf32> to vector<2x8x4xf32>
    %329 = arith.mulf %327, %328 : vector<2x8x4xf32>
    %cst_116 = arith.constant dense<0.000000e+00> : vector<2x4xf32>
    %330 = vector.multi_reduction <add>, %329, %cst_116 [1] : vector<2x8x4xf32> to vector<2x4xf32>
    %cst_117 = arith.constant 8.000000e+00 : f32
    %331 = vector.broadcast %cst_117 : f32 to vector<2x4xf32>
    %332 = arith.divf %330, %331 : vector<2x4xf32>
    %333 = tpu.concatenate %32, %52, %72, %92, %112, %132, %152, %172, %192, %212, %232, %252, %272, %292, %312, %332 in 1 : vector<2x4xf32>, vector<2x4xf32>, vector<2x4xf32>, vector<2x4xf32>, vector<2x4xf32>, vector<2x4xf32>, vector<2x4xf32>, vector<2x4xf32>, vector<2x4xf32>, vector<2x4xf32>, vector<2x4xf32>, vector<2x4xf32>, vector<2x4xf32>, vector<2x4xf32>, vector<2x4xf32>, vector<2x4xf32> -> vector<2x64xf32>
    %cst_118 = arith.constant dense<0.000000e+00> : vector<2x64xf32>
    %334 = vector.multi_reduction <add>, %0, %cst_118 [1] : vector<2x8x64xf32> to vector<2x64xf32>
    %cst_119 = arith.constant 8.000000e+00 : f32
    %335 = vector.broadcast %cst_119 : f32 to vector<2x64xf32>
    %336 = arith.divf %334, %335 : vector<2x64xf32>
    %c0_120 = arith.constant 0 : index
    %c0_121 = arith.constant 0 : index
    %337 = vector.load %arg4[%c0_120, %c0_121] : memref<64x64xf32, #tpu.memory_space<vmem>>, vector<64x64xf32>
    %cst_122 = arith.constant dense<0.000000e+00> : vector<2x64xf32>
    %338 = tpu.matmul %333, %337, %cst_122 {dimension_numbers = #tpu.dot_dimension_numbers<[1], [0], [0], [1], [0, 0, 1, 1], [], []>} : vector<2x64xf32>, vector<64x64xf32>, vector<2x64xf32> -> vector<2x64xf32>
    %c0_123 = arith.constant 0 : index
    %c0_124 = arith.constant 0 : index
    %339 = vector.load %arg5[%c0_123, %c0_124] : memref<1x64xf32, #tpu.memory_space<vmem>>, vector<1x64xf32>
    %340 = vector.broadcast %339 : vector<1x64xf32> to vector<2x64xf32>
    %341 = arith.addf %338, %340 : vector<2x64xf32>
    %342 = arith.addf %341, %336 : vector<2x64xf32>
    %c0_125 = arith.constant 0 : index
    %c0_126 = arith.constant 0 : index
    %343 = vector.load %arg6[%c0_125, %c0_126] : memref<2x64xf32, #tpu.memory_space<vmem>>, vector<2x64xf32>
    tpu.vector_store %arg6[%c0_125, %c0_126], %342 {strides = array<i32>} : memref<2x64xf32, #tpu.memory_space<vmem>>, vector<2x64xf32>,
    return
  }
  func.func @transform_0(%arg0: i32) -> (i32, i32, i32) {
    %c0_i32 = arith.constant 0 : i32
    %c0_i32_0 = arith.constant 0 : i32
    %c0_i32_1 = arith.constant 0 : i32
    return %arg0, %c0_i32, %c0_i32_0 : i32, i32, i32
  }
  func.func @transform_1(%arg0: i32) -> (i32, i32) {
    %c0_i32 = arith.constant 0 : i32
    %c0_i32_0 = arith.constant 0 : i32
    %c0_i32_1 = arith.constant 0 : i32
    return %c0_i32, %c0_i32_0 : i32, i32
  }
  func.func @transform_2(%arg0: i32) -> (i32, i32) {
    %c0_i32 = arith.constant 0 : i32
    %c0_i32_0 = arith.constant 0 : i32
    %c0_i32_1 = arith.constant 0 : i32
    return %c0_i32, %c0_i32_0 : i32, i32
  }
  func.func @transform_3(%arg0: i32) -> (i32, i32) {
    %c0_i32 = arith.constant 0 : i32
    %c0_i32_0 = arith.constant 0 : i32
    %c0_i32_1 = arith.constant 0 : i32
    return %c0_i32, %c0_i32_0 : i32, i32
  }
  func.func @transform_4(%arg0: i32) -> (i32, i32) {
    %c0_i32 = arith.constant 0 : i32
    %c0_i32_0 = arith.constant 0 : i32
    %c0_i32_1 = arith.constant 0 : i32
    return %c0_i32, %c0_i32_0 : i32, i32
  }
  func.func @transform_5(%arg0: i32) -> (i32, i32) {
    %c0_i32 = arith.constant 0 : i32
    %c0_i32_0 = arith.constant 0 : i32
    return %arg0, %c0_i32 : i32, i32
  }
}

</mosaic_0001>

<bundles_post_ra>
// kernel: tpu_custom_call.1
= control target key start
LH: loop header
LB: loop body
LE: loop exit
PB: predicated region body
PF: predicated region fallthrough
CT: control target
= control target key end

     0   :  { %10 = vsyncpa [#allocation3], 0  ;;  %s7855_s0 = inlined_call_operand.hbm [shape: f32[2,8,64], index: 0, kind: input, shape index: {}]   ;;  %s7856_s1 = inlined_call_operand.hbm [shape: f32[64,192], index: 1, kind: input, shape index: {}]   ;;  %s7857_s2 = inlined_call_operand.vmem [shape: f32[1,192], index: 2, kind: input, shape index: {}]   ;;  %s7858_s3 = inlined_call_operand.hbm [shape: f32[64,64], index: 3, kind: input, shape index: {}]   ;;  %s7859_s4 = inlined_call_operand.vmem [shape: f32[1,64], index: 4, kind: input, shape index: {}]   ;;  %s7860_s5 = inlined_call_operand.hbm [shape: f32[2,64], index: 5, kind: output, shape index: {}]  }
   0x1   :  { %11 = vsyncpa [#allocation6], 0 }
   0x2   :  { %12 = vsyncpa [#allocation4], 0  ;;  %s6859_s18 = smov [#allocation5]   ;;  %s6765_s22 = scalar_lea.hbm %s7856_s1, 2048 }
   0x3   :  { %s30_s19 = sshll.u32 %s6859_s18, 4  ;;  %p6766_p0 = scmp.ne.s32.totalorder %s7856_s1, %s6765_s22  ;;  %s31_s19 = int_to_ptr.vmem [resolvable:$true] %s30_s19 }
   0x4   :  { %p6769_p1 = scmp.lt.u32.totalorder %s6765_s22, %s7856_s1 }
   0x6   :  { %p6771_p2 = pnand %p6769_p1, %p6766_p0 }
   0x8   :  { %6774 = shalt.err (!%p6771_p2)
}
   0x9   :  { %s6775_s27 = scalar_lea.vmem %s31_s19, 2048  ;;  %p6780_p4 = scmp.lt.s32.totalorder %s31_s19, %s31_s19 }
   0xa   :  { %p6776_p3 = scmp.ne.s32.totalorder %s31_s19, %s6775_s27  ;;  %p6781_p5 = scmp.lt.s32.totalorder %s6775_s27, %s6775_s27 }
   0xc   :  { %p6782_p6 = por %p6781_p5, %p6780_p4 }
   0xe   :  { %p6783_p7 = pnand %p6782_p6, %p6776_p3 }
  0x10   :  { %6786 = shalt.err (!%p6783_p7)
}
  0x11   :  { %s6860_s28 = smov 256   ;;  %s6861_s29 = smov 16  }
  0x12   :  { %36 = dma.hbm_to_vmem [thread:$0]  %s7856_s1, 2048, %s31_s19, [#allocation6], %s6860_s28, %s6860_s28, %s6861_s29  }
  0x13   :  { %s6862_s7 = smov [#allocation2]   ;;  %s6787_s11 = scalar_lea.hbm %s7855_s0, 256 }
  0x14   :  { %s18_s8 = sshll.u32 %s6862_s7, 4  ;;  %p6788_p8 = scmp.ne.s32.totalorder %s7855_s0, %s6787_s11  ;;  %s19_s8 = int_to_ptr.vmem [resolvable:$true] %s18_s8 }
  0x15   :  { %p6791_p9 = scmp.lt.u32.totalorder %s6787_s11, %s7855_s0 }
  0x17   :  { %p6793_p10 = pnand %p6791_p9, %p6788_p8 }
  0x19   :  { %6796 = shalt.err (!%p6793_p10)
}
  0x1a   :  { %s6797_s16 = scalar_lea.vmem %s19_s8, 256  ;;  %p6802_p12 = scmp.lt.s32.totalorder %s19_s8, %s19_s8 }
  0x1b   :  { %p6798_p11 = scmp.ne.s32.totalorder %s19_s8, %s6797_s16  ;;  %p6803_p13 = scmp.lt.s32.totalorder %s6797_s16, %s6797_s16 }
  0x1d   :  { %p6804_p0 = por %p6803_p13, %p6802_p12 }
  0x1f   :  { %p6805_p1 = pnand %p6804_p0, %p6798_p11 }
  0x21   :  { %6808 = shalt.err (!%p6805_p1)
}
  0x22   :  { %s6863_s1 = smov 128   ;;  %s6864_s17 = smov 8  }
  0x23   :  { %24 = dma.hbm_to_vmem [thread:$0]  %s7855_s0, 256, %s19_s8, [#allocation3], %s6863_s1, %s6863_s1, %s6864_s17  }
  0x24   :  { %s6865_s20 = smov [#allocation7]   ;;  %s6809_s24 = scalar_lea.hbm %s7858_s3, 1024 }
  0x25   :  { %s44_s21 = sshll.u32 %s6865_s20, 4  ;;  %p6810_p2 = scmp.ne.s32.totalorder %s7858_s3, %s6809_s24  ;;  %s45_s21 = int_to_ptr.vmem [resolvable:$true] %s44_s21 }
  0x26   :  { %p6813_p3 = scmp.lt.u32.totalorder %s6809_s24, %s7858_s3 }
  0x28   :  { %p6815_p4 = pnand %p6813_p3, %p6810_p2 }
  0x2a   :  { %6818 = shalt.err (!%p6815_p4)
}
  0x2b   :  { %s6819_s30 = scalar_lea.vmem %s45_s21, 1024  ;;  %p6824_p6 = scmp.lt.s32.totalorder %s45_s21, %s45_s21 }
  0x2c   :  { %p6820_p5 = scmp.ne.s32.totalorder %s45_s21, %s6819_s30  ;;  %p6825_p7 = scmp.lt.s32.totalorder %s6819_s30, %s6819_s30 }
  0x2e   :  { %p6826_p8 = por %p6825_p7, %p6824_p6 }
  0x30   :  { %p6827_p9 = pnand %p6826_p8, %p6820_p5 }
  0x32   :  { %6830 = shalt.err (!%p6827_p9)
}
  0x33   :  { %50 = dma.hbm_to_vmem [thread:$0]  %s7858_s3, 1024, %s45_s21, [#allocation6], %s6863_s1, %s6863_s1, %s6864_s17  }
  0x34   :  { %6853 = dma.done.wait [#allocation3], 256  }
  0x35   :  { %6854 = vsyncadd [#allocation3], 4294967040 }
  0x36   :  { %6855 = dma.done.wait [#allocation6], 3072  }
  0x37   :  { %6856 = vsyncadd [#allocation6], 4294964224  ;;  %v6866_v0 = vmov 0.0   ;;  %v65_v1 = vld [vmem:[#allocation5 + $0x8] sm:$0xff]  ;;  %v67_v2 = vld [vmem:[#allocation5 + $0x18] sm:$0xff]  ;;  %vm92_vm0 = vcmask 523264   ;;  %v82_v27 = vlaneseq }
  0x38   :  { %163 = vmatprep.mubr.f32.mxu0 %v6866_v0  ;;  %6233 = vmatprep.subr.mxu1 %v6866_v0  ;;  %v64_v3 = vld [vmem:[#allocation5] sm:$0xff]  ;;  %v6567_v4 = vpack.c.bf16 %v67_v2, %v65_v1  ;;  %v66_v5 = vld [vmem:[#allocation5 + $0x10] sm:$0xff]  ;;  %v69_v6 = vld [vmem:[#allocation5 + $0x28] sm:$0xff]  ;;  %vm6867_vm1 = vmmov 0   ;;  %s6868_s8 = smov 64   ;;  %s6869_s9 = smov 60  }
  0x39   :  { %v71_v7 = vld [vmem:[#allocation5 + $0x38] sm:$0xff]  ;;  %v6569_v8 = vpack.c.bf16 %v66_v5, %v64_v3  ;;  %v68_v10 = vld [vmem:[#allocation5 + $0x20] sm:$0xff]  ;;  %v70_v11 = vld [vmem:[#allocation5 + $0x30] sm:$0xff]  ;;  %v83_v28 = vshrl.u32 %v82_v27, 7  ;;  %6235 = vmatprep.mubr.msk.f32.mxu1 %vm6867_vm1, %v6866_v0  ;;  %s6871_s10 = smov 56   ;;  %vm179_vm2 = vcmask 31744  }
  0x3a   :  { %v6571_v9 = vpack.c.bf16 %v71_v7, %v69_v6  ;;  %v73_v12 = vld [vmem:[#allocation5 + $0x48] sm:$0xff]  ;;  %6568 = vmatprep.subr.bf16.mxu0 %v6567_v4  ;;  %v75_v13 = vld [vmem:[#allocation5 + $0x58] sm:$0xff]  ;;  %v6573_v14 = vpack.c.bf16 %v70_v11, %v68_v10  ;;  %v72_v16 = vld [vmem:[#allocation5 + $0x40] sm:$0xff]  ;;  %vm333_vm3 = vcmask 64512   ;;  %s6872_s11 = smov 120   ;;  %s6873_s12 = smov 52  }
  0x3b   :  { %6570 = vmatpush1.bf16.msra.mxu0 %v6569_v8  ;;  %v6575_v15 = vpack.c.bf16 %v75_v13, %v73_v12  ;;  %v74_v17 = vld [vmem:[#allocation5 + $0x50] sm:$0xff]  ;;  %v77_v18 = vld [vmem:[#allocation5 + $0x68] sm:$0xff]  ;;  %v79_v19 = vld [vmem:[#allocation5 + $0x78] sm:$0xff]  ;;  %v84_v29 = vsub.s32 0, %v83_v28  ;;  %v88_v33 = vsub.s32 1, %v83_v28  ;;  %s6874_s13 = smov 116  }
  0x3c   :  { %6572 = vmatprep.subr.bf16.mxu0 %v6571_v9  ;;  %v6577_v20 = vpack.c.bf16 %v74_v17, %v72_v16  ;;  %v6579_v21 = vpack.c.bf16 %v79_v19, %v77_v18  ;;  %v76_v22 = vld [vmem:[#allocation5 + $0x60] sm:$0xff]  ;;  %v78_v23 = vld [vmem:[#allocation5 + $0x70] sm:$0xff]  ;;  %v63_v26 = vld [vmem:[#allocation2 + $0x8] sm:$0xff]  ;;  %s6875_s14 = smov 48   ;;  %s6876_s15 = smov 112   ;;  %vm5743_vm4 = vcmask 1041409  }
  0x3d   :  { %v6581_v24 = vpack.c.bf16 %v78_v23, %v76_v22  ;;  %v62_v25 = vld [vmem:[#allocation2] sm:$0xff]  ;;  %s6877_s16 = smov 44   ;;  %s6878_s1 = smov 108   ;;  %vm5838_vm5 = vcmask 97280   ;;  %vm5840_vm6 = vcmask 130048   ;;  %vm5842_vm7 = vcmask 162816  }
  0x3e   :  { %v80_v30 = vld [vmem:[%s7857_s2] sm:$0x3]  ;;  %s6870_s2 = smov 124   ;;  %s6879_s18 = smov 40   ;;  %vm5844_vm8 = vcmask 195584   ;;  %vm5846_vm9 = vcmask 228352  }
  0x3f   :  { %6574 = vmatpush1.bf16.msra.mxu0 %v6573_v14  ;;  %v85_v31 = vrot.slane %v80_v30, %v84_v29  ;;  %v89_v36 = vrot.slane %v80_v30, %v88_v33  ;;  %s6880_s19 = smov 104   ;;  %s6881_s20 = smov 36   ;;  %vm5848_vm10 = vcmask 261120   ;;  %vm5850_vm11 = vcmask 293888  }
  0x40   :  { %6576 = vmatprep.subr.bf16.mxu0 %v6575_v15  ;;  %s6882_s21 = smov 100   ;;  %s6883_s22 = smov 32   ;;  %vm5852_vm12 = vcmask 326656   ;;  %vm5854_vm13 = vcmask 359424   ;;  %vm5856_vm14 = vcmask 392192   ;;  %vm5858_vm15 = vcmask 424960  }
  0x41   :  { %s6884_s23 = smov 96   ;;  %s6885_s24 = smov 28  }
  0x42   :  { %s6886_s25 = smov 92   ;;  %s6887_s26 = smov 24  }
  0x43   :  { %6578 = vmatpush1.bf16.msra.mxu0 %v6577_v20  ;;  %s6888_s27 = smov 88   ;;  %s6889_s28 = smov 20  }
  0x44   :  { %6580 = vmatprep.subr.bf16.mxu0 %v6579_v21  ;;  %s6890_s30 = smov 84   ;;  %s6891_s0 = smov 80  }
  0x45   :  { %s6892_s6 = smov 12   ;;  %s6893_s3 = smov 76  }
  0x46   :  { %s6894_s7 = smov 72  }
  0x47   :  { %6582 = vmatpush1.bf16.msra.mxu0 %v6581_v24 }
  0x48   :  { %6228 = vmatprep.subr.mxu0 %v6866_v0 }
  0x4a   :  { %5991 = vmatmul.mubr.msk.f32.vlgmr.msra.gmra.mrb[0].mxu0 %vm92_vm0, %v62_v25 }
  0x4b   :  { %169 = vmatprep.mubr.f32.mxu0 %v6866_v0 }
  0x4e   :  { %5992 = vmatmul.mubr.msk.f32.gmra.mrb[2].mxu0 %vm92_vm0, %v63_v26 }
  0x4f   :  { %6230 = vmatprep.mubr.msk.f32.mxu0 %vm6867_vm1, %v6866_v0 }
 0x11d   :  { %v165_v32 = vpop.f32.mrb[0].mxu0 }
 0x11e   :  { %v6981_v34 = vadd.f32 %v165_v32, %v85_v31  ;;  %v167_v35 = vpop.f32.mrb[1].mxu0 }
 0x11f   :  { %v6995_v41 = vadd.f32 %v167_v35, %v89_v36 }
 0x120   :  { %177 = vrot.lane.b32.xlu0 %v6981_v34, %s6868_s8 }
 0x121   :  { %v171_v37 = vpop.f32.mrb[2].mxu0 }
 0x122   :  { %v6984_v38 = vadd.f32 %v171_v37, %v85_v31  ;;  %v173_v39 = vpop.f32.mrb[3].mxu0 }
 0x123   :  { %v6986_v40 = vadd.f32 %v173_v39, %v89_v36 }
 0x124   :  { %255 = vrot.lane.b32.xlu0 %v6984_v38, %s6868_s8  ;;  %s6895_s8 = smov 4  }
 0x128   :  { %521 = vrot.lane.b32.xlu0 %v6981_v34, %s6869_s9 }
 0x12c   :  { %519 = vrot.lane.b32.xlu0 %v6981_v34, %s6870_s2 }
 0x130   :  { %597 = vrot.lane.b32.xlu0 %v6984_v38, %s6870_s2 }
 0x134   :  { %698 = vrot.lane.b32.xlu0 %v6995_v41, %s6870_s2 }
 0x138   :  { %871 = vrot.lane.b32.xlu0 %v6981_v34, %s6871_s10 }
 0x192   :  { %v178_v42 = vpop.permute.xlu0 %177 }
 0x193   :  { %6229 = vmatpush3.xpose.msk.msra.mxu0 %vm179_vm2, %v178_v42 }
 0x194   :  { %6253 = vmatprep.subr.mxu0 %v6866_v0 }
 0x196   :  { %6231 = vmatmul.mubr.msk.f32.vlgmr.msra.gmra.mrb[4].mxu0 %vm179_vm2, %v6981_v34  ;;  %v256_v43 = vpop.permute.xlu0 %255 }
 0x197   :  { %6234 = vmatpush3.xpose.msk.msra.mxu1 %vm179_vm2, %v256_v43  ;;  %6255 = vmatprep.mubr.msk.f32.mxu0 %vm6867_vm1, %v6866_v0 }
 0x198   :  { %6238 = vmatprep.subr.mxu1 %v6866_v0 }
 0x19a   :  { %6236 = vmatmul.mubr.msk.f32.vlgmr.msra.gmra.mrb[0].mxu1 %vm179_vm2, %v6984_v38  ;;  %v522_v52 = vpop.permute.xlu0 %521 }
 0x19b   :  { %6239 = vmatpush3.msra.mxu1 %v6995_v41  ;;  %6240 = vmatprep.mubr.msk.f32.mxu1 %vm6867_vm1, %v6866_v0 }
 0x19c   :  { %6243 = vmatprep.subr.mxu1 %v6866_v0 }
 0x19e   :  { %v520_v57 = vpop.permute.xlu0 %519 }
 0x1a2   :  { %v598_v61 = vpop.permute.xlu0 %597 }
 0x1a6   :  { %v699_v2 = vpop.permute.xlu0 %698 }
 0x1aa   :  { %v872_v18 = vpop.permute.xlu0 %871 }
 0x269   :  { %v250_v44 = vpop.f32.mrb[4].mxu0 }
 0x26a   :  { %v331_v45 = vmul.f32 0.5, %v250_v44  ;;  %v6232_v46 = vpop.f32.mrb[5].mxu0 }
 0x26c   :  { %v334_v47 = vsel %vm333_vm3, %v331_v45, -inf }
 0x26d   :  { %335 = vmax.xlane.f32.xlu1 %v334_v47  ;;  %v327_v48 = vpop.f32.mrb[0].mxu1 }
 0x26e   :  { %v332_v49 = vmul.f32 0.5, %v327_v48  ;;  %v6237_v50 = vpop.f32.mrb[1].mxu1 }
 0x270   :  { %v337_v51 = vsel %vm333_vm3, %v332_v49, -inf }
 0x271   :  { %338 = vmax.xlane.f32.xlu1 %v337_v51 }
 0x282   :  { %599 = vrot.lane.b32.xlu1 %v6984_v38, %s6869_s9 }
 0x286   :  { %775 = vrot.lane.b32.xlu1 %v6986_v40, %s6870_s2  ;;  %s6896_s2 = smov 68  }
 0x2fa   :  { %v336_v53 = vpop.xlane.xlu1 %335 }
 0x2fb   :  { %v340_v54 = vsub.f32 %v331_v45, %v336_v53 }
 0x2fd   :  { %v342_v55 = vmul.f32 1.442695, %v340_v54 }
 0x2fe   :  { %v339_v56 = vpop.xlane.xlu1 %338 }
 0x2ff   :  { %6635 = vpow2.f32 %v342_v55  ;;  %v341_v58 = vsub.f32 %v332_v49, %v339_v56 }
 0x301   :  { %v344_v59 = vmul.f32 1.442695, %v341_v58 }
 0x302   :  { %v600_v60 = vpop.permute.xlu1 %599 }
 0x303   :  { %6637 = vpow2.f32 %v344_v59  ;;  %6254 = vmatpush3.xpose.msk.msra.mxu0 %vm179_vm2, %v600_v60 }
 0x304   :  { %6263 = vmatprep.subr.mxu0 %v6866_v0 }
 0x306   :  { %v776_v62 = vpop.permute.xlu1 %775  ;;  %6256 = vmatmul.mubr.msk.f32.vlgmr.msra.gmra.mrb[6].mxu0 %vm179_vm2, %v598_v61 }
 0x307   :  { %6264 = vmatpush3.msra.mxu0 %v776_v62  ;;  %6265 = vmatprep.mubr.msk.f32.mxu0 %vm6867_vm1, %v6866_v0 }
 0x308   :  { %6273 = vmatprep.subr.mxu0 %v6866_v0 }
 0x309   :  { %v7027_v63 = vpop.eup %6635 }
 0x30a   :  { %6241 = vmatmul.mubr.msk.f32.vlgmr.msra.gmra.mrb[2].mxu1 %vm333_vm3, %v7027_v63 }
 0x30b   :  { %6244 = vmatpush3.msra.mxu1 %v6986_v40  ;;  %6245 = vmatprep.mubr.msk.f32.mxu1 %vm6867_vm1, %v6866_v0 }
 0x30c   :  { %6248 = vmatprep.subr.mxu1 %v6866_v0 }
 0x30d   :  { %v7035_v1 = vpop.eup %6637 }
 0x30e   :  { %6246 = vmatmul.mubr.msk.f32.vlgmr.msra.gmra.mrb[4].mxu1 %vm333_vm3, %v7035_v1 }
 0x30f   :  { %6250 = vmatprep.mubr.msk.f32.mxu1 %vm6867_vm1, %v6866_v0 }
 0x312   :  { %6249 = vmatpush3.xpose.msk.msra.mxu1 %vm179_vm2, %v522_v52 }
 0x313   :  { %6258 = vmatprep.subr.mxu1 %v6866_v0 }
 0x315   :  { %6251 = vmatmul.mubr.msk.f32.vlgmr.msra.gmra.mrb[6].mxu1 %vm179_vm2, %v520_v57 }
 0x316   :  { %6259 = vmatpush3.msra.mxu1 %v699_v2  ;;  %6260 = vmatprep.mubr.msk.f32.mxu1 %vm6867_vm1, %v6866_v0 }
 0x317   :  { %6268 = vmatprep.subr.mxu1 %v6866_v0 }
 0x3d9   :  { %v671_v3 = vpop.f32.mrb[6].mxu0 }
 0x3da   :  { %v676_v4 = vmul.f32 0.5, %v671_v3  ;;  %v6257_v5 = vpop.f32.mrb[7].mxu0 }
 0x3dc   :  { %v680_v6 = vsel %vm333_vm3, %v676_v4, -inf }
 0x3dd   :  { %v7048_v7 = vpop.f32.mrb[2].mxu1  ;;  %681 = vmax.xlane.f32.xlu1 %v680_v6 }
 0x3de   :  { %7861 = vst [vmem:[#allocation12_spill] sm:$0xff] %v7048_v7  ;;  %v6242_v8 = vpop.f32.mrb[3].mxu1 }
 0x3e1   :  { %v7050_v9 = vpop.f32.mrb[4].mxu1 }
 0x3e2   :  { %7862 = vst [vmem:[#allocation13_spill] sm:$0xff] %v7050_v9  ;;  %v6247_v10 = vpop.f32.mrb[5].mxu1 }
 0x3e8   :  { %v593_v11 = vpop.f32.mrb[6].mxu1 }
 0x3e9   :  { %v675_v12 = vmul.f32 0.5, %v593_v11  ;;  %v6252_v13 = vpop.f32.mrb[7].mxu1 }
 0x3eb   :  { %v677_v14 = vsel %vm333_vm3, %v675_v12, -inf }
 0x3ec   :  { %678 = vmax.xlane.f32.xlu0 %v677_v14 }
 0x3ee   :  { %869 = vrot.lane.b32.xlu1 %v6981_v34, %s6872_s11 }
 0x3f2   :  { %1123 = vrot.lane.b32.xlu1 %v6986_v40, %s6872_s11 }
 0x3f6   :  { %1219 = vrot.lane.b32.xlu1 %v6981_v34, %s6873_s12 }
 0x402   :  { %949 = vrot.lane.b32.xlu0 %v6984_v38, %s6871_s10 }
 0x406   :  { %947 = vrot.lane.b32.xlu0 %v6984_v38, %s6872_s11 }
 0x46a   :  { %v682_v15 = vpop.xlane.xlu1 %681 }
 0x46b   :  { %v684_v16 = vsub.f32 %v676_v4, %v682_v15 }
 0x46d   :  { %v687_v17 = vmul.f32 1.442695, %v684_v16 }
 0x46e   :  { %v870_v22 = vpop.permute.xlu1 %869 }
 0x46f   :  { %6639 = vpow2.f32 %v687_v17 }
 0x472   :  { %v1124_v26 = vpop.permute.xlu1 %1123 }
 0x476   :  { %v1220_v48 = vpop.permute.xlu1 %1219 }
 0x479   :  { %v7063_v19 = vpop.eup %6639  ;;  %v679_v20 = vpop.xlane.xlu0 %678 }
 0x47a   :  { %v683_v21 = vsub.f32 %v675_v12, %v679_v20  ;;  %6266 = vmatmul.mubr.msk.f32.vlgmr.msra.gmra.mrb[8].mxu0 %vm333_vm3, %v7063_v19 }
 0x47b   :  { %6275 = vmatprep.mubr.msk.f32.mxu0 %vm6867_vm1, %v6866_v0 }
 0x47c   :  { %v685_v23 = vmul.f32 1.442695, %v683_v21 }
 0x47d   :  { %v950_v24 = vpop.permute.xlu0 %949 }
 0x47e   :  { %6641 = vpow2.f32 %v685_v23  ;;  %6274 = vmatpush3.xpose.msk.msra.mxu0 %vm179_vm2, %v950_v24 }
 0x47f   :  { %6283 = vmatprep.subr.mxu0 %v6866_v0 }
 0x481   :  { %v948_v25 = vpop.permute.xlu0 %947 }
 0x482   :  { %6276 = vmatmul.mubr.msk.f32.vlgmr.msra.gmra.mrb[10].mxu0 %vm179_vm2, %v948_v25 }
 0x483   :  { %6284 = vmatpush3.msra.mxu0 %v1124_v26  ;;  %6285 = vmatprep.mubr.msk.f32.mxu0 %vm6867_vm1, %v6866_v0 }
 0x484   :  { %6293 = vmatprep.subr.mxu0 %v6866_v0 }
 0x488   :  { %v7075_v27 = vpop.eup %6641 }
 0x489   :  { %6261 = vmatmul.mubr.msk.f32.vlgmr.msra.gmra.mrb[8].mxu1 %vm333_vm3, %v7075_v27 }
 0x48a   :  { %6269 = vmatpush3.xpose.msk.msra.mxu1 %vm179_vm2, %v872_v18  ;;  %6270 = vmatprep.mubr.msk.f32.mxu1 %vm6867_vm1, %v6866_v0 }
 0x48b   :  { %6278 = vmatprep.subr.mxu1 %v6866_v0 }
 0x48d   :  { %6271 = vmatmul.mubr.msk.f32.vlgmr.msra.gmra.mrb[10].mxu1 %vm179_vm2, %v870_v22 }
 0x48e   :  { %6280 = vmatprep.mubr.msk.f32.mxu1 %vm6867_vm1, %v6866_v0 }
 0x54d   :  { %v7086_v28 = vpop.f32.mrb[8].mxu0 }
 0x54e   :  { %v6267_v29 = vpop.f32.mrb[9].mxu0 }
 0x555   :  { %v1021_v30 = vpop.f32.mrb[10].mxu0 }
 0x556   :  { %v1026_v31 = vmul.f32 0.5, %v1021_v30  ;;  %v6277_v32 = vpop.f32.mrb[11].mxu0 }
 0x558   :  { %v1030_v33 = vsel %vm333_vm3, %v1026_v31, -inf }
 0x559   :  { %1031 = vmax.xlane.f32.xlu0 %v1030_v33 }
 0x55c   :  { %v7089_v35 = vpop.f32.mrb[8].mxu1 }
 0x55d   :  { %v6262_v36 = vpop.f32.mrb[9].mxu1 }
 0x560   :  { %v943_v37 = vpop.f32.mrb[10].mxu1 }
 0x561   :  { %v1025_v39 = vmul.f32 0.5, %v943_v37  ;;  %v6272_v42 = vpop.f32.mrb[11].mxu1 }
 0x563   :  { %v1027_v43 = vsel %vm333_vm3, %v1025_v39, -inf }
 0x564   :  { %1028 = vmax.xlane.f32.xlu1 %v1027_v43 }
 0x56f   :  { %1047 = vrot.lane.b32.xlu0 %v6995_v41, %s6872_s11 }
 0x573   :  { %1297 = vrot.lane.b32.xlu0 %v6984_v38, %s6873_s12 }
 0x575   :  { %1217 = vrot.lane.b32.xlu1 %v6981_v34, %s6874_s13 }
 0x577   :  { %1295 = vrot.lane.b32.xlu0 %v6984_v38, %s6874_s13 }
 0x579   :  { %1471 = vrot.lane.b32.xlu1 %v6986_v40, %s6874_s13 }
 0x57d   :  { %1567 = vrot.lane.b32.xlu1 %v6981_v34, %s6875_s14 }
 0x5e6   :  { %v1032_v44 = vpop.xlane.xlu0 %1031 }
 0x5e7   :  { %v1034_v45 = vsub.f32 %v1026_v31, %v1032_v44 }
 0x5e9   :  { %v1037_v46 = vmul.f32 1.442695, %v1034_v45 }
 0x5ea   :  { %v1048_v47 = vpop.permute.xlu0 %1047 }
 0x5eb   :  { %6643 = vpow2.f32 %v1037_v46  ;;  %6279 = vmatpush3.msra.mxu1 %v1048_v47 }
 0x5ec   :  { %6288 = vmatprep.subr.mxu1 %v6866_v0 }
 0x5ee   :  { %v1298_v51 = vpop.permute.xlu0 %1297 }
 0x5f1   :  { %v1029_v49 = vpop.xlane.xlu1 %1028 }
 0x5f2   :  { %v1033_v50 = vsub.f32 %v1025_v39, %v1029_v49  ;;  %v1296_v55 = vpop.permute.xlu0 %1295 }
 0x5f4   :  { %v1035_v52 = vmul.f32 1.442695, %v1033_v50 }
 0x5f5   :  { %v7105_v53 = vpop.eup %6643  ;;  %v1218_v54 = vpop.permute.xlu1 %1217 }
 0x5f6   :  { %6645 = vpow2.f32 %v1035_v52  ;;  %6286 = vmatmul.mubr.msk.f32.vlgmr.msra.gmra.mrb[12].mxu0 %vm333_vm3, %v7105_v53 }
 0x5f7   :  { %6294 = vmatpush3.xpose.msk.msra.mxu0 %vm179_vm2, %v1298_v51  ;;  %6295 = vmatprep.mubr.msk.f32.mxu0 %vm6867_vm1, %v6866_v0 }
 0x5f8   :  { %6303 = vmatprep.subr.mxu0 %v6866_v0 }
 0x5f9   :  { %v1472_v56 = vpop.permute.xlu1 %1471 }
 0x5fa   :  { %6296 = vmatmul.mubr.msk.f32.vlgmr.msra.gmra.mrb[14].mxu0 %vm179_vm2, %v1296_v55 }
 0x5fb   :  { %6304 = vmatpush3.msra.mxu0 %v1472_v56  ;;  %6305 = vmatprep.mubr.msk.f32.mxu0 %vm6867_vm1, %v6866_v0 }
 0x5fc   :  { %6313 = vmatprep.subr.mxu0 %v6866_v0 }
 0x5fd   :  { %v1568_v15 = vpop.permute.xlu1 %1567 }
 0x600   :  { %v7117_v57 = vpop.eup %6645 }
 0x601   :  { %6281 = vmatmul.mubr.msk.f32.vlgmr.msra.gmra.mrb[12].mxu1 %vm333_vm3, %v7117_v57 }
 0x602   :  { %6289 = vmatpush3.xpose.msk.msra.mxu1 %vm179_vm2, %v1220_v48  ;;  %6290 = vmatprep.mubr.msk.f32.mxu1 %vm6867_vm1, %v6866_v0 }
 0x603   :  { %6298 = vmatprep.subr.mxu1 %v6866_v0 }
 0x605   :  { %6291 = vmatmul.mubr.msk.f32.vlgmr.msra.gmra.mrb[14].mxu1 %vm179_vm2, %v1218_v54 }
 0x606   :  { %6300 = vmatprep.mubr.msk.f32.mxu1 %vm6867_vm1, %v6866_v0 }
 0x6c9   :  { %v7128_v58 = vpop.f32.mrb[12].mxu0 }
 0x6ca   :  { %v6287_v59 = vpop.f32.mrb[13].mxu0 }
 0x6cd   :  { %v1369_v60 = vpop.f32.mrb[14].mxu0 }
 0x6ce   :  { %v1374_v61 = vmul.f32 0.5, %v1369_v60  ;;  %v6297_v62 = vpop.f32.mrb[15].mxu0 }
 0x6d0   :  { %v1378_v2 = vsel %vm333_vm3, %v1374_v61, -inf }
 0x6d1   :  { %1379 = vmax.xlane.f32.xlu0 %v1378_v2 }
 0x6d4   :  { %v7131_v3 = vpop.f32.mrb[12].mxu1 }
 0x6d5   :  { %v6282_v4 = vpop.f32.mrb[13].mxu1 }
 0x6d8   :  { %v1291_v5 = vpop.f32.mrb[14].mxu1 }
 0x6d9   :  { %v1373_v6 = vmul.f32 0.5, %v1291_v5  ;;  %v6292_v8 = vpop.f32.mrb[15].mxu1 }
 0x6db   :  { %v1375_v10 = vsel %vm333_vm3, %v1373_v6, -inf }
 0x6dc   :  { %1376 = vmax.xlane.f32.xlu1 %v1375_v10 }
 0x6e7   :  { %1395 = vrot.lane.b32.xlu0 %v6995_v41, %s6874_s13 }
 0x6eb   :  { %1645 = vrot.lane.b32.xlu0 %v6984_v38, %s6875_s14 }
 0x6ed   :  { %1565 = vrot.lane.b32.xlu1 %v6981_v34, %s6876_s15 }
 0x6ef   :  { %1643 = vrot.lane.b32.xlu0 %v6984_v38, %s6876_s15 }
 0x6f1   :  { %1819 = vrot.lane.b32.xlu1 %v6986_v40, %s6876_s15 }
 0x6f5   :  { %1915 = vrot.lane.b32.xlu1 %v6981_v34, %s6877_s16 }
 0x75e   :  { %v1380_v11 = vpop.xlane.xlu0 %1379 }
 0x75f   :  { %v1382_v12 = vsub.f32 %v1374_v61, %v1380_v11 }
 0x761   :  { %v1385_v13 = vmul.f32 1.442695, %v1382_v12 }
 0x762   :  { %v1396_v14 = vpop.permute.xlu0 %1395 }
 0x763   :  { %6647 = vpow2.f32 %v1385_v13  ;;  %6299 = vmatpush3.msra.mxu1 %v1396_v14 }
 0x764   :  { %6308 = vmatprep.subr.mxu1 %v6866_v0 }
 0x766   :  { %v1646_v18 = vpop.permute.xlu0 %1645 }
 0x769   :  { %v1377_v16 = vpop.xlane.xlu1 %1376 }
 0x76a   :  { %v1381_v17 = vsub.f32 %v1373_v6, %v1377_v16  ;;  %v1644_v23 = vpop.permute.xlu0 %1643 }
 0x76c   :  { %v1383_v20 = vmul.f32 1.442695, %v1381_v17 }
 0x76d   :  { %v7147_v21 = vpop.eup %6647  ;;  %v1566_v22 = vpop.permute.xlu1 %1565 }
 0x76e   :  { %6649 = vpow2.f32 %v1383_v20  ;;  %6306 = vmatmul.mubr.msk.f32.vlgmr.msra.gmra.mrb[16].mxu0 %vm333_vm3, %v7147_v21 }
 0x76f   :  { %6314 = vmatpush3.xpose.msk.msra.mxu0 %vm179_vm2, %v1646_v18  ;;  %6315 = vmatprep.mubr.msk.f32.mxu0 %vm6867_vm1, %v6866_v0 }
 0x770   :  { %6323 = vmatprep.subr.mxu0 %v6866_v0 }
 0x771   :  { %v1820_v24 = vpop.permute.xlu1 %1819 }
 0x772   :  { %6316 = vmatmul.mubr.msk.f32.vlgmr.msra.gmra.mrb[18].mxu0 %vm179_vm2, %v1644_v23 }
 0x773   :  { %6324 = vmatpush3.msra.mxu0 %v1820_v24  ;;  %6325 = vmatprep.mubr.msk.f32.mxu0 %vm6867_vm1, %v6866_v0 }
 0x774   :  { %6333 = vmatprep.subr.mxu0 %v6866_v0 }
 0x775   :  { %v1916_v49 = vpop.permute.xlu1 %1915 }
 0x778   :  { %v7159_v25 = vpop.eup %6649 }
 0x779   :  { %6301 = vmatmul.mubr.msk.f32.vlgmr.msra.gmra.mrb[16].mxu1 %vm333_vm3, %v7159_v25 }
 0x77a   :  { %6309 = vmatpush3.xpose.msk.msra.mxu1 %vm179_vm2, %v1568_v15  ;;  %6310 = vmatprep.mubr.msk.f32.mxu1 %vm6867_vm1, %v6866_v0 }
 0x77b   :  { %6318 = vmatprep.subr.mxu1 %v6866_v0 }
 0x77d   :  { %6311 = vmatmul.mubr.msk.f32.vlgmr.msra.gmra.mrb[18].mxu1 %vm179_vm2, %v1566_v22 }
 0x77e   :  { %6320 = vmatprep.mubr.msk.f32.mxu1 %vm6867_vm1, %v6866_v0 }
 0x841   :  { %v7170_v26 = vpop.f32.mrb[16].mxu0 }
 0x842   :  { %v6307_v29 = vpop.f32.mrb[17].mxu0 }
 0x845   :  { %v1717_v30 = vpop.f32.mrb[18].mxu0 }
 0x846   :  { %v1722_v31 = vmul.f32 0.5, %v1717_v30  ;;  %v6317_v32 = vpop.f32.mrb[19].mxu0 }
 0x848   :  { %v1726_v33 = vsel %vm333_vm3, %v1722_v31, -inf }
 0x849   :  { %1727 = vmax.xlane.f32.xlu0 %v1726_v33 }
 0x84c   :  { %v7173_v36 = vpop.f32.mrb[16].mxu1 }
 0x84d   :  { %v6302_v37 = vpop.f32.mrb[17].mxu1 }
 0x850   :  { %v1639_v39 = vpop.f32.mrb[18].mxu1 }
 0x851   :  { %v1721_v42 = vmul.f32 0.5, %v1639_v39  ;;  %v6312_v43 = vpop.f32.mrb[19].mxu1 }
 0x853   :  { %v1723_v44 = vsel %vm333_vm3, %v1721_v42, -inf }
 0x854   :  { %1724 = vmax.xlane.f32.xlu1 %v1723_v44 }
 0x85f   :  { %1743 = vrot.lane.b32.xlu0 %v6995_v41, %s6876_s15 }
 0x863   :  { %1993 = vrot.lane.b32.xlu0 %v6984_v38, %s6877_s16 }
 0x865   :  { %1913 = vrot.lane.b32.xlu1 %v6981_v34, %s6878_s1 }
 0x867   :  { %1991 = vrot.lane.b32.xlu0 %v6984_v38, %s6878_s1 }
 0x869   :  { %2167 = vrot.lane.b32.xlu1 %v6986_v40, %s6878_s1 }
 0x86d   :  { %2263 = vrot.lane.b32.xlu1 %v6981_v34, %s6879_s18 }
 0x8d6   :  { %v1728_v45 = vpop.xlane.xlu0 %1727 }
 0x8d7   :  { %v1730_v46 = vsub.f32 %v1722_v31, %v1728_v45 }
 0x8d9   :  { %v1733_v47 = vmul.f32 1.442695, %v1730_v46 }
 0x8da   :  { %v1744_v48 = vpop.permute.xlu0 %1743 }
 0x8db   :  { %6651 = vpow2.f32 %v1733_v47  ;;  %6319 = vmatpush3.msra.mxu1 %v1744_v48 }
 0x8dc   :  { %6328 = vmatprep.subr.mxu1 %v6866_v0 }
 0x8de   :  { %v1994_v52 = vpop.permute.xlu0 %1993 }
 0x8e1   :  { %v1725_v50 = vpop.xlane.xlu1 %1724 }
 0x8e2   :  { %v1729_v51 = vsub.f32 %v1721_v42, %v1725_v50  ;;  %v1992_v59 = vpop.permute.xlu0 %1991 }
 0x8e4   :  { %v1731_v54 = vmul.f32 1.442695, %v1729_v51 }
 0x8e5   :  { %v7189_v55 = vpop.eup %6651  ;;  %v1914_v56 = vpop.permute.xlu1 %1913 }
 0x8e6   :  { %6653 = vpow2.f32 %v1731_v54  ;;  %6326 = vmatmul.mubr.msk.f32.vlgmr.msra.gmra.mrb[20].mxu0 %vm333_vm3, %v7189_v55 }
 0x8e7   :  { %6334 = vmatpush3.xpose.msk.msra.mxu0 %vm179_vm2, %v1994_v52  ;;  %6335 = vmatprep.mubr.msk.f32.mxu0 %vm6867_vm1, %v6866_v0 }
 0x8e8   :  { %6343 = vmatprep.subr.mxu0 %v6866_v0 }
 0x8e9   :  { %v2168_v60 = vpop.permute.xlu1 %2167 }
 0x8ea   :  { %6336 = vmatmul.mubr.msk.f32.vlgmr.msra.gmra.mrb[22].mxu0 %vm179_vm2, %v1992_v59 }
 0x8eb   :  { %6344 = vmatpush3.msra.mxu0 %v2168_v60  ;;  %6345 = vmatprep.mubr.msk.f32.mxu0 %vm6867_vm1, %v6866_v0 }
 0x8ec   :  { %6353 = vmatprep.subr.mxu0 %v6866_v0 }
 0x8ed   :  { %v2264_v22 = vpop.permute.xlu1 %2263 }
 0x8f0   :  { %v7201_v61 = vpop.eup %6653 }
 0x8f1   :  { %6321 = vmatmul.mubr.msk.f32.vlgmr.msra.gmra.mrb[20].mxu1 %vm333_vm3, %v7201_v61 }
 0x8f2   :  { %6329 = vmatpush3.xpose.msk.msra.mxu1 %vm179_vm2, %v1916_v49  ;;  %6330 = vmatprep.mubr.msk.f32.mxu1 %vm6867_vm1, %v6866_v0 }
 0x8f3   :  { %6338 = vmatprep.subr.mxu1 %v6866_v0 }
 0x8f5   :  { %6331 = vmatmul.mubr.msk.f32.vlgmr.msra.gmra.mrb[22].mxu1 %vm179_vm2, %v1914_v56 }
 0x8f6   :  { %6340 = vmatprep.mubr.msk.f32.mxu1 %vm6867_vm1, %v6866_v0 }
 0x9b9   :  { %v7212_v62 = vpop.f32.mrb[20].mxu0 }
 0x9ba   :  { %v6327_v2 = vpop.f32.mrb[21].mxu0 }
 0x9bd   :  { %v2065_v4 = vpop.f32.mrb[22].mxu0 }
 0x9be   :  { %v2070_v5 = vmul.f32 0.5, %v2065_v4  ;;  %v6337_v6 = vpop.f32.mrb[23].mxu0 }
 0x9c0   :  { %v2074_v8 = vsel %vm333_vm3, %v2070_v5, -inf }
 0x9c1   :  { %2075 = vmax.xlane.f32.xlu0 %v2074_v8 }
 0x9c4   :  { %v7215_v10 = vpop.f32.mrb[20].mxu1 }
 0x9c5   :  { %v6322_v11 = vpop.f32.mrb[21].mxu1 }
 0x9c8   :  { %v1987_v12 = vpop.f32.mrb[22].mxu1 }
 0x9c9   :  { %v2069_v13 = vmul.f32 0.5, %v1987_v12  ;;  %v6332_v14 = vpop.f32.mrb[23].mxu1 }
 0x9cb   :  { %v2071_v15 = vsel %vm333_vm3, %v2069_v13, -inf }
 0x9cc   :  { %2072 = vmax.xlane.f32.xlu1 %v2071_v15 }
 0x9d7   :  { %2091 = vrot.lane.b32.xlu0 %v6995_v41, %s6878_s1 }
 0x9db   :  { %2341 = vrot.lane.b32.xlu0 %v6984_v38, %s6879_s18 }
 0x9dd   :  { %2261 = vrot.lane.b32.xlu1 %v6981_v34, %s6880_s19 }
 0x9df   :  { %2339 = vrot.lane.b32.xlu0 %v6984_v38, %s6880_s19 }
 0x9e1   :  { %2515 = vrot.lane.b32.xlu1 %v6986_v40, %s6880_s19 }
 0x9e5   :  { %2611 = vrot.lane.b32.xlu1 %v6981_v34, %s6881_s20 }
 0xa4e   :  { %v2076_v16 = vpop.xlane.xlu0 %2075 }
 0xa4f   :  { %v2078_v17 = vsub.f32 %v2070_v5, %v2076_v16 }
 0xa51   :  { %v2081_v18 = vmul.f32 1.442695, %v2078_v17 }
 0xa52   :  { %v2092_v20 = vpop.permute.xlu0 %2091 }
 0xa53   :  { %6655 = vpow2.f32 %v2081_v18  ;;  %6339 = vmatpush3.msra.mxu1 %v2092_v20 }
 0xa54   :  { %6348 = vmatprep.subr.mxu1 %v6866_v0 }
 0xa56   :  { %v2342_v29 = vpop.permute.xlu0 %2341 }
 0xa59   :  { %v2073_v23 = vpop.xlane.xlu1 %2072 }
 0xa5a   :  { %v2077_v24 = vsub.f32 %v2069_v13, %v2073_v23  ;;  %v2340_v33 = vpop.permute.xlu0 %2339 }
 0xa5c   :  { %v2079_v30 = vmul.f32 1.442695, %v2077_v24 }
 0xa5d   :  { %v7231_v31 = vpop.eup %6655  ;;  %v2262_v32 = vpop.permute.xlu1 %2261 }
 0xa5e   :  { %6657 = vpow2.f32 %v2079_v30  ;;  %6346 = vmatmul.mubr.msk.f32.vlgmr.msra.gmra.mrb[24].mxu0 %vm333_vm3, %v7231_v31 }
 0xa5f   :  { %6354 = vmatpush3.xpose.msk.msra.mxu0 %vm179_vm2, %v2342_v29  ;;  %6355 = vmatprep.mubr.msk.f32.mxu0 %vm6867_vm1, %v6866_v0 }
 0xa60   :  { %6363 = vmatprep.subr.mxu0 %v6866_v0 }
 0xa61   :  { %v2516_v37 = vpop.permute.xlu1 %2515 }
 0xa62   :  { %6356 = vmatmul.mubr.msk.f32.vlgmr.msra.gmra.mrb[26].mxu0 %vm179_vm2, %v2340_v33 }
 0xa63   :  { %6364 = vmatpush3.msra.mxu0 %v2516_v37  ;;  %6365 = vmatprep.mubr.msk.f32.mxu0 %vm6867_vm1, %v6866_v0 }
 0xa64   :  { %6373 = vmatprep.subr.mxu0 %v6866_v0 }
 0xa65   :  { %v2612_v4 = vpop.permute.xlu1 %2611 }
 0xa68   :  { %v7243_v39 = vpop.eup %6657 }
 0xa69   :  { %6341 = vmatmul.mubr.msk.f32.vlgmr.msra.gmra.mrb[24].mxu1 %vm333_vm3, %v7243_v39 }
 0xa6a   :  { %6349 = vmatpush3.xpose.msk.msra.mxu1 %vm179_vm2, %v2264_v22  ;;  %6350 = vmatprep.mubr.msk.f32.mxu1 %vm6867_vm1, %v6866_v0 }
 0xa6b   :  { %6358 = vmatprep.subr.mxu1 %v6866_v0 }
 0xa6d   :  { %6351 = vmatmul.mubr.msk.f32.vlgmr.msra.gmra.mrb[26].mxu1 %vm179_vm2, %v2262_v32 }
 0xa6e   :  { %6360 = vmatprep.mubr.msk.f32.mxu1 %vm6867_vm1, %v6866_v0 }
 0xb31   :  { %v7254_v42 = vpop.f32.mrb[24].mxu0 }
 0xb32   :  { %v6347_v43 = vpop.f32.mrb[25].mxu0 }
 0xb35   :  { %v2413_v44 = vpop.f32.mrb[26].mxu0 }
 0xb36   :  { %v2418_v45 = vmul.f32 0.5, %v2413_v44  ;;  %v6357_v46 = vpop.f32.mrb[27].mxu0 }
 0xb38   :  { %v2422_v47 = vsel %vm333_vm3, %v2418_v45, -inf }
 0xb39   :  { %2423 = vmax.xlane.f32.xlu0 %v2422_v47 }
 0xb3c   :  { %v7257_v48 = vpop.f32.mrb[24].mxu1 }
 0xb3d   :  { %v6342_v49 = vpop.f32.mrb[25].mxu1 }
 0xb40   :  { %v2335_v50 = vpop.f32.mrb[26].mxu1 }
 0xb41   :  { %v2417_v51 = vmul.f32 0.5, %v2335_v50  ;;  %v6352_v52 = vpop.f32.mrb[27].mxu1 }
 0xb43   :  { %v2419_v54 = vsel %vm333_vm3, %v2417_v51, -inf }
 0xb44   :  { %2420 = vmax.xlane.f32.xlu1 %v2419_v54 }
 0xb4f   :  { %2439 = vrot.lane.b32.xlu0 %v6995_v41, %s6880_s19 }
 0xb53   :  { %2689 = vrot.lane.b32.xlu0 %v6984_v38, %s6881_s20 }
 0xb55   :  { %2609 = vrot.lane.b32.xlu1 %v6981_v34, %s6882_s21 }
 0xb57   :  { %2687 = vrot.lane.b32.xlu0 %v6984_v38, %s6882_s21 }
 0xb59   :  { %2863 = vrot.lane.b32.xlu1 %v6986_v40, %s6882_s21 }
 0xb5d   :  { %2959 = vrot.lane.b32.xlu1 %v6981_v34, %s6883_s22 }
 0xbc6   :  { %v2424_v56 = vpop.xlane.xlu0 %2423 }
 0xbc7   :  { %v2426_v59 = vsub.f32 %v2418_v45, %v2424_v56 }
 0xbc9   :  { %v2429_v60 = vmul.f32 1.442695, %v2426_v59 }
 0xbca   :  { %v2440_v2 = vpop.permute.xlu0 %2439 }
 0xbcb   :  { %6659 = vpow2.f32 %v2429_v60  ;;  %6359 = vmatpush3.msra.mxu1 %v2440_v2 }
 0xbcc   :  { %6368 = vmatprep.subr.mxu1 %v6866_v0 }
 0xbce   :  { %v2690_v8 = vpop.permute.xlu0 %2689 }
 0xbd1   :  { %v2421_v5 = vpop.xlane.xlu1 %2420 }
 0xbd2   :  { %v2425_v6 = vsub.f32 %v2417_v51, %v2421_v5  ;;  %v2688_v14 = vpop.permute.xlu0 %2687 }
 0xbd4   :  { %v2427_v11 = vmul.f32 1.442695, %v2425_v6 }
 0xbd5   :  { %v7273_v12 = vpop.eup %6659  ;;  %v2610_v13 = vpop.permute.xlu1 %2609 }
 0xbd6   :  { %6661 = vpow2.f32 %v2427_v11  ;;  %6366 = vmatmul.mubr.msk.f32.vlgmr.msra.gmra.mrb[28].mxu0 %vm333_vm3, %v7273_v12 }
 0xbd7   :  { %6374 = vmatpush3.xpose.msk.msra.mxu0 %vm179_vm2, %v2690_v8  ;;  %6375 = vmatprep.mubr.msk.f32.mxu0 %vm6867_vm1, %v6866_v0 }
 0xbd8   :  { %6383 = vmatprep.subr.mxu0 %v6866_v0 }
 0xbd9   :  { %v2864_v15 = vpop.permute.xlu1 %2863 }
 0xbda   :  { %6376 = vmatmul.mubr.msk.f32.vlgmr.msra.gmra.mrb[30].mxu0 %vm179_vm2, %v2688_v14 }
 0xbdb   :  { %6384 = vmatpush3.msra.mxu0 %v2864_v15  ;;  %6385 = vmatprep.mubr.msk.f32.mxu0 %vm6867_vm1, %v6866_v0 }
 0xbdc   :  { %6393 = vmatprep.subr.mxu0 %v6866_v0 }
 0xbdd   :  { %v2960_v49 = vpop.permute.xlu1 %2959 }
 0xbe0   :  { %v7285_v16 = vpop.eup %6661 }
 0xbe1   :  { %6361 = vmatmul.mubr.msk.f32.vlgmr.msra.gmra.mrb[28].mxu1 %vm333_vm3, %v7285_v16 }
 0xbe2   :  { %6369 = vmatpush3.xpose.msk.msra.mxu1 %vm179_vm2, %v2612_v4  ;;  %6370 = vmatprep.mubr.msk.f32.mxu1 %vm6867_vm1, %v6866_v0 }
 0xbe3   :  { %6378 = vmatprep.subr.mxu1 %v6866_v0 }
 0xbe5   :  { %6371 = vmatmul.mubr.msk.f32.vlgmr.msra.gmra.mrb[30].mxu1 %vm179_vm2, %v2610_v13 }
 0xbe6   :  { %6380 = vmatprep.mubr.msk.f32.mxu1 %vm6867_vm1, %v6866_v0 }
 0xca9   :  { %v7296_v17 = vpop.f32.mrb[28].mxu0 }
 0xcaa   :  { %v6367_v18 = vpop.f32.mrb[29].mxu0 }
 0xcad   :  { %v2761_v20 = vpop.f32.mrb[30].mxu0 }
 0xcae   :  { %v2766_v22 = vmul.f32 0.5, %v2761_v20  ;;  %v6377_v23 = vpop.f32.mrb[31].mxu0 }
 0xcb0   :  { %v2770_v24 = vsel %vm333_vm3, %v2766_v22, -inf }
 0xcb1   :  { %2771 = vmax.xlane.f32.xlu0 %v2770_v24 }
 0xcb4   :  { %v7299_v29 = vpop.f32.mrb[28].mxu1 }
 0xcb5   :  { %v6362_v30 = vpop.f32.mrb[29].mxu1 }
 0xcb8   :  { %v2683_v32 = vpop.f32.mrb[30].mxu1 }
 0xcb9   :  { %v2765_v33 = vmul.f32 0.5, %v2683_v32  ;;  %v6372_v37 = vpop.f32.mrb[31].mxu1 }
 0xcbb   :  { %v2767_v43 = vsel %vm333_vm3, %v2765_v33, -inf }
 0xcbc   :  { %2768 = vmax.xlane.f32.xlu1 %v2767_v43 }
 0xcc7   :  { %2787 = vrot.lane.b32.xlu0 %v6995_v41, %s6882_s21 }
 0xccb   :  { %3037 = vrot.lane.b32.xlu0 %v6984_v38, %s6883_s22 }
 0xccd   :  { %2957 = vrot.lane.b32.xlu1 %v6981_v34, %s6884_s23 }
 0xccf   :  { %3035 = vrot.lane.b32.xlu0 %v6984_v38, %s6884_s23 }
 0xcd1   :  { %3211 = vrot.lane.b32.xlu1 %v6986_v40, %s6884_s23 }
 0xcd5   :  { %3307 = vrot.lane.b32.xlu1 %v6981_v34, %s6885_s24 }
 0xd3e   :  { %v2772_v44 = vpop.xlane.xlu0 %2771 }
 0xd3f   :  { %v2774_v45 = vsub.f32 %v2766_v22, %v2772_v44 }
 0xd41   :  { %v2777_v46 = vmul.f32 1.442695, %v2774_v45 }
 0xd42   :  { %v2788_v47 = vpop.permute.xlu0 %2787 }
 0xd43   :  { %6663 = vpow2.f32 %v2777_v46  ;;  %6379 = vmatpush3.msra.mxu1 %v2788_v47 }
 0xd44   :  { %6388 = vmatprep.subr.mxu1 %v6866_v0 }
 0xd46   :  { %v3038_v52 = vpop.permute.xlu0 %3037 }
 0xd49   :  { %v2769_v50 = vpop.xlane.xlu1 %2768 }
 0xd4a   :  { %v2773_v51 = vsub.f32 %v2765_v33, %v2769_v50  ;;  %v3036_v60 = vpop.permute.xlu0 %3035 }
 0xd4c   :  { %v2775_v54 = vmul.f32 1.442695, %v2773_v51 }
 0xd4d   :  { %v7315_v56 = vpop.eup %6663  ;;  %v2958_v59 = vpop.permute.xlu1 %2957 }
 0xd4e   :  { %6665 = vpow2.f32 %v2775_v54  ;;  %6386 = vmatmul.mubr.msk.f32.vlgmr.msra.gmra.mrb[32].mxu0 %vm333_vm3, %v7315_v56 }
 0xd4f   :  { %6394 = vmatpush3.xpose.msk.msra.mxu0 %vm179_vm2, %v3038_v52  ;;  %6395 = vmatprep.mubr.msk.f32.mxu0 %vm6867_vm1, %v6866_v0 }
 0xd50   :  { %6403 = vmatprep.subr.mxu0 %v6866_v0 }
 0xd51   :  { %v3212_v2 = vpop.permute.xlu1 %3211 }
 0xd52   :  { %6396 = vmatmul.mubr.msk.f32.vlgmr.msra.gmra.mrb[34].mxu0 %vm179_vm2, %v3036_v60 }
 0xd53   :  { %6404 = vmatpush3.msra.mxu0 %v3212_v2  ;;  %6405 = vmatprep.mubr.msk.f32.mxu0 %vm6867_vm1, %v6866_v0 }
 0xd54   :  { %6413 = vmatprep.subr.mxu0 %v6866_v0 }
 0xd55   :  { %v3308_v43 = vpop.permute.xlu1 %3307 }
 0xd58   :  { %v7327_v4 = vpop.eup %6665 }
 0xd59   :  { %6381 = vmatmul.mubr.msk.f32.vlgmr.msra.gmra.mrb[32].mxu1 %vm333_vm3, %v7327_v4 }
 0xd5a   :  { %6389 = vmatpush3.xpose.msk.msra.mxu1 %vm179_vm2, %v2960_v49  ;;  %6390 = vmatprep.mubr.msk.f32.mxu1 %vm6867_vm1, %v6866_v0 }
 0xd5b   :  { %6398 = vmatprep.subr.mxu1 %v6866_v0 }
 0xd5d   :  { %6391 = vmatmul.mubr.msk.f32.vlgmr.msra.gmra.mrb[34].mxu1 %vm179_vm2, %v2958_v59 }
 0xd5e   :  { %6400 = vmatprep.mubr.msk.f32.mxu1 %vm6867_vm1, %v6866_v0 }
 0xe21   :  { %v7338_v5 = vpop.f32.mrb[32].mxu0 }
 0xe22   :  { %v6387_v6 = vpop.f32.mrb[33].mxu0 }
 0xe25   :  { %v3109_v8 = vpop.f32.mrb[34].mxu0 }
 0xe26   :  { %v3114_v11 = vmul.f32 0.5, %v3109_v8  ;;  %v6397_v13 = vpop.f32.mrb[35].mxu0 }
 0xe28   :  { %v3118_v14 = vsel %vm333_vm3, %v3114_v11, -inf }
 0xe29   :  { %3119 = vmax.xlane.f32.xlu0 %v3118_v14 }
 0xe2c   :  { %v7341_v15 = vpop.f32.mrb[32].mxu1 }
 0xe2d   :  { %v6382_v18 = vpop.f32.mrb[33].mxu1 }
 0xe30   :  { %v3031_v20 = vpop.f32.mrb[34].mxu1 }
 0xe31   :  { %v3113_v22 = vmul.f32 0.5, %v3031_v20  ;;  %v6392_v23 = vpop.f32.mrb[35].mxu1 }
 0xe33   :  { %v3115_v24 = vsel %vm333_vm3, %v3113_v22, -inf }
 0xe34   :  { %3116 = vmax.xlane.f32.xlu1 %v3115_v24 }
 0xe3f   :  { %3135 = vrot.lane.b32.xlu0 %v6995_v41, %s6884_s23 }
 0xe43   :  { %3385 = vrot.lane.b32.xlu0 %v6984_v38, %s6885_s24 }
 0xe45   :  { %3305 = vrot.lane.b32.xlu1 %v6981_v34, %s6886_s25 }
 0xe47   :  { %3383 = vrot.lane.b32.xlu0 %v6984_v38, %s6886_s25 }
 0xe49   :  { %3559 = vrot.lane.b32.xlu1 %v6986_v40, %s6886_s25 }
 0xe4d   :  { %3655 = vrot.lane.b32.xlu1 %v6981_v34, %s6887_s26 }
 0xeb6   :  { %v3120_v30 = vpop.xlane.xlu0 %3119 }
 0xeb7   :  { %v3122_v32 = vsub.f32 %v3114_v11, %v3120_v30 }
 0xeb9   :  { %v3125_v33 = vmul.f32 1.442695, %v3122_v32 }
 0xeba   :  { %v3136_v37 = vpop.permute.xlu0 %3135 }
 0xebb   :  { %6667 = vpow2.f32 %v3125_v33  ;;  %6399 = vmatpush3.msra.mxu1 %v3136_v37 }
 0xebc   :  { %6408 = vmatprep.subr.mxu1 %v6866_v0 }
 0xebe   :  { %v3386_v46 = vpop.permute.xlu0 %3385 }
 0xec1   :  { %v3117_v44 = vpop.xlane.xlu1 %3116 }
 0xec2   :  { %v3121_v45 = vsub.f32 %v3113_v22, %v3117_v44  ;;  %v3384_v51 = vpop.permute.xlu0 %3383 }
 0xec4   :  { %v3123_v47 = vmul.f32 1.442695, %v3121_v45 }
 0xec5   :  { %v7357_v49 = vpop.eup %6667  ;;  %v3306_v50 = vpop.permute.xlu1 %3305 }
 0xec6   :  { %6669 = vpow2.f32 %v3123_v47  ;;  %6406 = vmatmul.mubr.msk.f32.vlgmr.msra.gmra.mrb[36].mxu0 %vm333_vm3, %v7357_v49 }
 0xec7   :  { %6414 = vmatpush3.xpose.msk.msra.mxu0 %vm179_vm2, %v3386_v46  ;;  %6415 = vmatprep.mubr.msk.f32.mxu0 %vm6867_vm1, %v6866_v0 }
 0xec8   :  { %6423 = vmatprep.subr.mxu0 %v6866_v0 }
 0xec9   :  { %v3560_v52 = vpop.permute.xlu1 %3559 }
 0xeca   :  { %6416 = vmatmul.mubr.msk.f32.vlgmr.msra.gmra.mrb[38].mxu0 %vm179_vm2, %v3384_v51 }
 0xecb   :  { %6424 = vmatpush3.msra.mxu0 %v3560_v52  ;;  %6425 = vmatprep.mubr.msk.f32.mxu0 %vm6867_vm1, %v6866_v0 }
 0xecc   :  { %6433 = vmatprep.subr.mxu0 %v6866_v0 }
 0xecd   :  { %v3656_v37 = vpop.permute.xlu1 %3655 }
 0xed0   :  { %v7369_v54 = vpop.eup %6669 }
 0xed1   :  { %6401 = vmatmul.mubr.msk.f32.vlgmr.msra.gmra.mrb[36].mxu1 %vm333_vm3, %v7369_v54 }
 0xed2   :  { %6409 = vmatpush3.xpose.msk.msra.mxu1 %vm179_vm2, %v3308_v43  ;;  %6410 = vmatprep.mubr.msk.f32.mxu1 %vm6867_vm1, %v6866_v0 }
 0xed3   :  { %6418 = vmatprep.subr.mxu1 %v6866_v0 }
 0xed5   :  { %6411 = vmatmul.mubr.msk.f32.vlgmr.msra.gmra.mrb[38].mxu1 %vm179_vm2, %v3306_v50 }
 0xed6   :  { %6420 = vmatprep.mubr.msk.f32.mxu1 %vm6867_vm1, %v6866_v0 }
 0xf99   :  { %v7380_v59 = vpop.f32.mrb[36].mxu0 }
 0xf9a   :  { %v6407_v60 = vpop.f32.mrb[37].mxu0 }
 0xf9d   :  { %v3457_v2 = vpop.f32.mrb[38].mxu0 }
 0xf9e   :  { %v3462_v6 = vmul.f32 0.5, %v3457_v2  ;;  %v6417_v8 = vpop.f32.mrb[39].mxu0 }
 0xfa0   :  { %v3466_v11 = vsel %vm333_vm3, %v3462_v6, -inf }
 0xfa1   :  { %3467 = vmax.xlane.f32.xlu0 %v3466_v11 }
 0xfa4   :  { %v7383_v13 = vpop.f32.mrb[36].mxu1 }
 0xfa5   :  { %v6402_v14 = vpop.f32.mrb[37].mxu1 }
 0xfa8   :  { %v3379_v18 = vpop.f32.mrb[38].mxu1 }
 0xfa9   :  { %v3461_v20 = vmul.f32 0.5, %v3379_v18  ;;  %v6412_v22 = vpop.f32.mrb[39].mxu1 }
 0xfab   :  { %v3463_v23 = vsel %vm333_vm3, %v3461_v20, -inf }
 0xfac   :  { %3464 = vmax.xlane.f32.xlu1 %v3463_v23 }
 0xfb7   :  { %3483 = vrot.lane.b32.xlu0 %v6995_v41, %s6886_s25 }
 0xfbb   :  { %3733 = vrot.lane.b32.xlu0 %v6984_v38, %s6887_s26 }
 0xfbd   :  { %3653 = vrot.lane.b32.xlu1 %v6981_v34, %s6888_s27 }
 0xfbf   :  { %3731 = vrot.lane.b32.xlu0 %v6984_v38, %s6888_s27 }
 0xfc1   :  { %3907 = vrot.lane.b32.xlu1 %v6986_v40, %s6888_s27 }
 0xfc5   :  { %4003 = vrot.lane.b32.xlu1 %v6981_v34, %s6889_s28 }
0x102e   :  { %v3468_v24 = vpop.xlane.xlu0 %3467 }
0x102f   :  { %v3470_v30 = vsub.f32 %v3462_v6, %v3468_v24 }
0x1031   :  { %v3473_v32 = vmul.f32 1.442695, %v3470_v30 }
0x1032   :  { %v3484_v33 = vpop.permute.xlu0 %3483 }
0x1033   :  { %6671 = vpow2.f32 %v3473_v32  ;;  %6419 = vmatpush3.msra.mxu1 %v3484_v33 }
0x1034   :  { %6428 = vmatprep.subr.mxu1 %v6866_v0 }
0x1036   :  { %v3734_v45 = vpop.permute.xlu0 %3733 }
0x1039   :  { %v3465_v43 = vpop.xlane.xlu1 %3464 }
0x103a   :  { %v3469_v44 = vsub.f32 %v3461_v20, %v3465_v43  ;;  %v3732_v51 = vpop.permute.xlu0 %3731 }
0x103c   :  { %v3471_v46 = vmul.f32 1.442695, %v3469_v44 }
0x103d   :  { %v7399_v47 = vpop.eup %6671  ;;  %v3654_v50 = vpop.permute.xlu1 %3653 }
0x103e   :  { %6673 = vpow2.f32 %v3471_v46  ;;  %6426 = vmatmul.mubr.msk.f32.vlgmr.msra.gmra.mrb[40].mxu0 %vm333_vm3, %v7399_v47 }
0x103f   :  { %6434 = vmatpush3.xpose.msk.msra.mxu0 %vm179_vm2, %v3734_v45  ;;  %6435 = vmatprep.mubr.msk.f32.mxu0 %vm6867_vm1, %v6866_v0 }
0x1040   :  { %6443 = vmatprep.subr.mxu0 %v6866_v0 }
0x1041   :  { %v3908_v52 = vpop.permute.xlu1 %3907 }
0x1042   :  { %6436 = vmatmul.mubr.msk.f32.vlgmr.msra.gmra.mrb[42].mxu0 %vm179_vm2, %v3732_v51 }
0x1043   :  { %6444 = vmatpush3.msra.mxu0 %v3908_v52  ;;  %6445 = vmatprep.mubr.msk.f32.mxu0 %vm6867_vm1, %v6866_v0 }
0x1044   :  { %6453 = vmatprep.subr.mxu0 %v6866_v0 }
0x1045   :  { %v4004_v45 = vpop.permute.xlu1 %4003 }
0x1048   :  { %v7411_v60 = vpop.eup %6673 }
0x1049   :  { %6421 = vmatmul.mubr.msk.f32.vlgmr.msra.gmra.mrb[40].mxu1 %vm333_vm3, %v7411_v60 }
0x104a   :  { %6429 = vmatpush3.xpose.msk.msra.mxu1 %vm179_vm2, %v3656_v37  ;;  %6430 = vmatprep.mubr.msk.f32.mxu1 %vm6867_vm1, %v6866_v0 }
0x104b   :  { %6438 = vmatprep.subr.mxu1 %v6866_v0 }
0x104d   :  { %6431 = vmatmul.mubr.msk.f32.vlgmr.msra.gmra.mrb[42].mxu1 %vm179_vm2, %v3654_v50 }
0x104e   :  { %6440 = vmatprep.mubr.msk.f32.mxu1 %vm6867_vm1, %v6866_v0 }
0x1111   :  { %v7422_v2 = vpop.f32.mrb[40].mxu0 }
0x1112   :  { %7863 = vst [vmem:[#allocation14_spill] sm:$0xff] %v7422_v2  ;;  %v6427_v6 = vpop.f32.mrb[41].mxu0 }
0x1115   :  { %v3805_v8 = vpop.f32.mrb[42].mxu0 }
0x1116   :  { %v3810_v11 = vmul.f32 0.5, %v3805_v8  ;;  %v6437_v14 = vpop.f32.mrb[43].mxu0 }
0x1118   :  { %v3814_v18 = vsel %vm333_vm3, %v3810_v11, -inf }
0x1119   :  { %3815 = vmax.xlane.f32.xlu0 %v3814_v18 }
0x111c   :  { %v7425_v20 = vpop.f32.mrb[40].mxu1 }
0x111d   :  { %v6422_v22 = vpop.f32.mrb[41].mxu1 }
0x1120   :  { %v3727_v23 = vpop.f32.mrb[42].mxu1 }
0x1121   :  { %v3809_v24 = vmul.f32 0.5, %v3727_v23  ;;  %v6432_v30 = vpop.f32.mrb[43].mxu1 }
0x1123   :  { %v3811_v32 = vsel %vm333_vm3, %v3809_v24, -inf }
0x1124   :  { %3812 = vmax.xlane.f32.xlu1 %v3811_v32 }
0x112f   :  { %3831 = vrot.lane.b32.xlu0 %v6995_v41, %s6888_s27 }
0x1133   :  { %4081 = vrot.lane.b32.xlu0 %v6984_v38, %s6889_s28 }
0x1135   :  { %4001 = vrot.lane.b32.xlu1 %v6981_v34, %s6890_s30 }
0x1137   :  { %4079 = vrot.lane.b32.xlu0 %v6984_v38, %s6890_s30 }
0x1139   :  { %4255 = vrot.lane.b32.xlu1 %v6986_v40, %s6890_s30 }
0x113d   :  { %4351 = vrot.lane.b32.xlu1 %v6981_v34, %s6861_s29 }
0x11a6   :  { %v3816_v33 = vpop.xlane.xlu0 %3815 }
0x11a7   :  { %v3818_v37 = vsub.f32 %v3810_v11, %v3816_v33 }
0x11a9   :  { %v3821_v43 = vmul.f32 1.442695, %v3818_v37 }
0x11aa   :  { %v3832_v44 = vpop.permute.xlu0 %3831 }
0x11ab   :  { %6675 = vpow2.f32 %v3821_v43  ;;  %6439 = vmatpush3.msra.mxu1 %v3832_v44 }
0x11ac   :  { %6448 = vmatprep.subr.mxu1 %v6866_v0 }
0x11ae   :  { %v4082_v51 = vpop.permute.xlu0 %4081 }
0x11b1   :  { %v3813_v46 = vpop.xlane.xlu1 %3812 }
0x11b2   :  { %v3817_v50 = vsub.f32 %v3809_v24, %v3813_v46  ;;  %v4080_v11 = vpop.permute.xlu0 %4079 }
0x11b4   :  { %v3819_v52 = vmul.f32 1.442695, %v3817_v50 }
0x11b5   :  { %v7441_v6 = vpop.eup %6675  ;;  %v4002_v8 = vpop.permute.xlu1 %4001 }
0x11b6   :  { %6677 = vpow2.f32 %v3819_v52  ;;  %6446 = vmatmul.mubr.msk.f32.vlgmr.msra.gmra.mrb[44].mxu0 %vm333_vm3, %v7441_v6 }
0x11b7   :  { %6454 = vmatpush3.xpose.msk.msra.mxu0 %vm179_vm2, %v4082_v51  ;;  %6455 = vmatprep.mubr.msk.f32.mxu0 %vm6867_vm1, %v6866_v0 }
0x11b8   :  { %6463 = vmatprep.subr.mxu0 %v6866_v0 }
0x11b9   :  { %v4256_v14 = vpop.permute.xlu1 %4255 }
0x11ba   :  { %6456 = vmatmul.mubr.msk.f32.vlgmr.msra.gmra.mrb[46].mxu0 %vm179_vm2, %v4080_v11 }
0x11bb   :  { %6464 = vmatpush3.msra.mxu0 %v4256_v14  ;;  %6465 = vmatprep.mubr.msk.f32.mxu0 %vm6867_vm1, %v6866_v0 }
0x11bc   :  { %6473 = vmatprep.subr.mxu0 %v6866_v0 }
0x11bd   :  { %v4352_v14 = vpop.permute.xlu1 %4351 }
0x11c0   :  { %v7453_v18 = vpop.eup %6677 }
0x11c1   :  { %6441 = vmatmul.mubr.msk.f32.vlgmr.msra.gmra.mrb[44].mxu1 %vm333_vm3, %v7453_v18 }
0x11c2   :  { %6449 = vmatpush3.xpose.msk.msra.mxu1 %vm179_vm2, %v4004_v45  ;;  %6450 = vmatprep.mubr.msk.f32.mxu1 %vm6867_vm1, %v6866_v0 }
0x11c3   :  { %6458 = vmatprep.subr.mxu1 %v6866_v0 }
0x11c5   :  { %6451 = vmatmul.mubr.msk.f32.vlgmr.msra.gmra.mrb[46].mxu1 %vm179_vm2, %v4002_v8 }
0x11c6   :  { %6460 = vmatprep.mubr.msk.f32.mxu1 %vm6867_vm1, %v6866_v0 }
0x1289   :  { %v7464_v22 = vpop.f32.mrb[44].mxu0 }
0x128a   :  { %7864 = vst [vmem:[#allocation15_spill] sm:$0xff] %v7464_v22  ;;  %v6447_v23 = vpop.f32.mrb[45].mxu0 }
0x128d   :  { %v4153_v24 = vpop.f32.mrb[46].mxu0 }
0x128e   :  { %v4158_v30 = vmul.f32 0.5, %v4153_v24  ;;  %v6457_v32 = vpop.f32.mrb[47].mxu0 }
0x1290   :  { %v4162_v33 = vsel %vm333_vm3, %v4158_v30, -inf }
0x1291   :  { %4163 = vmax.xlane.f32.xlu0 %v4162_v33 }
0x1294   :  { %v7467_v37 = vpop.f32.mrb[44].mxu1 }
0x1295   :  { %v6442_v43 = vpop.f32.mrb[45].mxu1 }
0x1298   :  { %v4075_v44 = vpop.f32.mrb[46].mxu1 }
0x1299   :  { %v4157_v45 = vmul.f32 0.5, %v4075_v44  ;;  %v6452_v46 = vpop.f32.mrb[47].mxu1 }
0x129b   :  { %v4159_v50 = vsel %vm333_vm3, %v4157_v45, -inf }
0x129c   :  { %4160 = vmax.xlane.f32.xlu1 %v4159_v50 }
0x12a7   :  { %4179 = vrot.lane.b32.xlu0 %v6995_v41, %s6890_s30 }
0x12ab   :  { %4429 = vrot.lane.b32.xlu0 %v6984_v38, %s6861_s29 }
0x12ad   :  { %4349 = vrot.lane.b32.xlu1 %v6981_v34, %s6891_s0 }
0x12af   :  { %4427 = vrot.lane.b32.xlu0 %v6984_v38, %s6891_s0 }
0x12b1   :  { %4603 = vrot.lane.b32.xlu1 %v6986_v40, %s6891_s0 }
0x12b5   :  { %4699 = vrot.lane.b32.xlu1 %v6981_v34, %s6892_s6 }
0x131e   :  { %v4164_v51 = vpop.xlane.xlu0 %4163 }
0x131f   :  { %v4166_v52 = vsub.f32 %v4158_v30, %v4164_v51 }
0x1321   :  { %v4169_v8 = vmul.f32 1.442695, %v4166_v52 }
0x1322   :  { %v4180_v11 = vpop.permute.xlu0 %4179 }
0x1323   :  { %6679 = vpow2.f32 %v4169_v8  ;;  %6459 = vmatpush3.msra.mxu1 %v4180_v11 }
0x1324   :  { %6468 = vmatprep.subr.mxu1 %v6866_v0 }
0x1326   :  { %v4430_v32 = vpop.permute.xlu0 %4429 }
0x1329   :  { %v4161_v23 = vpop.xlane.xlu1 %4160 }
0x132a   :  { %v4165_v24 = vsub.f32 %v4157_v45, %v4161_v23  ;;  %v4428_v30 = vpop.permute.xlu0 %4427 }
0x132c   :  { %v4167_v33 = vmul.f32 1.442695, %v4165_v24 }
0x132d   :  { %v7483_v43 = vpop.eup %6679  ;;  %v4350_v44 = vpop.permute.xlu1 %4349 }
0x132e   :  { %6681 = vpow2.f32 %v4167_v33  ;;  %6466 = vmatmul.mubr.msk.f32.vlgmr.msra.gmra.mrb[48].mxu0 %vm333_vm3, %v7483_v43 }
0x132f   :  { %6474 = vmatpush3.xpose.msk.msra.mxu0 %vm179_vm2, %v4430_v32  ;;  %6475 = vmatprep.mubr.msk.f32.mxu0 %vm6867_vm1, %v6866_v0 }
0x1330   :  { %6483 = vmatprep.subr.mxu0 %v6866_v0 }
0x1331   :  { %v4604_v46 = vpop.permute.xlu1 %4603 }
0x1332   :  { %6476 = vmatmul.mubr.msk.f32.vlgmr.msra.gmra.mrb[50].mxu0 %vm179_vm2, %v4428_v30 }
0x1333   :  { %6484 = vmatpush3.msra.mxu0 %v4604_v46  ;;  %6485 = vmatprep.mubr.msk.f32.mxu0 %vm6867_vm1, %v6866_v0 }
0x1334   :  { %6493 = vmatprep.subr.mxu0 %v6866_v0 }
0x1338   :  { %v7495_v45 = vpop.eup %6681 }
0x1339   :  { %6461 = vmatmul.mubr.msk.f32.vlgmr.msra.gmra.mrb[48].mxu1 %vm333_vm3, %v7495_v45 }
0x133a   :  { %6469 = vmatpush3.xpose.msk.msra.mxu1 %vm179_vm2, %v4352_v14  ;;  %6470 = vmatprep.mubr.msk.f32.mxu1 %vm6867_vm1, %v6866_v0 }
0x133b   :  { %6478 = vmatprep.subr.mxu1 %v6866_v0 }
0x133d   :  { %6471 = vmatmul.mubr.msk.f32.vlgmr.msra.gmra.mrb[50].mxu1 %vm179_vm2, %v4350_v44 }
0x133e   :  { %6480 = vmatprep.mubr.msk.f32.mxu1 %vm6867_vm1, %v6866_v0 }
0x1401   :  { %v7506_v50 = vpop.f32.mrb[48].mxu0 }
0x1402   :  { %7865 = vst [vmem:[#allocation16_spill] sm:$0xff] %v7506_v50  ;;  %v6467_v51 = vpop.f32.mrb[49].mxu0 }
0x1405   :  { %v4501_v52 = vpop.f32.mrb[50].mxu0 }
0x1406   :  { %v4506_v8 = vmul.f32 0.5, %v4501_v52  ;;  %v6477_v11 = vpop.f32.mrb[51].mxu0 }
0x1408   :  { %v4510_v23 = vsel %vm333_vm3, %v4506_v8, -inf }
0x1409   :  { %4511 = vmax.xlane.f32.xlu0 %v4510_v23  ;;  %v4700_v23 = vpop.permute.xlu1 %4699 }
0x140c   :  { %v7509_v14 = vpop.f32.mrb[48].mxu1 }
0x140d   :  { %v6462_v24 = vpop.f32.mrb[49].mxu1 }
0x1410   :  { %v4423_v32 = vpop.f32.mrb[50].mxu1 }
0x1411   :  { %v4505_v33 = vmul.f32 0.5, %v4423_v32  ;;  %v6472_v30 = vpop.f32.mrb[51].mxu1 }
0x1413   :  { %v4507_v44 = vsel %vm333_vm3, %v4505_v33, -inf }
0x1414   :  { %4508 = vmax.xlane.f32.xlu1 %v4507_v44 }
0x141f   :  { %4527 = vrot.lane.b32.xlu0 %v6995_v41, %s6891_s0 }
0x1423   :  { %4777 = vrot.lane.b32.xlu0 %v6984_v38, %s6892_s6 }
0x1425   :  { %4697 = vrot.lane.b32.xlu1 %v6981_v34, %s6893_s3 }
0x1427   :  { %4775 = vrot.lane.b32.xlu0 %v6984_v38, %s6893_s3 }
0x1429   :  { %4951 = vrot.lane.b32.xlu1 %v6986_v40, %s6893_s3 }
0x142d   :  { %5047 = vrot.lane.b32.xlu1 %v6981_v34, %s6864_s17 }
0x1496   :  { %v4512_v46 = vpop.xlane.xlu0 %4511 }
0x1497   :  { %v4514_v51 = vsub.f32 %v4506_v8, %v4512_v46 }
0x1499   :  { %v4517_v52 = vmul.f32 1.442695, %v4514_v51 }
0x149a   :  { %v4528_v11 = vpop.permute.xlu0 %4527 }
0x149b   :  { %6683 = vpow2.f32 %v4517_v52  ;;  %6479 = vmatpush3.msra.mxu1 %v4528_v11 }
0x149c   :  { %6488 = vmatprep.subr.mxu1 %v6866_v0 }
0x149e   :  { %v4778_v30 = vpop.permute.xlu0 %4777 }
0x14a1   :  { %v4509_v24 = vpop.xlane.xlu1 %4508 }
0x14a2   :  { %v4513_v32 = vsub.f32 %v4505_v33, %v4509_v24  ;;  %v4776_v8 = vpop.permute.xlu0 %4775 }
0x14a4   :  { %v4515_v44 = vmul.f32 1.442695, %v4513_v32 }
0x14a5   :  { %v7525_v7 = vpop.eup %6683  ;;  %v4698_v9 = vpop.permute.xlu1 %4697 }
0x14a6   :  { %6685 = vpow2.f32 %v4515_v44  ;;  %6486 = vmatmul.mubr.msk.f32.vlgmr.msra.gmra.mrb[52].mxu0 %vm333_vm3, %v7525_v7 }
0x14a7   :  { %6494 = vmatpush3.xpose.msk.msra.mxu0 %vm179_vm2, %v4778_v30  ;;  %6495 = vmatprep.mubr.msk.f32.mxu0 %vm6867_vm1, %v6866_v0 }
0x14a8   :  { %6503 = vmatprep.subr.mxu0 %v6866_v0 }
0x14a9   :  { %v4952_v46 = vpop.permute.xlu1 %4951 }
0x14aa   :  { %6496 = vmatmul.mubr.msk.f32.vlgmr.msra.gmra.mrb[54].mxu0 %vm179_vm2, %v4776_v8 }
0x14ab   :  { %6504 = vmatpush3.msra.mxu0 %v4952_v46  ;;  %6505 = vmatprep.mubr.msk.f32.mxu0 %vm6867_vm1, %v6866_v0 }
0x14ac   :  { %6513 = vmatprep.subr.mxu0 %v6866_v0 }
0x14b0   :  { %v7537_v33 = vpop.eup %6685 }
0x14b1   :  { %6481 = vmatmul.mubr.msk.f32.vlgmr.msra.gmra.mrb[52].mxu1 %vm333_vm3, %v7537_v33 }
0x14b2   :  { %6489 = vmatpush3.xpose.msk.msra.mxu1 %vm179_vm2, %v4700_v23  ;;  %6490 = vmatprep.mubr.msk.f32.mxu1 %vm6867_vm1, %v6866_v0 }
0x14b3   :  { %6498 = vmatprep.subr.mxu1 %v6866_v0 }
0x14b5   :  { %6491 = vmatmul.mubr.msk.f32.vlgmr.msra.gmra.mrb[54].mxu1 %vm179_vm2, %v4698_v9 }
0x14b6   :  { %6500 = vmatprep.mubr.msk.f32.mxu1 %vm6867_vm1, %v6866_v0 }
0x1579   :  { %v7548_v51 = vpop.f32.mrb[52].mxu0 }
0x157a   :  { %7866 = vst [vmem:[#allocation17_spill] sm:$0xff] %v7548_v51  ;;  %v6487_v52 = vpop.f32.mrb[53].mxu0 }
0x157d   :  { %v4849_v11 = vpop.f32.mrb[54].mxu0 }
0x157e   :  { %v4854_v24 = vmul.f32 0.5, %v4849_v11  ;;  %v6497_v32 = vpop.f32.mrb[55].mxu0 }
0x1580   :  { %v4858_v30 = vsel %vm333_vm3, %v4854_v24, -inf }
0x1581   :  { %4859 = vmax.xlane.f32.xlu0 %v4858_v30  ;;  %v5048_v30 = vpop.permute.xlu1 %5047 }
0x1584   :  { %v7551_v23 = vpop.f32.mrb[52].mxu1 }
0x1585   :  { %7867 = vst [vmem:[#allocation18_spill] sm:$0xff] %v7551_v23  ;;  %v6482_v44 = vpop.f32.mrb[53].mxu1 }
0x1588   :  { %v4771_v8 = vpop.f32.mrb[54].mxu1 }
0x1589   :  { %v4853_v46 = vmul.f32 0.5, %v4771_v8  ;;  %v6492_v50 = vpop.f32.mrb[55].mxu1 }
0x158b   :  { %v4855_v9 = vsel %vm333_vm3, %v4853_v46, -inf }
0x158c   :  { %4856 = vmax.xlane.f32.xlu1 %v4855_v9 }
0x1597   :  { %4875 = vrot.lane.b32.xlu0 %v6995_v41, %s6893_s3 }
0x159b   :  { %5125 = vrot.lane.b32.xlu0 %v6984_v38, %s6864_s17 }
0x159d   :  { %5045 = vrot.lane.b32.xlu1 %v6981_v34, %s6894_s7 }
0x159f   :  { %5123 = vrot.lane.b32.xlu0 %v6984_v38, %s6894_s7 }
0x15a1   :  { %5299 = vrot.lane.b32.xlu1 %v6986_v40, %s6894_s7 }
0x15a5   :  { %5395 = vrot.lane.b32.xlu1 %v6981_v34, %s6895_s8 }
0x160e   :  { %v4860_v50 = vpop.xlane.xlu0 %4859 }
0x160f   :  { %v4862_v52 = vsub.f32 %v4854_v24, %v4860_v50 }
0x1611   :  { %v4865_v11 = vmul.f32 1.442695, %v4862_v52 }
0x1612   :  { %v4876_v32 = vpop.permute.xlu0 %4875 }
0x1613   :  { %6687 = vpow2.f32 %v4865_v11  ;;  %6499 = vmatpush3.msra.mxu1 %v4876_v32 }
0x1614   :  { %6508 = vmatprep.subr.mxu1 %v6866_v0 }
0x1616   :  { %v5126_v9 = vpop.permute.xlu0 %5125 }
0x1619   :  { %v4857_v44 = vpop.xlane.xlu1 %4856 }
0x161a   :  { %v4861_v8 = vsub.f32 %v4853_v46, %v4857_v44  ;;  %v5124_v24 = vpop.permute.xlu0 %5123 }
0x161c   :  { %v4863_v51 = vmul.f32 1.442695, %v4861_v8 }
0x161d   :  { %v7567_v22 = vpop.eup %6687  ;;  %v5046_v23 = vpop.permute.xlu1 %5045 }
0x161e   :  { %6689 = vpow2.f32 %v4863_v51  ;;  %6506 = vmatmul.mubr.msk.f32.vlgmr.msra.gmra.mrb[56].mxu0 %vm333_vm3, %v7567_v22 }
0x161f   :  { %6514 = vmatpush3.xpose.msk.msra.mxu0 %vm179_vm2, %v5126_v9  ;;  %6515 = vmatprep.mubr.msk.f32.mxu0 %vm6867_vm1, %v6866_v0 }
0x1620   :  { %6523 = vmatprep.subr.mxu0 %v6866_v0 }
0x1621   :  { %v5300_v50 = vpop.permute.xlu1 %5299 }
0x1622   :  { %6516 = vmatmul.mubr.msk.f32.vlgmr.msra.gmra.mrb[58].mxu0 %vm179_vm2, %v5124_v24 }
0x1623   :  { %6524 = vmatpush3.msra.mxu0 %v5300_v50  ;;  %6525 = vmatprep.mubr.msk.f32.mxu0 %vm6867_vm1, %v6866_v0 }
0x1624   :  { %6533 = vmatprep.subr.mxu0 %v6866_v0 }
0x1628   :  { %v7579_v51 = vpop.eup %6689 }
0x1629   :  { %6501 = vmatmul.mubr.msk.f32.vlgmr.msra.gmra.mrb[56].mxu1 %vm333_vm3, %v7579_v51 }
0x162a   :  { %6509 = vmatpush3.xpose.msk.msra.mxu1 %vm179_vm2, %v5048_v30  ;;  %6510 = vmatprep.mubr.msk.f32.mxu1 %vm6867_vm1, %v6866_v0 }
0x162b   :  { %6518 = vmatprep.subr.mxu1 %v6866_v0 }
0x162d   :  { %6511 = vmatmul.mubr.msk.f32.vlgmr.msra.gmra.mrb[58].mxu1 %vm179_vm2, %v5046_v23 }
0x162e   :  { %6520 = vmatprep.mubr.msk.f32.mxu1 %vm6867_vm1, %v6866_v0 }
0x16f1   :  { %v7590_v46 = vpop.f32.mrb[56].mxu0 }
0x16f2   :  { %7868 = vst [vmem:[#allocation19_spill] sm:$0xff] %v7590_v46  ;;  %v6507_v52 = vpop.f32.mrb[57].mxu0 }
0x16f5   :  { %v5197_v11 = vpop.f32.mrb[58].mxu0 }
0x16f6   :  { %v5202_v32 = vmul.f32 0.5, %v5197_v11  ;;  %v6517_v44 = vpop.f32.mrb[59].mxu0 }
0x16f8   :  { %v5206_v8 = vsel %vm333_vm3, %v5202_v32, -inf }
0x16f9   :  { %5207 = vmax.xlane.f32.xlu0 %v5206_v8  ;;  %v5396_v8 = vpop.permute.xlu1 %5395 }
0x16fc   :  { %v7593_v30 = vpop.f32.mrb[56].mxu1 }
0x16fd   :  { %7869 = vst [vmem:[#allocation20_spill] sm:$0xff] %v7593_v30  ;;  %v6502_v9 = vpop.f32.mrb[57].mxu1 }
0x1700   :  { %v5119_v24 = vpop.f32.mrb[58].mxu1 }
0x1701   :  { %v5201_v50 = vmul.f32 0.5, %v5119_v24  ;;  %v6512_v2 = vpop.f32.mrb[59].mxu1 }
0x1703   :  { %v5203_v23 = vsel %vm333_vm3, %v5201_v50, -inf }
0x1704   :  { %5204 = vmax.xlane.f32.xlu1 %v5203_v23 }
0x170f   :  { %5223 = vrot.lane.b32.xlu0 %v6995_v41, %s6894_s7 }
0x1713   :  { %5473 = vrot.lane.b32.xlu0 %v6984_v38, %s6895_s8 }
0x1715   :  { %5393 = vrot.lane.b32.xlu1 %v6981_v34, %s6896_s2 }
0x1717   :  { %5471 = vrot.lane.b32.xlu0 %v6984_v38, %s6896_s2 }
0x1786   :  { %v5208_v52 = vpop.xlane.xlu0 %5207 }
0x1787   :  { %v5210_v11 = vsub.f32 %v5202_v32, %v5208_v52 }
0x1789   :  { %v5213_v44 = vmul.f32 1.442695, %v5210_v11 }
0x178a   :  { %v5224_v2 = vpop.permute.xlu0 %5223 }
0x178b   :  { %6691 = vpow2.f32 %v5213_v44  ;;  %6519 = vmatpush3.msra.mxu1 %v5224_v2 }
0x178c   :  { %6528 = vmatprep.subr.mxu1 %v6866_v0 }
0x178e   :  { %v5474_v23 = vpop.permute.xlu0 %5473 }
0x1791   :  { %v5205_v9 = vpop.xlane.xlu1 %5204 }
0x1792   :  { %v5209_v24 = vsub.f32 %v5201_v50, %v5205_v9  ;;  %v5472_v34 = vpop.permute.xlu0 %5471 }
0x1794   :  { %v5211_v46 = vmul.f32 1.442695, %v5209_v24 }
0x1795   :  { %v7605_v30 = vpop.eup %6691 }
0x1796   :  { %6693 = vpow2.f32 %v5211_v46  ;;  %6526 = vmatmul.mubr.msk.f32.vlgmr.msra.gmra.mrb[60].mxu0 %vm333_vm3, %v7605_v30  ;;  %v5394_v46 = vpop.permute.xlu1 %5393 }
0x1797   :  { %6534 = vmatpush3.xpose.msk.msra.mxu0 %vm179_vm2, %v5474_v23  ;;  %6535 = vmatprep.mubr.msk.f32.mxu0 %vm6867_vm1, %v6866_v0 }
0x1798   :  { %6543 = vmatprep.subr.mxu0 %v6866_v0 }
0x179a   :  { %6536 = vmatmul.mubr.msk.f32.vlgmr.msra.gmra.mrb[62].mxu0 %vm179_vm2, %v5472_v34 }
0x179b   :  { %6545 = vmatprep.mubr.msk.f32.mxu0 %vm6867_vm1, %v6866_v0 }
0x17a0   :  { %v7616_v38 = vpop.eup %6693 }
0x17a1   :  { %6521 = vmatmul.mubr.msk.f32.vlgmr.msra.gmra.mrb[60].mxu1 %vm333_vm3, %v7616_v38 }
0x17a2   :  { %6529 = vmatpush3.xpose.msk.msra.mxu1 %vm179_vm2, %v5396_v8  ;;  %6530 = vmatprep.mubr.msk.f32.mxu1 %vm6867_vm1, %v6866_v0 }
0x17a3   :  { %6538 = vmatprep.subr.mxu1 %v6866_v0 }
0x17a5   :  { %6531 = vmatmul.mubr.msk.f32.vlgmr.msra.gmra.mrb[62].mxu1 %vm179_vm2, %v5394_v46 }
0x17a6   :  { %6540 = vmatprep.mubr.msk.f32.mxu1 %vm6867_vm1, %v6866_v0 }
0x1869   :  { %v7627_v32 = vpop.f32.mrb[60].mxu0 }
0x186a   :  { %v6527_v50 = vpop.f32.mrb[61].mxu0 }
0x186b   :  { %v692_v50 = vsel %vm333_vm3, %v7063_v19, 0.0  ;;  %v2083_v19 = vsel %vm333_vm3, %v7243_v39, 0.0  ;;  %v2434_v39 = vsel %vm333_vm3, %v7273_v12, 0.0  ;;  %v4171_v12 = vsel %vm333_vm3, %v7495_v45, 0.0 }
0x186c   :  { %v4522_v45 = vsel %vm333_vm3, %v7525_v7, 0.0 }
0x186d   :  { %v5545_v52 = vpop.f32.mrb[62].mxu0 }
0x186e   :  { %v7629_v11 = vmul.f32 0.5, %v5545_v52  ;;  %v6537_v44 = vpop.f32.mrb[63].mxu0  ;;  %v1039_v52 = vsel %vm333_vm3, %v7117_v57, 0.0  ;;  %v1390_v57 = vsel %vm333_vm3, %v7147_v21, 0.0  ;;  %v3127_v21 = vsel %vm333_vm3, %v7369_v54, 0.0 }
0x186f   :  { %v1387_v44 = vsel %vm333_vm3, %v7159_v25, 0.0  ;;  %v1738_v25 = vsel %vm333_vm3, %v7189_v55, 0.0  ;;  %v3475_v55 = vsel %vm333_vm3, %v7411_v60, 0.0  ;;  %v3478_v54 = vsel %vm333_vm3, %v7399_v47, 0.0 }
0x1870   :  { %v5554_v2 = vsel %vm333_vm3, %v7629_v11, -inf  ;;  %v3826_v60 = vsel %vm333_vm3, %v7441_v6, 0.0  ;;  %v5215_v47 = vsel %vm333_vm3, %v7616_v38, 0.0  ;;  %v4870_v6 = vsel %vm333_vm3, %v7567_v22, 0.0 }
0x1871   :  { %5555 = vmax.xlane.f32.xlu0 %v5554_v2  ;;  %v689_v2 = vsel %vm333_vm3, %v7075_v27, 0.0  ;;  %v2431_v27 = vsel %vm333_vm3, %v7285_v16, 0.0  ;;  %v2782_v16 = vsel %vm333_vm3, %v7315_v56, 0.0  ;;  %v4519_v56 = vsel %vm333_vm3, %v7537_v33, 0.0 }
0x1872   :  { %v5218_v33 = vsel %vm333_vm3, %v7605_v30, 0.0  ;;  %v349_v30 = vsel %vm333_vm3, %v7035_v1, 0.0 }
0x1874   :  { %v7633_v8 = vpop.f32.mrb[60].mxu1 }
0x1875   :  { %v6522_v9 = vpop.f32.mrb[61].mxu1 }
0x1878   :  { %v5467_v24 = vpop.f32.mrb[62].mxu1 }
0x1879   :  { %v7635_v23 = vmul.f32 0.5, %v5467_v24  ;;  %v6532_v34 = vpop.f32.mrb[63].mxu1 }
0x187b   :  { %v5551_v46 = vsel %vm333_vm3, %v7635_v23, -inf }
0x187c   :  { %5552 = vmax.xlane.f32.xlu1 %v5551_v46 }
0x1887   :  { %5571 = vrot.lane.b32.xlu0 %v6995_v41, %s6896_s2  ;;  %v1735_v41 = vsel %vm333_vm3, %v7201_v61, 0.0  ;;  %v2086_v61 = vsel %vm333_vm3, %v7231_v31, 0.0  ;;  %v3823_v31 = vsel %vm333_vm3, %v7453_v18, 0.0  ;;  %v4174_v18 = vsel %vm333_vm3, %v7483_v43, 0.0 }
0x188d   :  { %5647 = vrot.lane.b32.xlu1 %v6986_v40, %s6896_s2  ;;  %v1042_v40 = vsel %vm333_vm3, %v7105_v53, 0.0  ;;  %v2779_v53 = vsel %vm333_vm3, %v7327_v4, 0.0  ;;  %v3130_v4 = vsel %vm333_vm3, %v7357_v49, 0.0  ;;  %v4867_v49 = vsel %vm333_vm3, %v7579_v51, 0.0 }
0x18a6   :  { %693 = vadd.xlane.f32.xlu0 %v692_v50 }
0x18aa   :  { %1040 = vadd.xlane.f32.xlu0 %v1039_v52 }
0x18ae   :  { %1388 = vadd.xlane.f32.xlu0 %v1387_v44 }
0x18b1   :  { %690 = vadd.xlane.f32.xlu1 %v689_v2 }
0x18b2   :  { %1736 = vadd.xlane.f32.xlu0 %v1735_v41 }
0x18b5   :  { %1043 = vadd.xlane.f32.xlu1 %v1042_v40 }
0x18b6   :  { %2084 = vadd.xlane.f32.xlu0 %v2083_v19 }
0x18b9   :  { %1391 = vadd.xlane.f32.xlu1 %v1390_v57 }
0x18ba   :  { %2432 = vadd.xlane.f32.xlu0 %v2431_v27 }
0x18bd   :  { %1739 = vadd.xlane.f32.xlu1 %v1738_v25 }
0x18be   :  { %2780 = vadd.xlane.f32.xlu0 %v2779_v53 }
0x18c1   :  { %2087 = vadd.xlane.f32.xlu1 %v2086_v61 }
0x18c2   :  { %3128 = vadd.xlane.f32.xlu0 %v3127_v21 }
0x18c5   :  { %2435 = vadd.xlane.f32.xlu1 %v2434_v39 }
0x18c6   :  { %3476 = vadd.xlane.f32.xlu0 %v3475_v55 }
0x18c9   :  { %2783 = vadd.xlane.f32.xlu1 %v2782_v16 }
0x18ca   :  { %3824 = vadd.xlane.f32.xlu0 %v3823_v31 }
0x18cd   :  { %3131 = vadd.xlane.f32.xlu1 %v3130_v4 }
0x18ce   :  { %4172 = vadd.xlane.f32.xlu0 %v4171_v12 }
0x18d1   :  { %3479 = vadd.xlane.f32.xlu1 %v3478_v54 }
0x18d2   :  { %4520 = vadd.xlane.f32.xlu0 %v4519_v56 }
0x18d5   :  { %3827 = vadd.xlane.f32.xlu1 %v3826_v60 }
0x18d6   :  { %4868 = vadd.xlane.f32.xlu0 %v4867_v49 }
0x18d9   :  { %4175 = vadd.xlane.f32.xlu1 %v4174_v18 }
0x18da   :  { %5216 = vadd.xlane.f32.xlu0 %v5215_v47 }
0x18dd   :  { %4523 = vadd.xlane.f32.xlu1 %v4522_v45 }
0x18e1   :  { %4871 = vadd.xlane.f32.xlu1 %v4870_v6 }
0x18e5   :  { %5219 = vadd.xlane.f32.xlu1 %v5218_v33 }
0x18fe   :  { %v5556_v51 = vpop.xlane.xlu0 %5555 }
0x18ff   :  { %v5558_v43 = vsub.f32 %v7629_v11, %v5556_v51 }
0x1901   :  { %v5561_v9 = vmul.f32 1.442695, %v5558_v43 }
0x1902   :  { %v5572_v24 = vpop.permute.xlu0 %5571 }
0x1903   :  { %6695 = vpow2.f32 %v5561_v9  ;;  %6539 = vmatpush3.msra.mxu1 %v5572_v24 }
0x1909   :  { %v5553_v38 = vpop.xlane.xlu1 %5552 }
0x190a   :  { %v5557_v34 = vsub.f32 %v7635_v23, %v5553_v38  ;;  %v346_v23 = vsel %vm333_vm3, %v7027_v63, 0.0 }
0x190c   :  { %v5559_v7 = vmul.f32 1.442695, %v5557_v34 }
0x190d   :  { %v6696_v46 = vpop.eup %6695  ;;  %v5648_v50 = vpop.permute.xlu1 %5647 }
0x190e   :  { %6697 = vpow2.f32 %v5559_v7  ;;  %6544 = vmatpush3.msra.mxu0 %v5648_v50  ;;  %v5566_v22 = vsel %vm333_vm3, %v6696_v46, 0.0 }
0x190f   :  { %6546 = vmatmul.mubr.msk.f32.vlgmr.msra.gmra.mrb[64].mxu0 %vm333_vm3, %v6696_v46  ;;  %5567 = vadd.xlane.f32.xlu1 %v5566_v22 }
0x1913   :  { %350 = vadd.xlane.f32.xlu1 %v349_v30 }
0x1918   :  { %v6698_v11 = vpop.eup %6697 }
0x1919   :  { %6541 = vmatmul.mubr.msk.f32.vlgmr.msra.gmra.mrb[64].mxu1 %vm333_vm3, %v6698_v11  ;;  %v5563_v52 = vsel %vm333_vm3, %v6698_v11, 0.0 }
0x191a   :  { %5564 = vadd.xlane.f32.xlu0 %v5563_v52  ;;  %6564 = vmatprep.mubr.msk.f32.mxu1 %vm6867_vm1, %v6866_v0  ;;  %vm5860_vm1 = vcmask 457728  }
0x191e   :  { %347 = vadd.xlane.f32.xlu0 %v346_v23 }
0x1933   :  { %v694_v44 = vpop.xlane.xlu0 %693 }
0x1934   :  { %6699 = vrcp.f32 %v694_v44 }
0x1937   :  { %v1041_v2 = vpop.xlane.xlu0 %1040 }
0x1938   :  { %6701 = vrcp.f32 %v1041_v2 }
0x193b   :  { %v1389_v41 = vpop.xlane.xlu0 %1388 }
0x193c   :  { %6703 = vrcp.f32 %v1389_v41 }
0x193e   :  { %v6700_v1 = vpop.eup %6699  ;;  %v691_v40 = vpop.xlane.xlu1 %690 }
0x193f   :  { %v852_v19 = vmul.f32 %v6700_v1, %v7086_v28  ;;  %6705 = vrcp.f32 %v691_v40  ;;  %v1737_v57 = vpop.xlane.xlu0 %1736 }
0x1940   :  { %6707 = vrcp.f32 %v1737_v57 }
0x1941   :  { %v860_v27 = vsel %vm179_vm2, %v852_v19, 0.0 }
0x1942   :  { %v6702_v0 = vpop.eup %6701  ;;  %v1044_v25 = vpop.xlane.xlu1 %1043  ;;  %v861_v53 = vrot.slane %v860_v27, 4 }
0x1943   :  { %v1199_v63 = vmul.f32 %v6702_v0, %v7131_v3  ;;  %6709 = vrcp.f32 %v1044_v25  ;;  %v2085_v61 = vpop.xlane.xlu0 %2084 }
0x1944   :  { %6711 = vrcp.f32 %v2085_v61  ;;  %v862_v21 = vadd.f32 %v861_v53, %v860_v27 }
0x1945   :  { %v1201_v39 = vsel %vm179_vm2, %v1199_v63, 0.0 }
0x1946   :  { %v6704_v55 = vpop.eup %6703  ;;  %v1392_v16 = vpop.xlane.xlu1 %1391  ;;  %v863_v31 = vrot.slane %v862_v21, 2  ;;  %v1202_v28 = vrot.slane %v1201_v39, 4 }
0x1947   :  { %v1547_v4 = vmul.f32 %v6704_v55, %v7173_v36  ;;  %6713 = vrcp.f32 %v1392_v16  ;;  %v2433_v12 = vpop.xlane.xlu0 %2432 }
0x1948   :  { %6715 = vrcp.f32 %v2433_v12  ;;  %v864_v54 = vadd.f32 %v863_v31, %v862_v21  ;;  %v1203_v56 = vadd.f32 %v1202_v28, %v1201_v39 }
0x1949   :  { %v6706_v60 = vpop.eup %6705  ;;  %v1549_v3 = vsel %vm179_vm2, %v1547_v4, 0.0 }
0x194a   :  { %v6708_v49 = vpop.eup %6707  ;;  %v851_v18 = vmul.f32 %v6706_v60, %v7089_v35  ;;  %v1740_v47 = vpop.xlane.xlu1 %1739  ;;  %v865_v45 = vrot.slane %v864_v54, 1  ;;  %v1204_v6 = vrot.slane %v1203_v56, 2  ;;  %v1550_v33 = vrot.slane %v1549_v3, 4 }
0x194b   :  { %v1895_v51 = vmul.f32 %v6708_v49, %v7215_v10  ;;  %6717 = vrcp.f32 %v1740_v47  ;;  %v2781_v43 = vpop.xlane.xlu0 %2780 }
0x194c   :  { %6719 = vrcp.f32 %v2781_v43  ;;  %v853_v36 = vsel %vm179_vm2, %v851_v18, 0.0  ;;  %v866_v9 = vadd.f32 %v865_v45, %v864_v54  ;;  %v1205_v24 = vadd.f32 %v1204_v6, %v1203_v56 }
0x194d   :  { %v6710_v38 = vpop.eup %6709  ;;  %v854_v34 = vrot.slane %v853_v36, 4  ;;  %v1551_v7 = vadd.f32 %v1550_v33, %v1549_v3  ;;  %v1897_v46 = vsel %vm179_vm2, %v1895_v51, 0.0 }
0x194e   :  { %v6712_v50 = vpop.eup %6711  ;;  %v1200_v35 = vmul.f32 %v6710_v38, %v7128_v58  ;;  %v2088_v22 = vpop.xlane.xlu1 %2087  ;;  %v7722_v30 = vmul.f32 0.125, %v866_v9  ;;  %v1206_v11 = vrot.slane %v1205_v24, 1  ;;  %v1898_v10 = vrot.slane %v1897_v46, 4 }
0x194f   :  { %v2243_v52 = vmul.f32 %v6712_v50, %v7257_v48  ;;  %6721 = vrcp.f32 %v2088_v22  ;;  %v3129_v23 = vpop.xlane.xlu0 %3128  ;;  %v855_v44 = vadd.f32 %v854_v34, %v853_v36  ;;  %v1552_v2 = vrot.slane %v1551_v7, 2 }
0x1950   :  { %6723 = vrcp.f32 %v3129_v23  ;;  %v1207_v41 = vadd.f32 %v1206_v11, %v1205_v24  ;;  %v1208_v1 = vsel %vm179_vm2, %v1200_v35, 0.0  ;;  %v1899_v40 = vadd.f32 %v1898_v10, %v1897_v46 }
0x1951   :  { %v6714_v19 = vpop.eup %6713  ;;  %v856_v57 = vrot.slane %v855_v44, 2  ;;  %v1209_v58 = vrot.slane %v1208_v1, 4  ;;  %v1553_v27 = vadd.f32 %v1552_v2, %v1551_v7  ;;  %v2245_v0 = vsel %vm179_vm2, %v2243_v52, 0.0 }
0x1952   :  { %v6716_v25 = vpop.eup %6715  ;;  %v1548_v53 = vmul.f32 %v6714_v19, %v7170_v26  ;;  %v2436_v48 = vpop.xlane.xlu1 %2435  ;;  %v7728_v63 = vmul.f32 0.125, %v1207_v41  ;;  %v1900_v61 = vrot.slane %v1899_v40, 2  ;;  %v2246_v21 = vrot.slane %v2245_v0, 4 }
0x1953   :  { %v2591_v39 = vmul.f32 %v6716_v25, %v7299_v29  ;;  %6725 = vrcp.f32 %v2436_v48  ;;  %v3477_v55 = vpop.xlane.xlu0 %3476  ;;  %v857_v16 = vadd.f32 %v856_v57, %v855_v44  ;;  %v1210_v31 = vadd.f32 %v1209_v58, %v1208_v1 }
0x1954   :  { %6727 = vrcp.f32 %v3477_v55  ;;  %v1554_v28 = vrot.slane %v1553_v27, 1  ;;  %v1556_v4 = vsel %vm179_vm2, %v1548_v53, 0.0  ;;  %v1901_v12 = vadd.f32 %v1900_v61, %v1899_v40 }
0x1955   :  { %v6718_v54 = vpop.eup %6717  ;;  %v858_v56 = vrot.slane %v857_v16, 1  ;;  %v1211_v60 = vrot.slane %v1210_v31, 2  ;;  %v1557_v26 = vrot.slane %v1556_v4, 4  ;;  %v2247_v3 = vadd.f32 %v2246_v21, %v2245_v0 }
0x1956   :  { %v6720_v49 = vpop.eup %6719  ;;  %v1896_v18 = vmul.f32 %v6718_v54, %v7212_v62  ;;  %v2784_v47 = vpop.xlane.xlu1 %2783  ;;  %v1555_v45 = vadd.f32 %v1554_v28, %v1553_v27  ;;  %v1902_v29 = vrot.slane %v1901_v12, 1  ;;  %v2593_v6 = vsel %vm179_vm2, %v2591_v39, 0.0 }
0x1957   :  { %v2939_v33 = vmul.f32 %v6720_v49, %v7341_v15  ;;  %6729 = vrcp.f32 %v2784_v47  ;;  %v3825_v51 = vpop.xlane.xlu0 %3824  ;;  %v859_v43 = vadd.f32 %v858_v56, %v857_v16  ;;  %v1212_v36 = vadd.f32 %v1211_v60, %v1210_v31 }
0x1958   :  { %6731 = vrcp.f32 %v3825_v51  ;;  %v1558_v9 = vadd.f32 %v1557_v26, %v1556_v4  ;;  %v1563_v24 = vmul.f32 0.125, %v1555_v45  ;;  %v1903_v38 = vadd.f32 %v1902_v29, %v1901_v12 }
0x1959   :  { %v6722_v34 = vpop.eup %6721  ;;  %v867_v7 = vmul.f32 0.125, %v859_v43  ;;  %v1213_v46 = vrot.slane %v1212_v36, 1  ;;  %v1904_v62 = vsel %vm179_vm2, %v1896_v18, 0.0  ;;  %v2248_v50 = vrot.slane %v2247_v3, 2 }
0x195a   :  { %v6724_v35 = vpop.eup %6723  ;;  %v2244_v22 = vmul.f32 %v6722_v34, %v7254_v42  ;;  %v3132_v11 = vpop.xlane.xlu1 %3131  ;;  %v1559_v10 = vrot.slane %v1558_v9, 2  ;;  %v1905_v15 = vrot.slane %v1904_v62, 4  ;;  %v7737_v52 = vmul.f32 0.125, %v1903_v38 }
0x195b   :  { %v7740_v23 = vmul.f32 %v6724_v35, %v7383_v13  ;;  %6733 = vrcp.f32 %v3132_v11  ;;  %v4173_v44 = vpop.xlane.xlu0 %4172  ;;  %v5748_v2 = vsel %vm5743_vm4, %v7722_v30, %v867_v7  ;;  %v1214_v41 = vadd.f32 %v1213_v46, %v1212_v36 }
0x195c   :  { %6735 = vrcp.f32 %v4173_v44  ;;  %5749 = vrot.lane.b32.xlu0 %v5748_v2, %s6895_s8  ;;  %v1560_v1 = vadd.f32 %v1559_v10, %v1558_v9  ;;  %v1906_v40 = vadd.f32 %v1905_v15, %v1904_v62  ;;  %v2249_v42 = vadd.f32 %v2248_v50, %v2247_v3 }
0x195d   :  { %v6726_v19 = vpop.eup %6725  ;;  %v1216_v57 = vmul.f32 0.125, %v1214_v41  ;;  %v2252_v58 = vsel %vm179_vm2, %v2244_v22, 0.0  ;;  %v2594_v27 = vrot.slane %v2593_v6, 4  ;;  %v2941_v13 = vsel %vm179_vm2, %v2939_v33, 0.0 }
0x195e   :  { %v6728_v0 = vpop.eup %6727  ;;  %v2592_v25 = vmul.f32 %v6726_v19, %v7296_v17  ;;  %v3480_v53 = vpop.xlane.xlu1 %3479  ;;  %v1561_v48 = vrot.slane %v1560_v1, 1  ;;  %v1907_v30 = vrot.slane %v1906_v40, 2  ;;  %v2250_v61 = vrot.slane %v2249_v42, 1  ;;  %v7870_v19 = vld [vmem:[#allocation14_spill] sm:$0xff] }
0x195f   :  { %v7749_v21 = vmul.f32 %v6728_v0, %v7425_v20  ;;  %6737 = vrcp.f32 %v3480_v53  ;;  %v4521_v39 = vpop.xlane.xlu0 %4520  ;;  %v5754_v55 = vsel %vm5743_vm4, %v1216_v57, %v7728_v63  ;;  %v2253_v16 = vrot.slane %v2252_v58, 4 }
0x1960   :  { %6739 = vrcp.f32 %v4521_v39  ;;  %5755 = vrot.lane.b32.xlu1 %v5754_v55, %s6864_s17  ;;  %v1562_v31 = vadd.f32 %v1561_v48, %v1560_v1  ;;  %v1908_v28 = vadd.f32 %v1907_v30, %v1906_v40  ;;  %v2251_v4 = vadd.f32 %v2250_v61, %v2249_v42 }
0x1961   :  { %v6730_v17 = vpop.eup %6729  ;;  %v2254_v12 = vadd.f32 %v2253_v16, %v2252_v58  ;;  %v2595_v54 = vadd.f32 %v2594_v27, %v2593_v6  ;;  %v2600_v56 = vsel %vm179_vm2, %v2592_v25, 0.0  ;;  %v2942_v60 = vrot.slane %v2941_v13, 4  ;;  %v7871_v25 = vld [vmem:[#allocation18_spill] sm:$0xff] }
0x1962   :  { %v6732_v20 = vpop.eup %6731  ;;  %v2940_v26 = vmul.f32 %v6730_v17, %v7338_v5  ;;  %v3828_v3 = vpop.xlane.xlu1 %3827  ;;  %v1564_v49 = vmul.f32 0.125, %v1562_v31  ;;  %v1909_v18 = vrot.slane %v1908_v28, 1  ;;  %v2259_v63 = vmul.f32 0.125, %v2251_v4 }
0x1963   :  { %v7757_v47 = vmul.f32 %v6732_v20, %v7467_v37  ;;  %6741 = vrcp.f32 %v3828_v3  ;;  %v4869_v45 = vpop.xlane.xlu0 %4868  ;;  %v2255_v29 = vrot.slane %v2254_v12, 2  ;;  %v2596_v33 = vrot.slane %v2595_v54, 2  ;;  %v7873_v3 = vld [vmem:[#allocation20_spill] sm:$0xff] }
0x1964   :  { %6743 = vrcp.f32 %v4869_v45  ;;  %v5760_v6 = vsel %vm5743_vm4, %v1564_v49, %v1563_v24  ;;  %v1910_v51 = vadd.f32 %v1909_v18, %v1908_v28  ;;  %v2601_v43 = vrot.slane %v2600_v56, 4 }
0x1965   :  { %v6734_v36 = vpop.eup %6733  ;;  %5761 = vrot.lane.b32.xlu1 %v5760_v6, %s6892_s6  ;;  %v2256_v5 = vadd.f32 %v2255_v29, %v2254_v12  ;;  %v2597_v9 = vadd.f32 %v2596_v33, %v2595_v54  ;;  %v2943_v38 = vadd.f32 %v2942_v60, %v2941_v13  ;;  %v2948_v34 = vsel %vm179_vm2, %v2940_v26, 0.0  ;;  %v7872_v12 = vld [vmem:[#allocation15_spill] sm:$0xff] }
0x1966   :  { %v6736_v7 = vpop.eup %6735  ;;  %v3288_v37 = vmul.f32 %v6734_v36, %v7380_v59  ;;  %v4176_v46 = vpop.xlane.xlu1 %4175  ;;  %v1912_v62 = vmul.f32 0.125, %v1910_v51  ;;  %v2602_v50 = vadd.f32 %v2601_v43, %v2600_v56  ;;  %v2949_v35 = vrot.slane %v2948_v34, 4 }
0x1967   :  { %v7764_v22 = vmul.f32 %v6736_v7, %v7509_v14  ;;  %6745 = vrcp.f32 %v4176_v46  ;;  %v5217_v24 = vpop.xlane.xlu0 %5216  ;;  %v2257_v11 = vrot.slane %v2256_v5, 1  ;;  %v2598_v10 = vrot.slane %v2597_v9, 1 }
0x1968   :  { %6747 = vrcp.f32 %v5217_v24  ;;  %v5766_v15 = vsel %vm5743_vm4, %v1912_v62, %v7737_v52  ;;  %v2603_v44 = vrot.slane %v2602_v50, 2  ;;  %v2944_v2 = vrot.slane %v2943_v38, 2 }
0x1969   :  { %v6738_v41 = vpop.eup %6737  ;;  %5767 = vrot.lane.b32.xlu0 %v5766_v15, %s6861_s29  ;;  %v2258_v59 = vadd.f32 %v2257_v11, %v2256_v5  ;;  %v2599_v1 = vadd.f32 %v2598_v10, %v2597_v9  ;;  %v2950_v40 = vadd.f32 %v2949_v35, %v2948_v34  ;;  %v3289_v14 = vsel %vm179_vm2, %v7740_v23, 0.0 }
0x196a   :  { %v6740_v42 = vpop.eup %6739  ;;  %v3636_v57 = vmul.f32 %v6738_v41, %v7870_v19  ;;  %v4524_v58 = vpop.xlane.xlu1 %4523  ;;  %v2604_v27 = vadd.f32 %v2603_v44, %v2602_v50  ;;  %v2945_v13 = vadd.f32 %v2944_v2, %v2943_v38  ;;  %v3290_v0 = vrot.slane %v3289_v14, 4  ;;  %v7874_v38 = vld [vmem:[#allocation16_spill] sm:$0xff] }
0x196b   :  { %v7773_v52 = vmul.f32 %v6740_v42, %v7871_v25  ;;  %6749 = vrcp.f32 %v4524_v58  ;;  %v2260_v53 = vmul.f32 0.125, %v2258_v59  ;;  %v2607_v48 = vmul.f32 0.125, %v2599_v1 }
0x196c   :  { %v2605_v30 = vrot.slane %v2604_v27, 1  ;;  %v2946_v61 = vrot.slane %v2945_v13, 1  ;;  %v2951_v39 = vrot.slane %v2950_v40, 2  ;;  %v3291_v55 = vadd.f32 %v3290_v0, %v3289_v14 }
0x196d   :  { %v6742_v16 = vpop.eup %6741  ;;  %v5772_v23 = vsel %vm5743_vm4, %v2260_v53, %v2259_v63  ;;  %v3296_v31 = vsel %vm179_vm2, %v3288_v37, 0.0  ;;  %v3637_v28 = vsel %vm179_vm2, %v7749_v21, 0.0  ;;  %v3644_v4 = vsel %vm179_vm2, %v3636_v57, 0.0 }
0x196e   :  { %v6744_v17 = vpop.eup %6743  ;;  %v3984_v54 = vmul.f32 %v6742_v16, %v7872_v12  ;;  %5773 = vrot.lane.b32.xlu1 %v5772_v23, %s6889_s28  ;;  %v4872_v56 = vpop.xlane.xlu1 %4871  ;;  %v2606_v60 = vadd.f32 %v2605_v30, %v2604_v27  ;;  %v2947_v20 = vadd.f32 %v2946_v61, %v2945_v13  ;;  %v2952_v26 = vadd.f32 %v2951_v39, %v2950_v40  ;;  %v7875_v40 = vld [vmem:[#allocation17_spill] sm:$0xff]  ;;  %v7876_v16 = vld [vmem:[#allocation19_spill] sm:$0xff] }
0x196f   :  { %v7783_v49 = vmul.f32 %v6744_v17, %v7873_v3  ;;  %6751 = vrcp.f32 %v4872_v56  ;;  %v3292_v18 = vrot.slane %v3291_v55, 2  ;;  %v3297_v63 = vrot.slane %v3296_v31, 4 }
0x1970   :  { %v2608_v45 = vmul.f32 0.125, %v2606_v60  ;;  %v2953_v29 = vrot.slane %v2952_v26, 1  ;;  %v2955_v21 = vmul.f32 0.125, %v2947_v20  ;;  %v3638_v33 = vrot.slane %v3637_v28, 4 }
0x1971   :  { %v6746_v6 = vpop.eup %6745  ;;  %v3293_v51 = vadd.f32 %v3292_v18, %v3291_v55  ;;  %v3298_v43 = vadd.f32 %v3297_v63, %v3296_v31  ;;  %v3645_v36 = vrot.slane %v3644_v4, 4  ;;  %v3985_v5 = vsel %vm179_vm2, %v7757_v47, 0.0 }
0x1972   :  { %v6748_v9 = vpop.eup %6747  ;;  %v4332_v34 = vmul.f32 %v6746_v6, %v7874_v38  ;;  %v5778_v7 = vsel %vm5743_vm4, %v2608_v45, %v2607_v48  ;;  %v5220_v37 = vpop.xlane.xlu1 %5219  ;;  %v2954_v46 = vadd.f32 %v2953_v29, %v2952_v26  ;;  %v3639_v62 = vadd.f32 %v3638_v33, %v3637_v28 }
0x1973   :  { %v7790_v50 = vmul.f32 %v6748_v9, %v7633_v8  ;;  %5779 = vrot.lane.b32.xlu0 %v5778_v7, %s6887_s26  ;;  %6753 = vrcp.f32 %v5220_v37  ;;  %v3294_v35 = vrot.slane %v3293_v51, 1  ;;  %v3299_v24 = vrot.slane %v3298_v43, 2 }
0x1974   :  { %v2956_v11 = vmul.f32 0.125, %v2954_v46  ;;  %v3640_v10 = vrot.slane %v3639_v62, 2  ;;  %v3646_v15 = vadd.f32 %v3645_v36, %v3644_v4  ;;  %v3986_v47 = vrot.slane %v3985_v5, 4 }
0x1975   :  { %v6750_v44 = vpop.eup %6749  ;;  %v3295_v2 = vadd.f32 %v3294_v35, %v3293_v51  ;;  %v3300_v41 = vadd.f32 %v3299_v24, %v3298_v43  ;;  %v3992_v59 = vsel %vm179_vm2, %v3984_v54, 0.0  ;;  %v4333_v1 = vsel %vm179_vm2, %v7764_v22, 0.0 }
0x1976   :  { %v4680_v8 = vmul.f32 %v6750_v44, %v7875_v40  ;;  %v5784_v14 = vsel %vm5743_vm4, %v2956_v11, %v2955_v21  ;;  %v3641_v42 = vadd.f32 %v3640_v10, %v3639_v62  ;;  %v3647_v19 = vrot.slane %v3646_v15, 2 }
0x1977   :  { %5785 = vrot.lane.b32.xlu1 %v5784_v14, %s6885_s24  ;;  %v3301_v57 = vrot.slane %v3300_v41, 1  ;;  %v3303_v58 = vmul.f32 0.125, %v3295_v2  ;;  %v3987_v27 = vadd.f32 %v3986_v47, %v3985_v5  ;;  %v3993_v13 = vrot.slane %v3992_v59, 4 }
0x1978   :  { %v3642_v0 = vrot.slane %v3641_v42, 1  ;;  %v3648_v25 = vadd.f32 %v3647_v19, %v3646_v15  ;;  %v4334_v53 = vrot.slane %v4333_v1, 4  ;;  %v4340_v48 = vsel %vm179_vm2, %v4332_v34, 0.0 }
0x1979   :  { %v6752_v30 = vpop.eup %6751  ;;  %v3302_v61 = vadd.f32 %v3301_v57, %v3300_v41  ;;  %v3988_v22 = vrot.slane %v3987_v27, 2  ;;  %v3994_v39 = vadd.f32 %v3993_v13, %v3992_v59  ;;  %v4341_v55 = vrot.slane %v4340_v48, 4 }
0x197a   :  { %v5028_v23 = vmul.f32 %v6752_v30, %v7876_v16  ;;  %v3643_v31 = vadd.f32 %v3642_v0, %v3641_v42  ;;  %v3649_v28 = vrot.slane %v3648_v25, 1  ;;  %v4335_v4 = vadd.f32 %v4334_v53, %v4333_v1 }
0x197b   :  { %v3304_v17 = vmul.f32 0.125, %v3302_v61  ;;  %v3989_v12 = vadd.f32 %v3988_v22, %v3987_v27  ;;  %v3995_v54 = vrot.slane %v3994_v39, 2  ;;  %v4342_v56 = vadd.f32 %v4341_v55, %v4340_v48 }
0x197c   :  { %v3650_v60 = vadd.f32 %v3649_v28, %v3648_v25  ;;  %v3651_v20 = vmul.f32 0.125, %v3643_v31  ;;  %v4336_v26 = vrot.slane %v4335_v4, 2  ;;  %v4681_v3 = vsel %vm179_vm2, %v7773_v52, 0.0 }
0x197d   :  { %v6754_v18 = vpop.eup %6753  ;;  %v5790_v63 = vsel %vm5743_vm4, %v3304_v17, %v3303_v58  ;;  %v3990_v45 = vrot.slane %v3989_v12, 1  ;;  %v3996_v29 = vadd.f32 %v3995_v54, %v3994_v39  ;;  %v4343_v21 = vrot.slane %v4342_v56, 2 }
0x197e   :  { %v5376_v33 = vmul.f32 %v6754_v18, %v7627_v32  ;;  %5791 = vrot.lane.b32.xlu0 %v5790_v63, %s6883_s22  ;;  %v3652_v6 = vmul.f32 0.125, %v3650_v60  ;;  %v4337_v51 = vadd.f32 %v4336_v26, %v4335_v4  ;;  %v4682_v43 = vrot.slane %v4681_v3, 4  ;;  %v5880_v26 = vld [vmem:[#allocation7] sm:$0xff] }
0x197f   :  { %v3991_v36 = vadd.f32 %v3990_v45, %v3989_v12  ;;  %v3997_v5 = vrot.slane %v3996_v29, 1  ;;  %v4344_v9 = vadd.f32 %v4343_v21, %v4342_v56  ;;  %v4688_v38 = vsel %vm179_vm2, %v4680_v8, 0.0  ;;  %v5882_v21 = vld [vmem:[#allocation7 + $0x10] sm:$0xff] }
0x1980   :  { %v5796_v52 = vsel %vm5743_vm4, %v3652_v6, %v3651_v20  ;;  %v4338_v34 = vrot.slane %v4337_v51, 1  ;;  %v4683_v7 = vadd.f32 %v4682_v43, %v4681_v3  ;;  %v4689_v37 = vrot.slane %v4688_v38, 4  ;;  %v5881_v3 = vld [vmem:[#allocation7 + $0x8] sm:$0xff] }
0x1981   :  { %5797 = vrot.lane.b32.xlu1 %v5796_v52, %s6881_s20  ;;  %v3998_v46 = vadd.f32 %v3997_v5, %v3996_v29  ;;  %v3999_v62 = vmul.f32 0.125, %v3991_v36  ;;  %v4345_v32 = vrot.slane %v4344_v9, 1  ;;  %v5029_v35 = vsel %vm179_vm2, %v7783_v49, 0.0 }
0x1982   :  { %v4339_v24 = vadd.f32 %v4338_v34, %v4337_v51  ;;  %v4684_v11 = vrot.slane %v4683_v7, 2  ;;  %v4690_v10 = vadd.f32 %v4689_v37, %v4688_v38  ;;  %v5030_v15 = vrot.slane %v5029_v35, 4  ;;  %v5885_v37 = vld [vmem:[#allocation7 + $0x28] sm:$0xff] }
0x1983   :  { %v4000_v47 = vmul.f32 0.125, %v3998_v46  ;;  %v4346_v44 = vadd.f32 %v4345_v32, %v4344_v9  ;;  %v5036_v2 = vsel %vm179_vm2, %v5028_v23, 0.0  ;;  %v5377_v41 = vsel %vm179_vm2, %v7790_v50, 0.0  ;;  %v5886_v32 = vld [vmem:[#allocation7 + $0x30] sm:$0xff] }
0x1984   :  { %v4347_v59 = vmul.f32 0.125, %v4339_v24  ;;  %v4685_v1 = vadd.f32 %v4684_v11, %v4683_v7  ;;  %v4691_v40 = vrot.slane %v4690_v10, 2  ;;  %v5031_v8 = vadd.f32 %v5030_v15, %v5029_v35  ;;  %v5884_v7 = vld [vmem:[#allocation7 + $0x20] sm:$0xff]  ;;  %v5887_v35 = vld [vmem:[#allocation7 + $0x38] sm:$0xff] }
0x1985   :  { %v5802_v14 = vsel %vm5743_vm4, %v4000_v47, %v3999_v62  ;;  %v4348_v42 = vmul.f32 0.125, %v4346_v44  ;;  %v5037_v19 = vrot.slane %v5036_v2, 4  ;;  %v5378_v49 = vrot.slane %v5377_v41, 4 }
0x1986   :  { %5803 = vrot.lane.b32.xlu0 %v5802_v14, %s6879_s18  ;;  %v4686_v57 = vrot.slane %v4685_v1, 1  ;;  %v4692_v58 = vadd.f32 %v4691_v40, %v4690_v10  ;;  %v5032_v27 = vrot.slane %v5031_v8, 2  ;;  %v5384_v13 = vsel %vm179_vm2, %v5376_v33, 0.0  ;;  %v5883_v33 = vld [vmem:[#allocation7 + $0x18] sm:$0xff] }
0x1987   :  { %v5808_v0 = vsel %vm5743_vm4, %v4348_v42, %v4347_v59  ;;  %v5038_v25 = vadd.f32 %v5037_v19, %v5036_v2  ;;  %v5379_v50 = vadd.f32 %v5378_v49, %v5377_v41  ;;  %v5385_v53 = vrot.slane %v5384_v13, 4  ;;  %v7877_v2 = vld [vmem:[#allocation13_spill] sm:$0xff]  ;;  %v7878_v42 = vld [vmem:[#allocation12_spill] sm:$0xff] }
0x1988   :  { %5809 = vrot.lane.b32.xlu1 %v5808_v0, %s6877_s16  ;;  %v4687_v48 = vadd.f32 %v4686_v57, %v4685_v1  ;;  %v4693_v30 = vrot.slane %v4692_v58, 1  ;;  %v5033_v61 = vadd.f32 %v5032_v27, %v5031_v8  ;;  %v6584_v6 = vpack.c.bf16 %v5881_v3, %v5880_v26 }
0x1989   :  { %v5039_v22 = vrot.slane %v5038_v25, 2  ;;  %v5380_v39 = vrot.slane %v5379_v50, 2  ;;  %v5386_v55 = vadd.f32 %v5385_v53, %v5384_v13  ;;  %v6897_v5 = vmov 0.0|0.0  }
0x198a   :  { %v4694_v16 = vadd.f32 %v4693_v30, %v4692_v58  ;;  %v5034_v23 = vrot.slane %v5033_v61, 1  ;;  %v4695_v17 = vmul.f32 0.125, %v4687_v48  ;;  %6583 = vmatprep.subr.bf16.mxu1 %v6897_v5  ;;  %v6587_v9 = vpack.c.bf16 %v5883_v33, %v5882_v21 }
0x198b   :  { %v5040_v31 = vadd.f32 %v5039_v22, %v5038_v25  ;;  %v5381_v28 = vadd.f32 %v5380_v39, %v5379_v50  ;;  %v5387_v4 = vrot.slane %v5386_v55, 2  ;;  %6585 = vmatpush3.bf16.msra.mxu1 %v6584_v6  ;;  %v6590_v62 = vpack.c.bf16 %v5885_v37, %v5884_v7 }
0x198c   :  { %v4696_v12 = vmul.f32 0.125, %v4694_v16  ;;  %v5035_v54 = vadd.f32 %v5034_v23, %v5033_v61  ;;  %6586 = vmatprep.subr.bf16.mxu1 %v6897_v5  ;;  %v6593_v24 = vpack.c.bf16 %v5887_v35, %v5886_v32 }
0x198d   :  { %v5041_v56 = vrot.slane %v5040_v31, 1  ;;  %v5382_v60 = vrot.slane %v5381_v28, 1  ;;  %v5388_v20 = vadd.f32 %v5387_v4, %v5386_v55 }
0x198e   :  { %v5814_v18 = vsel %vm5743_vm4, %v4696_v12, %v4695_v17  ;;  %v5043_v51 = vmul.f32 0.125, %v5035_v54 }
0x198f   :  { %5815 = vrot.lane.b32.xlu0 %v5814_v18, %s6875_s14  ;;  %v5042_v63 = vadd.f32 %v5041_v56, %v5040_v31  ;;  %v5383_v45 = vadd.f32 %v5382_v60, %v5381_v28  ;;  %v5389_v29 = vrot.slane %v5388_v20, 1  ;;  %6588 = vmatpush3.bf16.msra.mxu1 %v6587_v9 }
0x1990   :  { %6589 = vmatprep.subr.bf16.mxu1 %v6897_v5 }
0x1991   :  { %v5044_v43 = vmul.f32 0.125, %v5042_v63  ;;  %v5390_v36 = vadd.f32 %v5389_v29, %v5388_v20  ;;  %v5391_v52 = vmul.f32 0.125, %v5383_v45 }
0x1993   :  { %v5820_v38 = vsel %vm5743_vm4, %v5044_v43, %v5043_v51  ;;  %v5392_v34 = vmul.f32 0.125, %v5390_v36  ;;  %6591 = vmatpush3.bf16.msra.mxu1 %v6590_v62 }
0x1994   :  { %5821 = vrot.lane.b32.xlu1 %v5820_v38, %s6873_s12  ;;  %6592 = vmatprep.subr.bf16.mxu1 %v6897_v5 }
0x1995   :  { %v5826_v46 = vsel %vm5743_vm4, %v5392_v34, %v5391_v52 }
0x1996   :  { %5827 = vrot.lane.b32.xlu0 %v5826_v46, %s6871_s10 }
0x1997   :  { %6594 = vmatpush3.bf16.msra.mxu1 %v6593_v24 }
0x199c   :  { %v5568_v11 = vpop.xlane.xlu1 %5567 }
0x19a0   :  { %v351_v10 = vpop.xlane.xlu1 %350 }
0x19a1   :  { %6755 = vrcp.f32 %v351_v10 }
0x19a7   :  { %v5565_v15 = vpop.xlane.xlu0 %5564 }
0x19ab   :  { %v6756_v47 = vpop.eup %6755  ;;  %v348_v44 = vpop.xlane.xlu0 %347 }
0x19ac   :  { %v501_v41 = vmul.f32 %v6756_v47, %v7877_v2  ;;  %6757 = vrcp.f32 %v348_v44 }
0x19ad   :  { %6759 = vrcp.f32 %v5568_v11 }
0x19ae   :  { %v509_v59 = vsel %vm179_vm2, %v501_v41, 0.0  ;;  %6761 = vrcp.f32 %v5565_v15 }
0x19af   :  { %v510_v1 = vrot.slane %v509_v59, 4 }
0x19b1   :  { %v511_v40 = vadd.f32 %v510_v1, %v509_v59 }
0x19b3   :  { %v512_v14 = vrot.slane %v511_v40, 2 }
0x19b5   :  { %v513_v58 = vadd.f32 %v512_v14, %v511_v40 }
0x19b6   :  { %v6758_v8 = vpop.eup %6757 }
0x19b7   :  { %v500_v19 = vmul.f32 %v6758_v8, %v7878_v42  ;;  %v514_v0 = vrot.slane %v513_v58, 1  ;;  %v6760_v39 = vpop.eup %6759 }
0x19b8   :  { %v6762_v17 = vpop.eup %6761 }
0x19b9   :  { %v502_v49 = vsel %vm179_vm2, %v500_v19, 0.0  ;;  %v515_v53 = vadd.f32 %v514_v0, %v513_v58 }
0x19ba   :  { %v503_v57 = vrot.slane %v502_v49, 4 }
0x19bb   :  { %v518_v61 = vmul.f32 0.125, %v515_v53 }
0x19bc   :  { %v504_v27 = vadd.f32 %v503_v57, %v502_v49 }
0x19be   :  { %v505_v13 = vrot.slane %v504_v27, 2 }
0x19c0   :  { %v506_v25 = vadd.f32 %v505_v13, %v504_v27  ;;  %v6763_v13 = vld [vmem:[#allocation2] sm:$0xff] }
0x19c1   :  { %v5864_v0 = vsel %vm92_vm0, %v6763_v13, 0.0 }
0x19c2   :  { %v507_v50 = vrot.slane %v506_v25, 1  ;;  %v5865_v53 = vrot.slane %v5864_v0, 4 }
0x19c4   :  { %v508_v48 = vadd.f32 %v507_v50, %v506_v25  ;;  %v6764_v25 = vld [vmem:[#allocation2 + $0x8] sm:$0xff] }
0x19c5   :  { %v5871_v50 = vsel %vm92_vm0, %v6764_v25, 0.0 }
0x19c6   :  { %v517_v30 = vmul.f32 0.125, %v508_v48  ;;  %v5872_v48 = vrot.slane %v5871_v50, 4 }
0x19c8   :  { %v5744_v22 = vsel %vm5743_vm4, %v518_v61, %v517_v30  ;;  %v5866_v30 = vadd.f32 %v5865_v53, %v5864_v0  ;;  %v5873_v61 = vadd.f32 %v5872_v48, %v5871_v50 }
0x19ce   :  { %v5750_v9 = vpop.permute.xlu0 %5749 }
0x19cf   :  { %v5836_v62 = vsel %vm179_vm2, %v5744_v22, %v5750_v9  ;;  %v5867_v22 = vrot.slane %v5866_v30, 2 }
0x19d2   :  { %v5756_v5 = vpop.permute.xlu1 %5755 }
0x19d3   :  { %v5837_v32 = vsel %vm333_vm3, %v5836_v62, %v5756_v5 }
0x19d7   :  { %v5762_v38 = vpop.permute.xlu1 %5761 }
0x19d8   :  { %v5839_v24 = vsel %vm5838_vm5, %v5837_v32, %v5762_v38 }
0x19db   :  { %v5768_v52 = vpop.permute.xlu0 %5767 }
0x19dc   :  { %v5841_v10 = vsel %vm5840_vm6, %v5839_v24, %v5768_v52 }
0x19e0   :  { %v5774_v34 = vpop.permute.xlu1 %5773 }
0x19e1   :  { %v5843_v15 = vsel %vm5842_vm7, %v5841_v10, %v5774_v34 }
0x19e2   :  { %v5719_v55 = vpop.f32.mrb[64].mxu0 }
0x19e3   :  { %v5724_v16 = vmul.f32 %v6760_v39, %v5719_v55  ;;  %v6547_v23 = vpop.f32.mrb[65].mxu0  ;;  %v5874_v39 = vrot.slane %v5873_v61, 2  ;;  %v5868_v55 = vadd.f32 %v5867_v22, %v5866_v30 }
0x19e5   :  { %v5732_v31 = vsel %vm179_vm2, %v5724_v16, 0.0  ;;  %v5780_v7 = vpop.permute.xlu0 %5779  ;;  %v5875_v16 = vadd.f32 %v5874_v39, %v5873_v61  ;;  %v5869_v23 = vrot.slane %v5868_v55, 1 }
0x19e6   :  { %v5733_v28 = vrot.slane %v5732_v31, 4  ;;  %v5845_v47 = vsel %vm5844_vm8, %v5843_v15, %v5780_v7 }
0x19e8   :  { %v5734_v4 = vadd.f32 %v5733_v28, %v5732_v31  ;;  %v5876_v31 = vrot.slane %v5875_v16, 1  ;;  %v5870_v28 = vadd.f32 %v5869_v23, %v5868_v55 }
0x19e9   :  { %v5786_v37 = vpop.permute.xlu1 %5785 }
0x19ea   :  { %v5735_v12 = vrot.slane %v5734_v4, 2  ;;  %v5847_v2 = vsel %vm5846_vm9, %v5845_v47, %v5786_v37 }
0x19ec   :  { %v5643_v54 = vpop.f32.mrb[64].mxu1  ;;  %v5736_v26 = vadd.f32 %v5735_v12, %v5734_v4  ;;  %v5877_v4 = vadd.f32 %v5876_v31, %v5875_v16 }
0x19ed   :  { %v5723_v56 = vmul.f32 %v6762_v17, %v5643_v54  ;;  %v6542_v60 = vpop.f32.mrb[65].mxu1  ;;  %v5878_v17 = vmul.f32 0.125, %v5870_v28 }
0x19ee   :  { %v5737_v63 = vrot.slane %v5736_v26, 1  ;;  %v5879_v12 = vmul.f32 0.125, %v5877_v4 }
0x19ef   :  { %v5725_v20 = vsel %vm179_vm2, %v5723_v56, 0.0  ;;  %vm5862_vm2 = vcmask 490496   ;;  %v6089_v56 = vld [vmem:[%s7859_s4] ss:$0 sm:$0xff] }
0x19f0   :  { %v5726_v3 = vrot.slane %v5725_v20, 4  ;;  %v5738_v21 = vadd.f32 %v5737_v63, %v5736_v26  ;;  %v5792_v46 = vpop.permute.xlu0 %5791  ;;  %v5970_v54 = vsel %vm5743_vm4, %v5879_v12, %v5878_v17 }
0x19f1   :  { %v5849_v59 = vsel %vm5848_vm10, %v5847_v2, %v5792_v46 }
0x19f2   :  { %v5727_v18 = vadd.f32 %v5726_v3, %v5725_v20  ;;  %v5740_v43 = vmul.f32 0.125, %v5738_v21 }
0x19f3   :  { %v5798_v35 = vpop.permute.xlu1 %5797 }
0x19f4   :  { %v5728_v45 = vrot.slane %v5727_v18, 2  ;;  %v5851_v1 = vsel %vm5850_vm11, %v5849_v59, %v5798_v35 }
0x19f6   :  { %v5729_v29 = vadd.f32 %v5728_v45, %v5727_v18 }
0x19f8   :  { %v5730_v33 = vrot.slane %v5729_v29, 1  ;;  %v5804_v11 = vpop.permute.xlu0 %5803 }
0x19f9   :  { %v5853_v40 = vsel %vm5852_vm12, %v5851_v1, %v5804_v11 }
0x19fa   :  { %v5731_v6 = vadd.f32 %v5730_v33, %v5729_v29  ;;  %v5810_v44 = vpop.permute.xlu1 %5809 }
0x19fb   :  { %v5855_v14 = vsel %vm5854_vm13, %v5853_v40, %v5810_v44 }
0x19fc   :  { %v5739_v51 = vmul.f32 0.125, %v5731_v6 }
0x19fe   :  { %v5832_v36 = vsel %vm5743_vm4, %v5740_v43, %v5739_v51 }
0x19ff   :  { %5833 = vrot.lane.b32.xlu1 %v5832_v36, %s6869_s9  ;;  %s6898_s9 = smov [#allocation8]  }
0x1a00   :  { %s5981_s10 = sshll.u32 %s6898_s9, 4  ;;  %s5982_s10 = int_to_ptr.vmem [resolvable:$true] %s5981_s10 }
0x1a01   :  { %v5816_v41 = vpop.permute.xlu0 %5815  ;;  %s6831_s11 = scalar_lea.vmem %s5982_s10, 32  ;;  %p6836_p11 = scmp.lt.s32.totalorder %s5982_s10, %s5982_s10 }
0x1a02   :  { %v5857_v19 = vsel %vm5856_vm14, %v5855_v14, %v5816_v41  ;;  %p6832_p10 = scmp.ne.s32.totalorder %s5982_s10, %s6831_s11  ;;  %p6837_p12 = scmp.lt.s32.totalorder %s6831_s11, %s6831_s11 }
0x1a04   :  { %p6838_p13 = por %p6837_p12, %p6836_p11 }
0x1a06   :  { %v5822_v8 = vpop.permute.xlu1 %5821  ;;  %p6839_p0 = pnand %p6838_p13, %p6832_p10 }
0x1a07   :  { %v5859_v49 = vsel %vm5858_vm15, %v5857_v19, %v5822_v8 }
0x1a08   :  { %v5828_v42 = vpop.permute.xlu0 %5827 }
0x1a09   :  { %v5861_v57 = vsel %vm5860_vm1, %v5859_v49, %v5828_v42 }
0x1a71   :  { %v5834_v58 = vpop.permute.xlu1 %5833 }
0x1a72   :  { %v5863_v27 = vsel %vm5862_vm2, %v5861_v57, %v5834_v58 }
0x1a73   :  { %6565 = vmatmul.mubr.msk.f32.vlgmr.msra.gmra.mrb[66].mxu1 %vm92_vm0, %v5863_v27  ;;  %vm5973_vm0 = vcmask 517120  }
0x1b46   :  { %v5964_v60 = vpop.f32.mrb[66].mxu1 }
0x1b47   :  { %v5965_v20 = vadd.f32 %v6089_v56, %v5964_v60  ;;  %v6566_v26 = vpop.f32.mrb[67].mxu1 }
0x1b49   :  { %v5972_v3 = vadd.f32 %v5970_v54, %v5965_v20 }
0x1b4b   :  { %5974 = vst.msk [vmem:[#allocation8] sm:$0x3] %vm5973_vm0, %v5972_v3 }
0x1b4c   :  { %6842 = shalt.err (!%p6839_p0)
}
0x1b4d   :  { %s6843_s4 = scalar_lea.hbm %s7860_s5, 32 }
0x1b4e   :  { %p6844_p1 = scmp.ne.s32.totalorder %s7860_s5, %s6843_s4  ;;  %p6847_p2 = scmp.lt.u32.totalorder %s6843_s4, %s7860_s5 }
0x1b50   :  { %p6849_p3 = pnand %p6847_p2, %p6844_p1 }
0x1b52   :  { %6852 = shalt.err (!%p6849_p3)
}
0x1b53   :  { %5984 = dma.vmem_to_hbm [thread:$0]  %s5982_s10, 32, %s7860_s5, [#allocation4]  }
0x1b54   :  { %6857 = dma.done.wait [#allocation4], 32  }
0x1b55   :  { %6858 = vsyncadd [#allocation4], 4294967264 }
0x1b56   :  { %5988 = vsyncpa [#allocation3], 1 }
0x1b57   :  { %5989 = vsyncpa [#allocation6], 1 }
0x1b58   :  { %5990 = vsyncpa [#allocation4], 1 }

</bundles_post_ra>
